<compile_context>
chip_gen: v5e
topology: v5e:2x2
jax: 0.10.0
libtpu: 0.0.40
codegen_flags: <defaults>
</compile_context>

<pallas_src>
import functools

import numpy as np

import jax
import jax.numpy as jnp
from jax.experimental import pallas as pl
from jax.experimental.pallas import tpu as pltpu

F32 = jnp.float32
_SQRT_HALF = 0.7071067811865476  # sqrt(0.5), matches torch.sqrt(FloatTensor([0.5]))


def _vmem_specs(n):
    return [pl.BlockSpec(memory_space=pltpu.MemorySpace.VMEM) for _ in range(n)]


# ----------------------------------------------------------------------------
# Static helper matrices for the fused TCN kernel (built with numpy from
# static shapes, baked into the jaxpr as constants).
# ----------------------------------------------------------------------------
def _shift_matrix(s, B, T):
    """Right-multiply selection matrix implementing a causal shift by `s`
    within each length-T batch segment of a (C, B*T) activation:
      (X @ S)[:, b*T + t] = X[:, b*T + t - s]   if t >= s else 0."""
    BT = B * T
    S = np.zeros((BT, BT), np.float32)
    for m in range(BT):
        if (m % T) >= s:
            S[m - s, m] = 1.0
    return S


def _last_matrix(B, T):
    """(B*T, B) selector extracting the last time step of each batch segment."""
    P = np.zeros((B * T, B), np.float32)
    for b in range(B):
        P[b * T + T - 1, b] = 1.0
    return P


# ----------------------------------------------------------------------------
# Kernel 1: fused wide encoder
#   sigmoid(proj([wide | onehot(week) | onehot(session) | onehot(minute)]))
#   -> FeatureTransformer(proj_dim -> 128) -> FT(128 -> 64) -> FT(64 -> out)
# One-hot matmuls are done in-kernel (one_hot(k) @ W == W[:, k] gather), so no
# XLA one_hot/concatenate glue ops exist outside the kernel.
# ----------------------------------------------------------------------------
def _make_wide_kernel(week_class, session_class, minute_class):
    def kernel(*refs):
        (wide_ref, wk_ref, ss_ref, mn_ref,
         wpw, wpk, wps, wpm, bp) = refs[:9]
        ft_refs = [refs[9 + 6 * i: 9 + 6 * (i + 1)] for i in range(3)]
        o_ref = refs[27]

        B = wide_ref.shape[1]

        def one_hot(idx_ref, n):
            iota = jax.lax.broadcasted_iota(jnp.int32, (n, B), 0)
            return (iota == idx_ref[...]).astype(jnp.float32)  # (n, B)

        pre = (jnp.dot(wpw[...], wide_ref[...], preferred_element_type=jnp.float32)
               + jnp.dot(wpk[...], one_hot(wk_ref, week_class),
                         preferred_element_type=jnp.float32)
               + jnp.dot(wps[...], one_hot(ss_ref, session_class),
                         preferred_element_type=jnp.float32)
               + jnp.dot(wpm[...], one_hot(mn_ref, minute_class),
                         preferred_element_type=jnp.float32)
               + bp[...])
        h = jax.nn.sigmoid(pre)  # (proj_dim, B); dropout = identity (inference)

        def feature_transformer(x, w, b, w1, b1, w2, b2):
            # h = fc(x); out = (h + sigmoid(fc1(h)) * fc2(h)) * sqrt(0.5)
            hh = jnp.dot(w[...], x, preferred_element_type=jnp.float32) + b[...]
            sig = jax.nn.sigmoid(
                jnp.dot(w1[...], hh, preferred_element_type=jnp.float32) + b1[...])
            g = jnp.dot(w2[...], hh, preferred_element_type=jnp.float32) + b2[...]
            return (hh + sig * g) * _SQRT_HALF

        for fr in ft_refs:
            h = feature_transformer(h, *fr)
        o_ref[...] = h.astype(o_ref.dtype)

    return kernel


def wide_encoder(params, wide_col, week, sess, minute, cfg):
    B = wide_col.shape[1]
    inputs = [wide_col, week, sess, minute,
              params["proj_w_wide"], params["proj_w_week"],
              params["proj_w_sess"], params["proj_w_min"], params["proj_b"]]
    for name in ("ft1", "ft2", "ft3"):
        f = params[name]
        inputs += [f["w"], f["b"], f["w1"], f["b1"], f["w2"], f["b2"]]
    kernel = _make_wide_kernel(cfg["week_class"], cfg["session_class"],
                               cfg["minute_class"])
    return pl.pallas_call(
        kernel,
        out_shape=jax.ShapeDtypeStruct((cfg["wide_output_dim"], B), F32),
        in_specs=_vmem_specs(len(inputs)),
        out_specs=pl.BlockSpec(memory_space=pltpu.MemorySpace.VMEM),
    )(*inputs)


# ----------------------------------------------------------------------------
# Kernel 2: fused TCN sequence encoder.
# Activations live in (channels, B*T) layout (batch*time on lanes).  Each
# causal dilated-conv tap is one matmul; the causal left-padding / Chomp1d is
# realised by the static shift selection matrices (zero where t < shift).
# ----------------------------------------------------------------------------
def _make_seq_kernel(block_cfgs, shift_to_idx):
    def kernel(*refs):
        a_ref, pw_ref, pb_ref = refs[0], refs[1], refs[2]
        pos = 3
        blk_refs = []
        for bc in block_cfgs:
            if bc["has_down"]:
                blk_refs.append(tuple(refs[pos:pos + 6]))
                pos += 6
            else:
                blk_refs.append(tuple(refs[pos:pos + 4]) + (None, None))
                pos += 4
        lw_ref, lb_ref, sels_ref, last_ref = refs[pos:pos + 4]
        o_ref = refs[pos + 4]

        # tcn_proj + tanh, already in (C, B*T) layout (no transpose between kernels)
        x = jnp.tanh(
            jnp.dot(pw_ref[...], a_ref[...], preferred_element_type=jnp.float32)
            + pb_ref[...])

        def causal_conv(w_ref, b_ref, xin, K, d):
            cout = w_ref.shape[1]
            acc = jnp.zeros((cout, xin.shape[1]), jnp.float32)
            for k in range(K):
                s = (K - 1 - k) * d
                if s == 0:
                    xs = xin
                else:
                    xs = jnp.dot(xin, sels_ref[shift_to_idx[s]],
                                 preferred_element_type=jnp.float32)
                acc = acc + jnp.dot(w_ref[k], xs,
                                    preferred_element_type=jnp.float32)
            return acc + b_ref[...]

        for bc, (w1, b1, w2, b2, wd, bd) in zip(block_cfgs, blk_refs):
            K, d = bc["K"], bc["d"]
            h1 = jnp.maximum(causal_conv(w1, b1, x, K, d), 0.0)
            if wd is not None:  # 1x1 downsample conv
                res = jnp.dot(wd[...], x, preferred_element_type=jnp.float32) + bd[...]
            else:
                res = x
            h2 = jnp.maximum(causal_conv(w2, b2, h1, K, d), 0.0)
            x = jnp.maximum(h2 + res, 0.0)

        # last time step of every batch segment, then the final linear
        last = jnp.dot(x, last_ref[...], preferred_element_type=jnp.float32)  # (C, B)
        out = jnp.dot(lw_ref[...], last, preferred_element_type=jnp.float32) + lb_ref[...]
        o_ref[...] = out.astype(o_ref.dtype)

    return kernel


def seq_encoder(params, alias_col, B, T, cfg):
    K = cfg["seq_kernel_size"]
    block_cfgs = []
    in_ch = cfg["seq_num_input"]
    for i, out_ch in enumerate(cfg["seq_num_channels"]):
        block_cfgs.append(dict(K=K, d=2 ** i, has_down=(in_ch != out_ch)))
        in_ch = out_ch

    shifts = sorted({(K - 1 - k) * bc["d"] for bc in block_cfgs for k in range(K)} - {0})
    if not shifts:
        shifts = [0]  # dummy (never used; s == 0 is special-cased)
    shift_to_idx = {s: i for i, s in enumerate(shifts)}
    sels = jnp.asarray(np.stack([_shift_matrix(s, B, T) for s in shifts]))
    lastm = jnp.asarray(_last_matrix(B, T))

    inputs = [alias_col, params["tcn_proj_w"], params["tcn_proj_b"]]
    for bc, blk in zip(block_cfgs, params["tcn_blocks"]):
        inputs += [blk["w1"], blk["b1"], blk["w2"], blk["b2"]]
        if bc["has_down"]:
            inputs += [blk["wd"], blk["bd"]]
    inputs += [params["tcn_lin_w"], params["tcn_lin_b"], sels, lastm]

    kernel = _make_seq_kernel(block_cfgs, shift_to_idx)
    return pl.pallas_call(
        kernel,
        out_shape=jax.ShapeDtypeStruct((cfg["seq_output_size"], B), F32),
        in_specs=_vmem_specs(len(inputs)),
        out_specs=pl.BlockSpec(memory_space=pltpu.MemorySpace.VMEM),
    )(*inputs)


# ----------------------------------------------------------------------------
# Kernel 3: fused combine layer + MMOE heads.
# Expert and gate weights are pre-stacked so there is ONE expert matmul and ONE
# gate matmul; the (Tn, B) task output is assembled in registers and written
# with a single store.
# ----------------------------------------------------------------------------
def _make_head_kernel(E, S, Tn):
    def kernel(wide_ref, seq_ref, stock_ref,
               wcw, wcs, wck, bc,
               we, be, wg, bg, wo, bo,
               task_ref, tick_ref):
        B = wide_ref.shape[1]

        tick = (jnp.dot(wcw[...], wide_ref[...], preferred_element_type=jnp.float32)
                + jnp.dot(wcs[...], seq_ref[...], preferred_element_type=jnp.float32)
                + jnp.dot(wck[...], stock_ref[...], preferred_element_type=jnp.float32)
                + bc[...])                                           # (comb, B)

        eh = jnp.maximum(
            jnp.dot(we[...], tick, preferred_element_type=jnp.float32) + be[...], 0.0
        )                                                            # (E*S, B)
        gl = jnp.dot(wg[...], tick, preferred_element_type=jnp.float32) + bg[...]  # (Tn*E, B)

        task = jnp.zeros((Tn, B), jnp.float32)
        row_ids = jax.lax.broadcasted_iota(jnp.int32, (Tn, 1), 0)
        for t in range(Tn):
            g = gl[t * E:(t + 1) * E, :]                             # (E, B)
            g = g - jnp.max(g, axis=0, keepdims=True)
            ge = jnp.exp(g)
            gate = ge * pl.reciprocal(jnp.sum(ge, axis=0, keepdims=True), approx=True)
            mix = jnp.zeros((S, B), jnp.float32)
            for e in range(E):
                mix = mix + eh[e * S:(e + 1) * S, :] * gate[e:e + 1, :]
            row = jnp.dot(wo[t:t + 1, :], mix,
                          preferred_element_type=jnp.float32) + bo[t:t + 1, :]  # (1, B)
            task = task + (row_ids == t).astype(jnp.float32) * row

        task_ref[...] = task.astype(task_ref.dtype)      # single lane-dense store
        tick_ref[...] = tick.astype(tick_ref.dtype)

    return kernel


def combine_mmoe(params, wide_out, seq_out, stock_col, cfg):
    B = wide_out.shape[1]
    comb = cfg["wide_output_dim"] + cfg["seq_output_size"]
    E, Tn, S = cfg["expert_number"], cfg["task_number"], cfg["expert_size"]
    m = params["mmoe"]
    inputs = [wide_out, seq_out, stock_col,
              params["comb_w_wide"], params["comb_w_seq"],
              params["comb_w_stock"], params["comb_b"],
              m["we"], m["be"], m["wg"], m["bg"], m["wo"], m["bo"]]
    kernel = _make_head_kernel(E, S, Tn)
    return pl.pallas_call(
        kernel,
        out_shape=(jax.ShapeDtypeStruct((Tn, B), F32),
                   jax.ShapeDtypeStruct((comb, B), F32)),
        in_specs=_vmem_specs(len(inputs)),
        out_specs=(pl.BlockSpec(memory_space=pltpu.MemorySpace.VMEM),
                   pl.BlockSpec(memory_space=pltpu.MemorySpace.VMEM)),
    )(*inputs)


# ----------------------------------------------------------------------------
# Parameter initialization (deterministic, synthetic).  All linear weights are
# stored in PyTorch (out, in) layout with (out, 1) column biases so the
# feature-major kernels use them directly (W @ x + b).
# ----------------------------------------------------------------------------
def _dense(key, din, dout):
    kw, kb = jax.random.split(key)
    w = jax.random.normal(kw, (dout, din), F32) * (1.0 / float(np.sqrt(din)))
    b = jax.random.normal(kb, (dout, 1), F32) * 0.01
    return w, b


def _ft_params(key, din, dout):
    k0, k1, k2 = jax.random.split(key, 3)
    w, b = _dense(k0, din, dout)
    w1, b1 = _dense(k1, dout, dout)
    w2, b2 = _dense(k2, dout, dout)
    return dict(w=w, b=b, w1=w1, b1=b1, w2=w2, b2=b2)


def _wn_conv(key, cin, cout, K):
    # weight_norm(Conv1d): effective weight = g * v / ||v|| (norm per out channel)
    kv, kg, kb = jax.random.split(key, 3)
    v = jax.random.normal(kv, (cout, cin, K), F32) * 0.01
    g = jnp.abs(jax.random.normal(kg, (cout, 1, 1), F32)) * 0.1 + 0.05
    norm = jnp.sqrt(jnp.sum(v * v, axis=(1, 2), keepdims=True)) + 1e-12
    w = g * v / norm
    b = jax.random.normal(kb, (cout,), F32) * 0.01
    return w.transpose(2, 0, 1), b.reshape(cout, 1)  # (K, Cout, Cin), (Cout, 1)


def init_params(key, cfg):
    keys = iter(jax.random.split(key, 64))
    params = {}

    # --- wide encoder ---
    fd, wc, sc = cfg["feat_dim"], cfg["week_class"], cfg["session_class"]
    wide_in = fd + wc + sc + cfg["minute_class"]
    pw, pb = _dense(next(keys), wide_in, cfg["proj_dim"])
    params["proj_w_wide"] = pw[:, :fd]
    params["proj_w_week"] = pw[:, fd:fd + wc]
    params["proj_w_sess"] = pw[:, fd + wc:fd + wc + sc]
    params["proj_w_min"] = pw[:, fd + wc + sc:]
    params["proj_b"] = pb
    params["ft1"] = _ft_params(next(keys), cfg["proj_dim"], 128)
    params["ft2"] = _ft_params(next(keys), 128, 64)
    params["ft3"] = _ft_params(next(keys), 64, cfg["wide_output_dim"])

    # --- seq encoder (TCN) ---
    ni = cfg["seq_num_input"]
    params["tcn_proj_w"], params["tcn_proj_b"] = _dense(next(keys), ni, ni)
    blocks = []
    K = cfg["seq_kernel_size"]
    in_ch = ni
    for out_ch in cfg["seq_num_channels"]:
        w1, b1 = _wn_conv(next(keys), in_ch, out_ch, K)
        w2, b2 = _wn_conv(next(keys), out_ch, out_ch, K)
        blk = dict(w1=w1, b1=b1, w2=w2, b2=b2)
        if in_ch != out_ch:
            kd, kb2 = jax.random.split(next(keys))
            blk["wd"] = jax.random.normal(kd, (out_ch, in_ch), F32) * 0.01
            blk["bd"] = jax.random.normal(kb2, (out_ch, 1), F32) * 0.01
        blocks.append(blk)
        in_ch = out_ch
    params["tcn_blocks"] = blocks
    params["tcn_lin_w"], params["tcn_lin_b"] = _dense(
        next(keys), cfg["seq_num_channels"][-1], cfg["seq_output_size"])

    # TODO(synk): StockEncoder is not defined in the reference source; implemented
    # as a deterministic (32, stock_class) embedding table (lookup is glue).
    params["stock_emb"] = jax.random.normal(next(keys), (32, cfg["stock_class"]), F32) * 0.1

    # --- combine layer (weight split into [wide | seq | stock] column blocks) ---
    comb = cfg["wide_output_dim"] + cfg["seq_output_size"]
    cw, cb = _dense(next(keys), comb + 32, comb)
    Dw, So = cfg["wide_output_dim"], cfg["seq_output_size"]
    params["comb_w_wide"] = cw[:, :Dw]
    params["comb_w_seq"] = cw[:, Dw:Dw + So]
    params["comb_w_stock"] = cw[:, Dw + So:]
    params["comb_b"] = cb

    # --- MMOE heads (pre-stacked for single matmuls) ---
    E, Tn, S = cfg["expert_number"], cfg["task_number"], cfg["expert_size"]
    we, be = zip(*[_dense(next(keys), comb, S) for _ in range(E)])
    wg, bg = zip(*[_dense(next(keys), comb, E) for _ in range(Tn)])
    wo, bo = zip(*[_dense(next(keys), S, 1) for _ in range(Tn)])
    params["mmoe"] = dict(
        we=jnp.concatenate(we, axis=0), be=jnp.concatenate(be, axis=0),   # (E*S, comb), (E*S, 1)
        wg=jnp.concatenate(wg, axis=0), bg=jnp.concatenate(bg, axis=0),   # (Tn*E, comb), (Tn*E, 1)
        wo=jnp.concatenate(wo, axis=0), bo=jnp.concatenate(bo, axis=0),   # (Tn, S), (Tn, 1)
    )
    return params


# ----------------------------------------------------------------------------
# Forward pass: 3 fused Pallas kernels + minimal raw-input / raw-output glue.
# ----------------------------------------------------------------------------
def light_mmoe_forward(params, x, alias_feats, stock_ids, cfg):
    B = x.shape[0]
    xs = x[:, 0, :]                                        # squeeze(1) -> (B, feat_dim+3)
    wide_col = xs[:, :-3].T                                # (feat_dim, B)
    week = xs[:, -3].astype(jnp.int32).reshape(1, B)
    sess = xs[:, -2].astype(jnp.int32).reshape(1, B)
    minute = xs[:, -1].astype(jnp.int32).reshape(1, B)
    stock_col = params["stock_emb"][:, stock_ids]          # (32, B)

    # --- wide encoder (1 fused kernel) ---
    wide_out = wide_encoder(params, wide_col, week, sess, minute, cfg)   # (Dw, B)

    # --- seq encoder / TCN (1 fused kernel, (C, B*T) layout) ---
    _, T, Ni = alias_feats.shape
    alias_col = jnp.transpose(alias_feats, (2, 0, 1)).reshape(Ni, B * T)
    seq_out = seq_encoder(params, alias_col, B, T, cfg)                  # (Sout, B)

    # --- combine + MMOE (1 fused kernel) ---
    task_col, tick_col = combine_mmoe(params, wide_out, seq_out, stock_col, cfg)

    # back to PyTorch (batch-major) orientation
    return task_col.T, tick_col.T


# ----------------------------------------------------------------------------
# Example run
# ----------------------------------------------------------------------------
if __name__ == "__main__":
    cfg = dict(
        feat_dim=16,
        week_class=7,
        session_class=4,
        minute_class=16,
        proj_dim=32,
        wide_output_dim=16,
        seq_num_input=8,
        seq_output_size=16,
        seq_num_channels=[16, 16],
        seq_kernel_size=2,
        stock_class=10,
        expert_size=16,
        expert_number=3,
        task_number=2,
    )

    key = jax.random.PRNGKey(0)
    kp, kx, kw, ks, km, ka, kid = jax.random.split(key, 7)

    params = init_params(kp, cfg)

    B = 2
    wide_feats = jax.random.normal(kx, (B, 1, cfg["feat_dim"]), F32)
    week = jax.random.randint(kw, (B, 1, 1), 0, cfg["week_class"]).astype(F32)
    session = jax.random.randint(ks, (B, 1, 1), 0, cfg["session_class"]).astype(F32)
    minute = jax.random.randint(km, (B, 1, 1), 0, cfg["minute_class"]).astype(F32)
    x = jnp.concatenate([wide_feats, week, session, minute], axis=-1)       # (B, 1, 19)
    alias_feats = jax.random.normal(ka, (B, 8, cfg["seq_num_input"]), F32)  # (B, T=8, 8)
    stock_ids = jax.random.randint(kid, (B,), 0, cfg["stock_class"])

    fwd = jax.jit(functools.partial(light_mmoe_forward, cfg=cfg))
    task_outputs, tick_x = fwd(params, x, alias_feats, stock_ids)
    jax.block_until_ready((task_outputs, tick_x))

    assert task_outputs.shape == (B, cfg["task_number"])
    assert tick_x.shape == (B, cfg["wide_output_dim"] + cfg["seq_output_size"])
    print("KERNEL_OK")
</pallas_src>

<mosaic_0001>
module attributes {stable_mosaic.version = 11 : i64} {
  func.func @kernel(%arg0: memref<16x2xf32, #tpu.memory_space<vmem>>, %arg1: memref<1x2xi32, #tpu.memory_space<vmem>>, %arg2: memref<1x2xi32, #tpu.memory_space<vmem>>, %arg3: memref<1x2xi32, #tpu.memory_space<vmem>>, %arg4: memref<32x16xf32, #tpu.memory_space<vmem>>, %arg5: memref<32x7xf32, #tpu.memory_space<vmem>>, %arg6: memref<32x4xf32, #tpu.memory_space<vmem>>, %arg7: memref<32x16xf32, #tpu.memory_space<vmem>>, %arg8: memref<32x1xf32, #tpu.memory_space<vmem>>, %arg9: memref<128x32xf32, #tpu.memory_space<vmem>>, %arg10: memref<128x1xf32, #tpu.memory_space<vmem>>, %arg11: memref<128x128xf32, #tpu.memory_space<vmem>>, %arg12: memref<128x1xf32, #tpu.memory_space<vmem>>, %arg13: memref<128x128xf32, #tpu.memory_space<vmem>>, %arg14: memref<128x1xf32, #tpu.memory_space<vmem>>, %arg15: memref<64x128xf32, #tpu.memory_space<vmem>>, %arg16: memref<64x1xf32, #tpu.memory_space<vmem>>, %arg17: memref<64x64xf32, #tpu.memory_space<vmem>>, %arg18: memref<64x1xf32, #tpu.memory_space<vmem>>, %arg19: memref<64x64xf32, #tpu.memory_space<vmem>>, %arg20: memref<64x1xf32, #tpu.memory_space<vmem>>, %arg21: memref<16x64xf32, #tpu.memory_space<vmem>>, %arg22: memref<16x1xf32, #tpu.memory_space<vmem>>, %arg23: memref<16x16xf32, #tpu.memory_space<vmem>>, %arg24: memref<16x1xf32, #tpu.memory_space<vmem>>, %arg25: memref<16x16xf32, #tpu.memory_space<vmem>>, %arg26: memref<16x1xf32, #tpu.memory_space<vmem>>, %arg27: memref<16x2xf32, #tpu.memory_space<vmem>>) attributes {dimension_semantics = [], scalar_prefetch = 0 : i64, scratch_operands = 0 : i64, tpu.core_type = #tpu.core_type<tc>} {
    %c0 = arith.constant 0 : index
    %c0_0 = arith.constant 0 : index
    %0 = vector.load %arg4[%c0, %c0_0] : memref<32x16xf32, #tpu.memory_space<vmem>>, vector<32x16xf32>
    %c0_1 = arith.constant 0 : index
    %c0_2 = arith.constant 0 : index
    %1 = vector.load %arg0[%c0_1, %c0_2] : memref<16x2xf32, #tpu.memory_space<vmem>>, vector<16x2xf32>
    %cst = arith.constant dense<0.000000e+00> : vector<32x2xf32>
    %2 = tpu.matmul %0, %1, %cst {dimension_numbers = #tpu.dot_dimension_numbers<[1], [0], [0], [1], [0, 0, 1, 1], [], []>} : vector<32x16xf32>, vector<16x2xf32>, vector<32x2xf32> -> vector<32x2xf32>
    %c0_3 = arith.constant 0 : index
    %c0_4 = arith.constant 0 : index
    %3 = vector.load %arg5[%c0_3, %c0_4] : memref<32x7xf32, #tpu.memory_space<vmem>>, vector<32x7xf32>
    %4 = tpu.iota {dimensions = array<i32: 0>} : vector<7x2xi32>
    %c0_5 = arith.constant 0 : index
    %c0_6 = arith.constant 0 : index
    %5 = vector.load %arg1[%c0_5, %c0_6] : memref<1x2xi32, #tpu.memory_space<vmem>>, vector<1x2xi32>
    %6 = vector.broadcast %5 : vector<1x2xi32> to vector<7x2xi32>
    %7 = arith.cmpi eq, %4, %6 : vector<7x2xi32>
    %8 = arith.extui %7 : vector<7x2xi1> to vector<7x2xi32>
    %9 = arith.sitofp %8 : vector<7x2xi32> to vector<7x2xf32>
    %cst_7 = arith.constant dense<0.000000e+00> : vector<32x2xf32>
    %10 = tpu.matmul %3, %9, %cst_7 {dimension_numbers = #tpu.dot_dimension_numbers<[1], [0], [0], [1], [0, 0, 1, 1], [], []>} : vector<32x7xf32>, vector<7x2xf32>, vector<32x2xf32> -> vector<32x2xf32>
    %11 = arith.addf %2, %10 : vector<32x2xf32>
    %c0_8 = arith.constant 0 : index
    %c0_9 = arith.constant 0 : index
    %12 = vector.load %arg6[%c0_8, %c0_9] : memref<32x4xf32, #tpu.memory_space<vmem>>, vector<32x4xf32>
    %13 = tpu.iota {dimensions = array<i32: 0>} : vector<4x2xi32>
    %c0_10 = arith.constant 0 : index
    %c0_11 = arith.constant 0 : index
    %14 = vector.load %arg2[%c0_10, %c0_11] : memref<1x2xi32, #tpu.memory_space<vmem>>, vector<1x2xi32>
    %15 = vector.broadcast %14 : vector<1x2xi32> to vector<4x2xi32>
    %16 = arith.cmpi eq, %13, %15 : vector<4x2xi32>
    %17 = arith.extui %16 : vector<4x2xi1> to vector<4x2xi32>
    %18 = arith.sitofp %17 : vector<4x2xi32> to vector<4x2xf32>
    %cst_12 = arith.constant dense<0.000000e+00> : vector<32x2xf32>
    %19 = tpu.matmul %12, %18, %cst_12 {dimension_numbers = #tpu.dot_dimension_numbers<[1], [0], [0], [1], [0, 0, 1, 1], [], []>} : vector<32x4xf32>, vector<4x2xf32>, vector<32x2xf32> -> vector<32x2xf32>
    %20 = arith.addf %11, %19 : vector<32x2xf32>
    %c0_13 = arith.constant 0 : index
    %c0_14 = arith.constant 0 : index
    %21 = vector.load %arg7[%c0_13, %c0_14] : memref<32x16xf32, #tpu.memory_space<vmem>>, vector<32x16xf32>
    %22 = tpu.iota {dimensions = array<i32: 0>} : vector<16x2xi32>
    %c0_15 = arith.constant 0 : index
    %c0_16 = arith.constant 0 : index
    %23 = vector.load %arg3[%c0_15, %c0_16] : memref<1x2xi32, #tpu.memory_space<vmem>>, vector<1x2xi32>
    %24 = vector.broadcast %23 : vector<1x2xi32> to vector<16x2xi32>
    %25 = arith.cmpi eq, %22, %24 : vector<16x2xi32>
    %26 = arith.extui %25 : vector<16x2xi1> to vector<16x2xi32>
    %27 = arith.sitofp %26 : vector<16x2xi32> to vector<16x2xf32>
    %cst_17 = arith.constant dense<0.000000e+00> : vector<32x2xf32>
    %28 = tpu.matmul %21, %27, %cst_17 {dimension_numbers = #tpu.dot_dimension_numbers<[1], [0], [0], [1], [0, 0, 1, 1], [], []>} : vector<32x16xf32>, vector<16x2xf32>, vector<32x2xf32> -> vector<32x2xf32>
    %29 = arith.addf %20, %28 : vector<32x2xf32>
    %c0_18 = arith.constant 0 : index
    %c0_19 = arith.constant 0 : index
    %30 = vector.load %arg8[%c0_18, %c0_19] : memref<32x1xf32, #tpu.memory_space<vmem>>, vector<32x1xf32>
    %31 = vector.broadcast %30 : vector<32x1xf32> to vector<32x2xf32>
    %32 = arith.addf %29, %31 : vector<32x2xf32>
    %33 = arith.negf %32 : vector<32x2xf32>
    %34 = math.exp %33 : vector<32x2xf32>
    %cst_20 = arith.constant 1.000000e+00 : f32
    %35 = vector.broadcast %cst_20 : f32 to vector<32x2xf32>
    %36 = arith.addf %35, %34 : vector<32x2xf32>
    %37 = arith.divf %35, %36 : vector<32x2xf32>
    %c0_21 = arith.constant 0 : index
    %c0_22 = arith.constant 0 : index
    %38 = vector.load %arg9[%c0_21, %c0_22] : memref<128x32xf32, #tpu.memory_space<vmem>>, vector<128x32xf32>
    %cst_23 = arith.constant dense<0.000000e+00> : vector<128x2xf32>
    %39 = tpu.matmul %38, %37, %cst_23 {dimension_numbers = #tpu.dot_dimension_numbers<[1], [0], [0], [1], [0, 0, 1, 1], [], []>} : vector<128x32xf32>, vector<32x2xf32>, vector<128x2xf32> -> vector<128x2xf32>
    %c0_24 = arith.constant 0 : index
    %c0_25 = arith.constant 0 : index
    %40 = vector.load %arg10[%c0_24, %c0_25] : memref<128x1xf32, #tpu.memory_space<vmem>>, vector<128x1xf32>
    %41 = vector.broadcast %40 : vector<128x1xf32> to vector<128x2xf32>
    %42 = arith.addf %39, %41 : vector<128x2xf32>
    %c0_26 = arith.constant 0 : index
    %c0_27 = arith.constant 0 : index
    %43 = vector.load %arg11[%c0_26, %c0_27] : memref<128x128xf32, #tpu.memory_space<vmem>>, vector<128x128xf32>
    %cst_28 = arith.constant dense<0.000000e+00> : vector<128x2xf32>
    %44 = tpu.matmul %43, %42, %cst_28 {dimension_numbers = #tpu.dot_dimension_numbers<[1], [0], [0], [1], [0, 0, 1, 1], [], []>} : vector<128x128xf32>, vector<128x2xf32>, vector<128x2xf32> -> vector<128x2xf32>
    %c0_29 = arith.constant 0 : index
    %c0_30 = arith.constant 0 : index
    %45 = vector.load %arg12[%c0_29, %c0_30] : memref<128x1xf32, #tpu.memory_space<vmem>>, vector<128x1xf32>
    %46 = vector.broadcast %45 : vector<128x1xf32> to vector<128x2xf32>
    %47 = arith.addf %44, %46 : vector<128x2xf32>
    %48 = arith.negf %47 : vector<128x2xf32>
    %49 = math.exp %48 : vector<128x2xf32>
    %cst_31 = arith.constant 1.000000e+00 : f32
    %50 = vector.broadcast %cst_31 : f32 to vector<128x2xf32>
    %51 = arith.addf %50, %49 : vector<128x2xf32>
    %52 = arith.divf %50, %51 : vector<128x2xf32>
    %c0_32 = arith.constant 0 : index
    %c0_33 = arith.constant 0 : index
    %53 = vector.load %arg13[%c0_32, %c0_33] : memref<128x128xf32, #tpu.memory_space<vmem>>, vector<128x128xf32>
    %cst_34 = arith.constant dense<0.000000e+00> : vector<128x2xf32>
    %54 = tpu.matmul %53, %42, %cst_34 {dimension_numbers = #tpu.dot_dimension_numbers<[1], [0], [0], [1], [0, 0, 1, 1], [], []>} : vector<128x128xf32>, vector<128x2xf32>, vector<128x2xf32> -> vector<128x2xf32>
    %c0_35 = arith.constant 0 : index
    %c0_36 = arith.constant 0 : index
    %55 = vector.load %arg14[%c0_35, %c0_36] : memref<128x1xf32, #tpu.memory_space<vmem>>, vector<128x1xf32>
    %56 = vector.broadcast %55 : vector<128x1xf32> to vector<128x2xf32>
    %57 = arith.addf %54, %56 : vector<128x2xf32>
    %58 = arith.mulf %52, %57 : vector<128x2xf32>
    %59 = arith.addf %42, %58 : vector<128x2xf32>
    %cst_37 = arith.constant 0.707106769 : f32
    %60 = vector.broadcast %cst_37 : f32 to vector<128x2xf32>
    %61 = arith.mulf %59, %60 : vector<128x2xf32>
    %c0_38 = arith.constant 0 : index
    %c0_39 = arith.constant 0 : index
    %62 = vector.load %arg15[%c0_38, %c0_39] : memref<64x128xf32, #tpu.memory_space<vmem>>, vector<64x128xf32>
    %cst_40 = arith.constant dense<0.000000e+00> : vector<64x2xf32>
    %63 = tpu.matmul %62, %61, %cst_40 {dimension_numbers = #tpu.dot_dimension_numbers<[1], [0], [0], [1], [0, 0, 1, 1], [], []>} : vector<64x128xf32>, vector<128x2xf32>, vector<64x2xf32> -> vector<64x2xf32>
    %c0_41 = arith.constant 0 : index
    %c0_42 = arith.constant 0 : index
    %64 = vector.load %arg16[%c0_41, %c0_42] : memref<64x1xf32, #tpu.memory_space<vmem>>, vector<64x1xf32>
    %65 = vector.broadcast %64 : vector<64x1xf32> to vector<64x2xf32>
    %66 = arith.addf %63, %65 : vector<64x2xf32>
    %c0_43 = arith.constant 0 : index
    %c0_44 = arith.constant 0 : index
    %67 = vector.load %arg17[%c0_43, %c0_44] : memref<64x64xf32, #tpu.memory_space<vmem>>, vector<64x64xf32>
    %cst_45 = arith.constant dense<0.000000e+00> : vector<64x2xf32>
    %68 = tpu.matmul %67, %66, %cst_45 {dimension_numbers = #tpu.dot_dimension_numbers<[1], [0], [0], [1], [0, 0, 1, 1], [], []>} : vector<64x64xf32>, vector<64x2xf32>, vector<64x2xf32> -> vector<64x2xf32>
    %c0_46 = arith.constant 0 : index
    %c0_47 = arith.constant 0 : index
    %69 = vector.load %arg18[%c0_46, %c0_47] : memref<64x1xf32, #tpu.memory_space<vmem>>, vector<64x1xf32>
    %70 = vector.broadcast %69 : vector<64x1xf32> to vector<64x2xf32>
    %71 = arith.addf %68, %70 : vector<64x2xf32>
    %72 = arith.negf %71 : vector<64x2xf32>
    %73 = math.exp %72 : vector<64x2xf32>
    %cst_48 = arith.constant 1.000000e+00 : f32
    %74 = vector.broadcast %cst_48 : f32 to vector<64x2xf32>
    %75 = arith.addf %74, %73 : vector<64x2xf32>
    %76 = arith.divf %74, %75 : vector<64x2xf32>
    %c0_49 = arith.constant 0 : index
    %c0_50 = arith.constant 0 : index
    %77 = vector.load %arg19[%c0_49, %c0_50] : memref<64x64xf32, #tpu.memory_space<vmem>>, vector<64x64xf32>
    %cst_51 = arith.constant dense<0.000000e+00> : vector<64x2xf32>
    %78 = tpu.matmul %77, %66, %cst_51 {dimension_numbers = #tpu.dot_dimension_numbers<[1], [0], [0], [1], [0, 0, 1, 1], [], []>} : vector<64x64xf32>, vector<64x2xf32>, vector<64x2xf32> -> vector<64x2xf32>
    %c0_52 = arith.constant 0 : index
    %c0_53 = arith.constant 0 : index
    %79 = vector.load %arg20[%c0_52, %c0_53] : memref<64x1xf32, #tpu.memory_space<vmem>>, vector<64x1xf32>
    %80 = vector.broadcast %79 : vector<64x1xf32> to vector<64x2xf32>
    %81 = arith.addf %78, %80 : vector<64x2xf32>
    %82 = arith.mulf %76, %81 : vector<64x2xf32>
    %83 = arith.addf %66, %82 : vector<64x2xf32>
    %cst_54 = arith.constant 0.707106769 : f32
    %84 = vector.broadcast %cst_54 : f32 to vector<64x2xf32>
    %85 = arith.mulf %83, %84 : vector<64x2xf32>
    %c0_55 = arith.constant 0 : index
    %c0_56 = arith.constant 0 : index
    %86 = vector.load %arg21[%c0_55, %c0_56] : memref<16x64xf32, #tpu.memory_space<vmem>>, vector<16x64xf32>
    %cst_57 = arith.constant dense<0.000000e+00> : vector<16x2xf32>
    %87 = tpu.matmul %86, %85, %cst_57 {dimension_numbers = #tpu.dot_dimension_numbers<[1], [0], [0], [1], [0, 0, 1, 1], [], []>} : vector<16x64xf32>, vector<64x2xf32>, vector<16x2xf32> -> vector<16x2xf32>
    %c0_58 = arith.constant 0 : index
    %c0_59 = arith.constant 0 : index
    %88 = vector.load %arg22[%c0_58, %c0_59] : memref<16x1xf32, #tpu.memory_space<vmem>>, vector<16x1xf32>
    %89 = vector.broadcast %88 : vector<16x1xf32> to vector<16x2xf32>
    %90 = arith.addf %87, %89 : vector<16x2xf32>
    %c0_60 = arith.constant 0 : index
    %c0_61 = arith.constant 0 : index
    %91 = vector.load %arg23[%c0_60, %c0_61] : memref<16x16xf32, #tpu.memory_space<vmem>>, vector<16x16xf32>
    %cst_62 = arith.constant dense<0.000000e+00> : vector<16x2xf32>
    %92 = tpu.matmul %91, %90, %cst_62 {dimension_numbers = #tpu.dot_dimension_numbers<[1], [0], [0], [1], [0, 0, 1, 1], [], []>} : vector<16x16xf32>, vector<16x2xf32>, vector<16x2xf32> -> vector<16x2xf32>
    %c0_63 = arith.constant 0 : index
    %c0_64 = arith.constant 0 : index
    %93 = vector.load %arg24[%c0_63, %c0_64] : memref<16x1xf32, #tpu.memory_space<vmem>>, vector<16x1xf32>
    %94 = vector.broadcast %93 : vector<16x1xf32> to vector<16x2xf32>
    %95 = arith.addf %92, %94 : vector<16x2xf32>
    %96 = arith.negf %95 : vector<16x2xf32>
    %97 = math.exp %96 : vector<16x2xf32>
    %cst_65 = arith.constant 1.000000e+00 : f32
    %98 = vector.broadcast %cst_65 : f32 to vector<16x2xf32>
    %99 = arith.addf %98, %97 : vector<16x2xf32>
    %100 = arith.divf %98, %99 : vector<16x2xf32>
    %c0_66 = arith.constant 0 : index
    %c0_67 = arith.constant 0 : index
    %101 = vector.load %arg25[%c0_66, %c0_67] : memref<16x16xf32, #tpu.memory_space<vmem>>, vector<16x16xf32>
    %cst_68 = arith.constant dense<0.000000e+00> : vector<16x2xf32>
    %102 = tpu.matmul %101, %90, %cst_68 {dimension_numbers = #tpu.dot_dimension_numbers<[1], [0], [0], [1], [0, 0, 1, 1], [], []>} : vector<16x16xf32>, vector<16x2xf32>, vector<16x2xf32> -> vector<16x2xf32>
    %c0_69 = arith.constant 0 : index
    %c0_70 = arith.constant 0 : index
    %103 = vector.load %arg26[%c0_69, %c0_70] : memref<16x1xf32, #tpu.memory_space<vmem>>, vector<16x1xf32>
    %104 = vector.broadcast %103 : vector<16x1xf32> to vector<16x2xf32>
    %105 = arith.addf %102, %104 : vector<16x2xf32>
    %106 = arith.mulf %100, %105 : vector<16x2xf32>
    %107 = arith.addf %90, %106 : vector<16x2xf32>
    %cst_71 = arith.constant 0.707106769 : f32
    %108 = vector.broadcast %cst_71 : f32 to vector<16x2xf32>
    %109 = arith.mulf %107, %108 : vector<16x2xf32>
    %c0_72 = arith.constant 0 : index
    %c0_73 = arith.constant 0 : index
    %110 = vector.load %arg27[%c0_72, %c0_73] : memref<16x2xf32, #tpu.memory_space<vmem>>, vector<16x2xf32>
    tpu.vector_store %arg27[%c0_72, %c0_73], %109 {strides = array<i32>} : memref<16x2xf32, #tpu.memory_space<vmem>>, vector<16x2xf32>,
    return
  }
}

module attributes {stable_mosaic.version = 11 : i64} {
  func.func @kernel(%arg0: memref<8x16xf32, #tpu.memory_space<vmem>>, %arg1: memref<8x8xf32, #tpu.memory_space<vmem>>, %arg2: memref<8x1xf32, #tpu.memory_space<vmem>>, %arg3: memref<2x16x8xf32, #tpu.memory_space<vmem>>, %arg4: memref<16x1xf32, #tpu.memory_space<vmem>>, %arg5: memref<2x16x16xf32, #tpu.memory_space<vmem>>, %arg6: memref<16x1xf32, #tpu.memory_space<vmem>>, %arg7: memref<16x8xf32, #tpu.memory_space<vmem>>, %arg8: memref<16x1xf32, #tpu.memory_space<vmem>>, %arg9: memref<2x16x16xf32, #tpu.memory_space<vmem>>, %arg10: memref<16x1xf32, #tpu.memory_space<vmem>>, %arg11: memref<2x16x16xf32, #tpu.memory_space<vmem>>, %arg12: memref<16x1xf32, #tpu.memory_space<vmem>>, %arg13: memref<16x16xf32, #tpu.memory_space<vmem>>, %arg14: memref<16x1xf32, #tpu.memory_space<vmem>>, %arg15: memref<2x16x16xf32, #tpu.memory_space<vmem>>, %arg16: memref<16x2xf32, #tpu.memory_space<vmem>>, %arg17: memref<16x2xf32, #tpu.memory_space<vmem>>) attributes {dimension_semantics = [], scalar_prefetch = 0 : i64, scratch_operands = 0 : i64, tpu.core_type = #tpu.core_type<tc>} {
    %c0 = arith.constant 0 : index
    %c0_0 = arith.constant 0 : index
    %0 = vector.load %arg1[%c0, %c0_0] : memref<8x8xf32, #tpu.memory_space<vmem>>, vector<8x8xf32>
    %c0_1 = arith.constant 0 : index
    %c0_2 = arith.constant 0 : index
    %1 = vector.load %arg0[%c0_1, %c0_2] : memref<8x16xf32, #tpu.memory_space<vmem>>, vector<8x16xf32>
    %cst = arith.constant dense<0.000000e+00> : vector<8x16xf32>
    %2 = tpu.matmul %0, %1, %cst {dimension_numbers = #tpu.dot_dimension_numbers<[1], [0], [0], [1], [0, 0, 1, 1], [], []>} : vector<8x8xf32>, vector<8x16xf32>, vector<8x16xf32> -> vector<8x16xf32>
    %c0_3 = arith.constant 0 : index
    %c0_4 = arith.constant 0 : index
    %3 = vector.load %arg2[%c0_3, %c0_4] : memref<8x1xf32, #tpu.memory_space<vmem>>, vector<8x1xf32>
    %4 = vector.broadcast %3 : vector<8x1xf32> to vector<8x16xf32>
    %5 = arith.addf %2, %4 : vector<8x16xf32>
    %6 = math.tanh %5 : vector<8x16xf32>
    %cst_5 = arith.constant 0.000000e+00 : f32
    %7 = vector.broadcast %cst_5 : f32 to vector<16x16xf32>
    %c0_6 = arith.constant 0 : index
    %c0_7 = arith.constant 0 : index
    %c0_8 = arith.constant 0 : index
    %8 = vector.load %arg15[%c0_6, %c0_7, %c0_8] : memref<2x16x16xf32, #tpu.memory_space<vmem>>, vector<1x16x16xf32>
    %9 = vector.shape_cast %8 : vector<1x16x16xf32> to vector<16x16xf32>
    %cst_9 = arith.constant dense<0.000000e+00> : vector<8x16xf32>
    %10 = tpu.matmul %6, %9, %cst_9 {dimension_numbers = #tpu.dot_dimension_numbers<[1], [0], [0], [1], [0, 0, 1, 1], [], []>} : vector<8x16xf32>, vector<16x16xf32>, vector<8x16xf32> -> vector<8x16xf32>
    %c0_10 = arith.constant 0 : index
    %c0_11 = arith.constant 0 : index
    %c0_12 = arith.constant 0 : index
    %11 = vector.load %arg3[%c0_10, %c0_11, %c0_12] : memref<2x16x8xf32, #tpu.memory_space<vmem>>, vector<1x16x8xf32>
    %12 = vector.shape_cast %11 : vector<1x16x8xf32> to vector<16x8xf32>
    %cst_13 = arith.constant dense<0.000000e+00> : vector<16x16xf32>
    %13 = tpu.matmul %12, %10, %cst_13 {dimension_numbers = #tpu.dot_dimension_numbers<[1], [0], [0], [1], [0, 0, 1, 1], [], []>} : vector<16x8xf32>, vector<8x16xf32>, vector<16x16xf32> -> vector<16x16xf32>
    %14 = arith.addf %7, %13 : vector<16x16xf32>
    %c1 = arith.constant 1 : index
    %c0_14 = arith.constant 0 : index
    %c0_15 = arith.constant 0 : index
    %15 = vector.load %arg3[%c1, %c0_14, %c0_15] : memref<2x16x8xf32, #tpu.memory_space<vmem>>, vector<1x16x8xf32>
    %16 = vector.shape_cast %15 : vector<1x16x8xf32> to vector<16x8xf32>
    %cst_16 = arith.constant dense<0.000000e+00> : vector<16x16xf32>
    %17 = tpu.matmul %16, %6, %cst_16 {dimension_numbers = #tpu.dot_dimension_numbers<[1], [0], [0], [1], [0, 0, 1, 1], [], []>} : vector<16x8xf32>, vector<8x16xf32>, vector<16x16xf32> -> vector<16x16xf32>
    %18 = arith.addf %14, %17 : vector<16x16xf32>
    %c0_17 = arith.constant 0 : index
    %c0_18 = arith.constant 0 : index
    %19 = vector.load %arg4[%c0_17, %c0_18] : memref<16x1xf32, #tpu.memory_space<vmem>>, vector<16x1xf32>
    %20 = vector.broadcast %19 : vector<16x1xf32> to vector<16x16xf32>
    %21 = arith.addf %18, %20 : vector<16x16xf32>
    %cst_19 = arith.constant 0.000000e+00 : f32
    %22 = vector.broadcast %cst_19 : f32 to vector<16x16xf32>
    %23 = arith.maximumf %21, %22 : vector<16x16xf32>
    %c0_20 = arith.constant 0 : index
    %c0_21 = arith.constant 0 : index
    %24 = vector.load %arg7[%c0_20, %c0_21] : memref<16x8xf32, #tpu.memory_space<vmem>>, vector<16x8xf32>
    %cst_22 = arith.constant dense<0.000000e+00> : vector<16x16xf32>
    %25 = tpu.matmul %24, %6, %cst_22 {dimension_numbers = #tpu.dot_dimension_numbers<[1], [0], [0], [1], [0, 0, 1, 1], [], []>} : vector<16x8xf32>, vector<8x16xf32>, vector<16x16xf32> -> vector<16x16xf32>
    %c0_23 = arith.constant 0 : index
    %c0_24 = arith.constant 0 : index
    %26 = vector.load %arg8[%c0_23, %c0_24] : memref<16x1xf32, #tpu.memory_space<vmem>>, vector<16x1xf32>
    %27 = vector.broadcast %26 : vector<16x1xf32> to vector<16x16xf32>
    %28 = arith.addf %25, %27 : vector<16x16xf32>
    %cst_25 = arith.constant 0.000000e+00 : f32
    %29 = vector.broadcast %cst_25 : f32 to vector<16x16xf32>
    %c0_26 = arith.constant 0 : index
    %c0_27 = arith.constant 0 : index
    %c0_28 = arith.constant 0 : index
    %30 = vector.load %arg15[%c0_26, %c0_27, %c0_28] : memref<2x16x16xf32, #tpu.memory_space<vmem>>, vector<1x16x16xf32>
    %31 = vector.shape_cast %30 : vector<1x16x16xf32> to vector<16x16xf32>
    %cst_29 = arith.constant dense<0.000000e+00> : vector<16x16xf32>
    %32 = tpu.matmul %23, %31, %cst_29 {dimension_numbers = #tpu.dot_dimension_numbers<[1], [0], [0], [1], [0, 0, 1, 1], [], []>} : vector<16x16xf32>, vector<16x16xf32>, vector<16x16xf32> -> vector<16x16xf32>
    %c0_30 = arith.constant 0 : index
    %c0_31 = arith.constant 0 : index
    %c0_32 = arith.constant 0 : index
    %33 = vector.load %arg5[%c0_30, %c0_31, %c0_32] : memref<2x16x16xf32, #tpu.memory_space<vmem>>, vector<1x16x16xf32>
    %34 = vector.shape_cast %33 : vector<1x16x16xf32> to vector<16x16xf32>
    %cst_33 = arith.constant dense<0.000000e+00> : vector<16x16xf32>
    %35 = tpu.matmul %34, %32, %cst_33 {dimension_numbers = #tpu.dot_dimension_numbers<[1], [0], [0], [1], [0, 0, 1, 1], [], []>} : vector<16x16xf32>, vector<16x16xf32>, vector<16x16xf32> -> vector<16x16xf32>
    %36 = arith.addf %29, %35 : vector<16x16xf32>
    %c1_34 = arith.constant 1 : index
    %c0_35 = arith.constant 0 : index
    %c0_36 = arith.constant 0 : index
    %37 = vector.load %arg5[%c1_34, %c0_35, %c0_36] : memref<2x16x16xf32, #tpu.memory_space<vmem>>, vector<1x16x16xf32>
    %38 = vector.shape_cast %37 : vector<1x16x16xf32> to vector<16x16xf32>
    %cst_37 = arith.constant dense<0.000000e+00> : vector<16x16xf32>
    %39 = tpu.matmul %38, %23, %cst_37 {dimension_numbers = #tpu.dot_dimension_numbers<[1], [0], [0], [1], [0, 0, 1, 1], [], []>} : vector<16x16xf32>, vector<16x16xf32>, vector<16x16xf32> -> vector<16x16xf32>
    %40 = arith.addf %36, %39 : vector<16x16xf32>
    %c0_38 = arith.constant 0 : index
    %c0_39 = arith.constant 0 : index
    %41 = vector.load %arg6[%c0_38, %c0_39] : memref<16x1xf32, #tpu.memory_space<vmem>>, vector<16x1xf32>
    %42 = vector.broadcast %41 : vector<16x1xf32> to vector<16x16xf32>
    %43 = arith.addf %40, %42 : vector<16x16xf32>
    %cst_40 = arith.constant 0.000000e+00 : f32
    %44 = vector.broadcast %cst_40 : f32 to vector<16x16xf32>
    %45 = arith.maximumf %43, %44 : vector<16x16xf32>
    %46 = arith.addf %45, %28 : vector<16x16xf32>
    %cst_41 = arith.constant 0.000000e+00 : f32
    %47 = vector.broadcast %cst_41 : f32 to vector<16x16xf32>
    %48 = arith.maximumf %46, %47 : vector<16x16xf32>
    %cst_42 = arith.constant 0.000000e+00 : f32
    %49 = vector.broadcast %cst_42 : f32 to vector<16x16xf32>
    %c1_43 = arith.constant 1 : index
    %c0_44 = arith.constant 0 : index
    %c0_45 = arith.constant 0 : index
    %50 = vector.load %arg15[%c1_43, %c0_44, %c0_45] : memref<2x16x16xf32, #tpu.memory_space<vmem>>, vector<1x16x16xf32>
    %51 = vector.shape_cast %50 : vector<1x16x16xf32> to vector<16x16xf32>
    %cst_46 = arith.constant dense<0.000000e+00> : vector<16x16xf32>
    %52 = tpu.matmul %48, %51, %cst_46 {dimension_numbers = #tpu.dot_dimension_numbers<[1], [0], [0], [1], [0, 0, 1, 1], [], []>} : vector<16x16xf32>, vector<16x16xf32>, vector<16x16xf32> -> vector<16x16xf32>
    %c0_47 = arith.constant 0 : index
    %c0_48 = arith.constant 0 : index
    %c0_49 = arith.constant 0 : index
    %53 = vector.load %arg9[%c0_47, %c0_48, %c0_49] : memref<2x16x16xf32, #tpu.memory_space<vmem>>, vector<1x16x16xf32>
    %54 = vector.shape_cast %53 : vector<1x16x16xf32> to vector<16x16xf32>
    %cst_50 = arith.constant dense<0.000000e+00> : vector<16x16xf32>
    %55 = tpu.matmul %54, %52, %cst_50 {dimension_numbers = #tpu.dot_dimension_numbers<[1], [0], [0], [1], [0, 0, 1, 1], [], []>} : vector<16x16xf32>, vector<16x16xf32>, vector<16x16xf32> -> vector<16x16xf32>
    %56 = arith.addf %49, %55 : vector<16x16xf32>
    %c1_51 = arith.constant 1 : index
    %c0_52 = arith.constant 0 : index
    %c0_53 = arith.constant 0 : index
    %57 = vector.load %arg9[%c1_51, %c0_52, %c0_53] : memref<2x16x16xf32, #tpu.memory_space<vmem>>, vector<1x16x16xf32>
    %58 = vector.shape_cast %57 : vector<1x16x16xf32> to vector<16x16xf32>
    %cst_54 = arith.constant dense<0.000000e+00> : vector<16x16xf32>
    %59 = tpu.matmul %58, %48, %cst_54 {dimension_numbers = #tpu.dot_dimension_numbers<[1], [0], [0], [1], [0, 0, 1, 1], [], []>} : vector<16x16xf32>, vector<16x16xf32>, vector<16x16xf32> -> vector<16x16xf32>
    %60 = arith.addf %56, %59 : vector<16x16xf32>
    %c0_55 = arith.constant 0 : index
    %c0_56 = arith.constant 0 : index
    %61 = vector.load %arg10[%c0_55, %c0_56] : memref<16x1xf32, #tpu.memory_space<vmem>>, vector<16x1xf32>
    %62 = vector.broadcast %61 : vector<16x1xf32> to vector<16x16xf32>
    %63 = arith.addf %60, %62 : vector<16x16xf32>
    %cst_57 = arith.constant 0.000000e+00 : f32
    %64 = vector.broadcast %cst_57 : f32 to vector<16x16xf32>
    %65 = arith.maximumf %63, %64 : vector<16x16xf32>
    %cst_58 = arith.constant 0.000000e+00 : f32
    %66 = vector.broadcast %cst_58 : f32 to vector<16x16xf32>
    %c1_59 = arith.constant 1 : index
    %c0_60 = arith.constant 0 : index
    %c0_61 = arith.constant 0 : index
    %67 = vector.load %arg15[%c1_59, %c0_60, %c0_61] : memref<2x16x16xf32, #tpu.memory_space<vmem>>, vector<1x16x16xf32>
    %68 = vector.shape_cast %67 : vector<1x16x16xf32> to vector<16x16xf32>
    %cst_62 = arith.constant dense<0.000000e+00> : vector<16x16xf32>
    %69 = tpu.matmul %65, %68, %cst_62 {dimension_numbers = #tpu.dot_dimension_numbers<[1], [0], [0], [1], [0, 0, 1, 1], [], []>} : vector<16x16xf32>, vector<16x16xf32>, vector<16x16xf32> -> vector<16x16xf32>
    %c0_63 = arith.constant 0 : index
    %c0_64 = arith.constant 0 : index
    %c0_65 = arith.constant 0 : index
    %70 = vector.load %arg11[%c0_63, %c0_64, %c0_65] : memref<2x16x16xf32, #tpu.memory_space<vmem>>, vector<1x16x16xf32>
    %71 = vector.shape_cast %70 : vector<1x16x16xf32> to vector<16x16xf32>
    %cst_66 = arith.constant dense<0.000000e+00> : vector<16x16xf32>
    %72 = tpu.matmul %71, %69, %cst_66 {dimension_numbers = #tpu.dot_dimension_numbers<[1], [0], [0], [1], [0, 0, 1, 1], [], []>} : vector<16x16xf32>, vector<16x16xf32>, vector<16x16xf32> -> vector<16x16xf32>
    %73 = arith.addf %66, %72 : vector<16x16xf32>
    %c1_67 = arith.constant 1 : index
    %c0_68 = arith.constant 0 : index
    %c0_69 = arith.constant 0 : index
    %74 = vector.load %arg11[%c1_67, %c0_68, %c0_69] : memref<2x16x16xf32, #tpu.memory_space<vmem>>, vector<1x16x16xf32>
    %75 = vector.shape_cast %74 : vector<1x16x16xf32> to vector<16x16xf32>
    %cst_70 = arith.constant dense<0.000000e+00> : vector<16x16xf32>
    %76 = tpu.matmul %75, %65, %cst_70 {dimension_numbers = #tpu.dot_dimension_numbers<[1], [0], [0], [1], [0, 0, 1, 1], [], []>} : vector<16x16xf32>, vector<16x16xf32>, vector<16x16xf32> -> vector<16x16xf32>
    %77 = arith.addf %73, %76 : vector<16x16xf32>
    %c0_71 = arith.constant 0 : index
    %c0_72 = arith.constant 0 : index
    %78 = vector.load %arg12[%c0_71, %c0_72] : memref<16x1xf32, #tpu.memory_space<vmem>>, vector<16x1xf32>
    %79 = vector.broadcast %78 : vector<16x1xf32> to vector<16x16xf32>
    %80 = arith.addf %77, %79 : vector<16x16xf32>
    %cst_73 = arith.constant 0.000000e+00 : f32
    %81 = vector.broadcast %cst_73 : f32 to vector<16x16xf32>
    %82 = arith.maximumf %80, %81 : vector<16x16xf32>
    %83 = arith.addf %82, %48 : vector<16x16xf32>
    %cst_74 = arith.constant 0.000000e+00 : f32
    %84 = vector.broadcast %cst_74 : f32 to vector<16x16xf32>
    %85 = arith.maximumf %83, %84 : vector<16x16xf32>
    %c0_75 = arith.constant 0 : index
    %c0_76 = arith.constant 0 : index
    %86 = vector.load %arg16[%c0_75, %c0_76] : memref<16x2xf32, #tpu.memory_space<vmem>>, vector<16x2xf32>
    %cst_77 = arith.constant dense<0.000000e+00> : vector<16x2xf32>
    %87 = tpu.matmul %85, %86, %cst_77 {dimension_numbers = #tpu.dot_dimension_numbers<[1], [0], [0], [1], [0, 0, 1, 1], [], []>} : vector<16x16xf32>, vector<16x2xf32>, vector<16x2xf32> -> vector<16x2xf32>
    %c0_78 = arith.constant 0 : index
    %c0_79 = arith.constant 0 : index
    %88 = vector.load %arg13[%c0_78, %c0_79] : memref<16x16xf32, #tpu.memory_space<vmem>>, vector<16x16xf32>
    %cst_80 = arith.constant dense<0.000000e+00> : vector<16x2xf32>
    %89 = tpu.matmul %88, %87, %cst_80 {dimension_numbers = #tpu.dot_dimension_numbers<[1], [0], [0], [1], [0, 0, 1, 1], [], []>} : vector<16x16xf32>, vector<16x2xf32>, vector<16x2xf32> -> vector<16x2xf32>
    %c0_81 = arith.constant 0 : index
    %c0_82 = arith.constant 0 : index
    %90 = vector.load %arg14[%c0_81, %c0_82] : memref<16x1xf32, #tpu.memory_space<vmem>>, vector<16x1xf32>
    %91 = vector.broadcast %90 : vector<16x1xf32> to vector<16x2xf32>
    %92 = arith.addf %89, %91 : vector<16x2xf32>
    %c0_83 = arith.constant 0 : index
    %c0_84 = arith.constant 0 : index
    %93 = vector.load %arg17[%c0_83, %c0_84] : memref<16x2xf32, #tpu.memory_space<vmem>>, vector<16x2xf32>
    tpu.vector_store %arg17[%c0_83, %c0_84], %92 {strides = array<i32>} : memref<16x2xf32, #tpu.memory_space<vmem>>, vector<16x2xf32>,
    return
  }
}

module attributes {stable_mosaic.version = 11 : i64} {
  func.func @kernel(%arg0: memref<16x2xf32, #tpu.memory_space<vmem>>, %arg1: memref<16x2xf32, #tpu.memory_space<vmem>>, %arg2: memref<32x2xf32, #tpu.memory_space<vmem>>, %arg3: memref<32x16xf32, #tpu.memory_space<vmem>>, %arg4: memref<32x16xf32, #tpu.memory_space<vmem>>, %arg5: memref<32x32xf32, #tpu.memory_space<vmem>>, %arg6: memref<32x1xf32, #tpu.memory_space<vmem>>, %arg7: memref<48x32xf32, #tpu.memory_space<vmem>>, %arg8: memref<48x1xf32, #tpu.memory_space<vmem>>, %arg9: memref<6x32xf32, #tpu.memory_space<vmem>>, %arg10: memref<6x1xf32, #tpu.memory_space<vmem>>, %arg11: memref<2x16xf32, #tpu.memory_space<vmem>>, %arg12: memref<2x1xf32, #tpu.memory_space<vmem>>, %arg13: memref<2x2xf32, #tpu.memory_space<vmem>>, %arg14: memref<32x2xf32, #tpu.memory_space<vmem>>) attributes {dimension_semantics = [], scalar_prefetch = 0 : i64, scratch_operands = 0 : i64, tpu.core_type = #tpu.core_type<tc>} {
    %c0 = arith.constant 0 : index
    %c0_0 = arith.constant 0 : index
    %0 = vector.load %arg3[%c0, %c0_0] : memref<32x16xf32, #tpu.memory_space<vmem>>, vector<32x16xf32>
    %c0_1 = arith.constant 0 : index
    %c0_2 = arith.constant 0 : index
    %1 = vector.load %arg0[%c0_1, %c0_2] : memref<16x2xf32, #tpu.memory_space<vmem>>, vector<16x2xf32>
    %cst = arith.constant dense<0.000000e+00> : vector<32x2xf32>
    %2 = tpu.matmul %0, %1, %cst {dimension_numbers = #tpu.dot_dimension_numbers<[1], [0], [0], [1], [0, 0, 1, 1], [], []>} : vector<32x16xf32>, vector<16x2xf32>, vector<32x2xf32> -> vector<32x2xf32>
    %c0_3 = arith.constant 0 : index
    %c0_4 = arith.constant 0 : index
    %3 = vector.load %arg4[%c0_3, %c0_4] : memref<32x16xf32, #tpu.memory_space<vmem>>, vector<32x16xf32>
    %c0_5 = arith.constant 0 : index
    %c0_6 = arith.constant 0 : index
    %4 = vector.load %arg1[%c0_5, %c0_6] : memref<16x2xf32, #tpu.memory_space<vmem>>, vector<16x2xf32>
    %cst_7 = arith.constant dense<0.000000e+00> : vector<32x2xf32>
    %5 = tpu.matmul %3, %4, %cst_7 {dimension_numbers = #tpu.dot_dimension_numbers<[1], [0], [0], [1], [0, 0, 1, 1], [], []>} : vector<32x16xf32>, vector<16x2xf32>, vector<32x2xf32> -> vector<32x2xf32>
    %6 = arith.addf %2, %5 : vector<32x2xf32>
    %c0_8 = arith.constant 0 : index
    %c0_9 = arith.constant 0 : index
    %7 = vector.load %arg5[%c0_8, %c0_9] : memref<32x32xf32, #tpu.memory_space<vmem>>, vector<32x32xf32>
    %c0_10 = arith.constant 0 : index
    %c0_11 = arith.constant 0 : index
    %8 = vector.load %arg2[%c0_10, %c0_11] : memref<32x2xf32, #tpu.memory_space<vmem>>, vector<32x2xf32>
    %cst_12 = arith.constant dense<0.000000e+00> : vector<32x2xf32>
    %9 = tpu.matmul %7, %8, %cst_12 {dimension_numbers = #tpu.dot_dimension_numbers<[1], [0], [0], [1], [0, 0, 1, 1], [], []>} : vector<32x32xf32>, vector<32x2xf32>, vector<32x2xf32> -> vector<32x2xf32>
    %10 = arith.addf %6, %9 : vector<32x2xf32>
    %c0_13 = arith.constant 0 : index
    %c0_14 = arith.constant 0 : index
    %11 = vector.load %arg6[%c0_13, %c0_14] : memref<32x1xf32, #tpu.memory_space<vmem>>, vector<32x1xf32>
    %12 = vector.broadcast %11 : vector<32x1xf32> to vector<32x2xf32>
    %13 = arith.addf %10, %12 : vector<32x2xf32>
    %c0_15 = arith.constant 0 : index
    %c0_16 = arith.constant 0 : index
    %14 = vector.load %arg7[%c0_15, %c0_16] : memref<48x32xf32, #tpu.memory_space<vmem>>, vector<48x32xf32>
    %cst_17 = arith.constant dense<0.000000e+00> : vector<48x2xf32>
    %15 = tpu.matmul %14, %13, %cst_17 {dimension_numbers = #tpu.dot_dimension_numbers<[1], [0], [0], [1], [0, 0, 1, 1], [], []>} : vector<48x32xf32>, vector<32x2xf32>, vector<48x2xf32> -> vector<48x2xf32>
    %c0_18 = arith.constant 0 : index
    %c0_19 = arith.constant 0 : index
    %16 = vector.load %arg8[%c0_18, %c0_19] : memref<48x1xf32, #tpu.memory_space<vmem>>, vector<48x1xf32>
    %17 = vector.broadcast %16 : vector<48x1xf32> to vector<48x2xf32>
    %18 = arith.addf %15, %17 : vector<48x2xf32>
    %cst_20 = arith.constant 0.000000e+00 : f32
    %19 = vector.broadcast %cst_20 : f32 to vector<48x2xf32>
    %20 = arith.maximumf %18, %19 : vector<48x2xf32>
    %c0_21 = arith.constant 0 : index
    %c0_22 = arith.constant 0 : index
    %21 = vector.load %arg9[%c0_21, %c0_22] : memref<6x32xf32, #tpu.memory_space<vmem>>, vector<6x32xf32>
    %cst_23 = arith.constant dense<0.000000e+00> : vector<6x2xf32>
    %22 = tpu.matmul %21, %13, %cst_23 {dimension_numbers = #tpu.dot_dimension_numbers<[1], [0], [0], [1], [0, 0, 1, 1], [], []>} : vector<6x32xf32>, vector<32x2xf32>, vector<6x2xf32> -> vector<6x2xf32>
    %c0_24 = arith.constant 0 : index
    %c0_25 = arith.constant 0 : index
    %23 = vector.load %arg10[%c0_24, %c0_25] : memref<6x1xf32, #tpu.memory_space<vmem>>, vector<6x1xf32>
    %24 = vector.broadcast %23 : vector<6x1xf32> to vector<6x2xf32>
    %25 = arith.addf %22, %24 : vector<6x2xf32>
    %cst_26 = arith.constant 0.000000e+00 : f32
    %26 = vector.broadcast %cst_26 : f32 to vector<2x2xf32>
    %27 = tpu.iota {dimensions = array<i32: 0>} : vector<2x1xi32>
    %28 = vector.extract_strided_slice %25 {offsets = [0, 0], sizes = [3, 2], strides = [1, 1]} : vector<6x2xf32> to vector<3x2xf32>
    %cst_27 = arith.constant dense<0xFF800000> : vector<2xf32>
    %29 = vector.multi_reduction <maximumf>, %28, %cst_27 [0] : vector<3x2xf32> to vector<2xf32>
    %30 = vector.shape_cast %29 : vector<2xf32> to vector<1x2xf32>
    %31 = vector.broadcast %30 : vector<1x2xf32> to vector<3x2xf32>
    %32 = arith.subf %28, %31 : vector<3x2xf32>
    %33 = math.exp %32 : vector<3x2xf32>
    %cst_28 = arith.constant dense<0.000000e+00> : vector<2xf32>
    %34 = vector.multi_reduction <add>, %33, %cst_28 [0] : vector<3x2xf32> to vector<2xf32>
    %35 = vector.shape_cast %34 : vector<2xf32> to vector<1x2xf32>
    %36 = tpu.reciprocal %35 {approx = true} : vector<1x2xf32> -> vector<1x2xf32>
    %37 = vector.broadcast %36 : vector<1x2xf32> to vector<3x2xf32>
    %38 = arith.mulf %33, %37 : vector<3x2xf32>
    %cst_29 = arith.constant 0.000000e+00 : f32
    %39 = vector.broadcast %cst_29 : f32 to vector<16x2xf32>
    %40 = vector.extract_strided_slice %20 {offsets = [0, 0], sizes = [16, 2], strides = [1, 1]} : vector<48x2xf32> to vector<16x2xf32>
    %41 = vector.extract_strided_slice %38 {offsets = [0, 0], sizes = [1, 2], strides = [1, 1]} : vector<3x2xf32> to vector<1x2xf32>
    %42 = vector.broadcast %41 : vector<1x2xf32> to vector<16x2xf32>
    %43 = arith.mulf %40, %42 : vector<16x2xf32>
    %44 = arith.addf %39, %43 : vector<16x2xf32>
    %45 = vector.extract_strided_slice %20 {offsets = [16, 0], sizes = [16, 2], strides = [1, 1]} : vector<48x2xf32> to vector<16x2xf32>
    %46 = vector.extract_strided_slice %38 {offsets = [1, 0], sizes = [1, 2], strides = [1, 1]} : vector<3x2xf32> to vector<1x2xf32>
    %47 = vector.broadcast %46 : vector<1x2xf32> to vector<16x2xf32>
    %48 = arith.mulf %45, %47 : vector<16x2xf32>
    %49 = arith.addf %44, %48 : vector<16x2xf32>
    %50 = vector.extract_strided_slice %20 {offsets = [32, 0], sizes = [16, 2], strides = [1, 1]} : vector<48x2xf32> to vector<16x2xf32>
    %51 = vector.extract_strided_slice %38 {offsets = [2, 0], sizes = [1, 2], strides = [1, 1]} : vector<3x2xf32> to vector<1x2xf32>
    %52 = vector.broadcast %51 : vector<1x2xf32> to vector<16x2xf32>
    %53 = arith.mulf %50, %52 : vector<16x2xf32>
    %54 = arith.addf %49, %53 : vector<16x2xf32>
    %c0_30 = arith.constant 0 : index
    %c0_31 = arith.constant 0 : index
    %55 = vector.load %arg11[%c0_30, %c0_31] : memref<2x16xf32, #tpu.memory_space<vmem>>, vector<1x16xf32>
    %cst_32 = arith.constant dense<0.000000e+00> : vector<1x2xf32>
    %56 = tpu.matmul %55, %54, %cst_32 {dimension_numbers = #tpu.dot_dimension_numbers<[1], [0], [0], [1], [0, 0, 1, 1], [], []>} : vector<1x16xf32>, vector<16x2xf32>, vector<1x2xf32> -> vector<1x2xf32>
    %c0_33 = arith.constant 0 : index
    %c0_34 = arith.constant 0 : index
    %57 = vector.load %arg12[%c0_33, %c0_34] : memref<2x1xf32, #tpu.memory_space<vmem>>, vector<1x1xf32>
    %58 = vector.broadcast %57 : vector<1x1xf32> to vector<1x2xf32>
    %59 = arith.addf %56, %58 : vector<1x2xf32>
    %c0_i32 = arith.constant 0 : i32
    %60 = vector.broadcast %c0_i32 : i32 to vector<2x1xi32>
    %61 = arith.cmpi eq, %27, %60 : vector<2x1xi32>
    %62 = arith.extui %61 : vector<2x1xi1> to vector<2x1xi32>
    %63 = arith.sitofp %62 : vector<2x1xi32> to vector<2x1xf32>
    %64 = vector.broadcast %63 : vector<2x1xf32> to vector<2x2xf32>
    %65 = vector.broadcast %59 : vector<1x2xf32> to vector<2x2xf32>
    %66 = arith.mulf %64, %65 : vector<2x2xf32>
    %67 = arith.addf %26, %66 : vector<2x2xf32>
    %68 = vector.extract_strided_slice %25 {offsets = [3, 0], sizes = [3, 2], strides = [1, 1]} : vector<6x2xf32> to vector<3x2xf32>
    %cst_35 = arith.constant dense<0xFF800000> : vector<2xf32>
    %69 = vector.multi_reduction <maximumf>, %68, %cst_35 [0] : vector<3x2xf32> to vector<2xf32>
    %70 = vector.shape_cast %69 : vector<2xf32> to vector<1x2xf32>
    %71 = vector.broadcast %70 : vector<1x2xf32> to vector<3x2xf32>
    %72 = arith.subf %68, %71 : vector<3x2xf32>
    %73 = math.exp %72 : vector<3x2xf32>
    %cst_36 = arith.constant dense<0.000000e+00> : vector<2xf32>
    %74 = vector.multi_reduction <add>, %73, %cst_36 [0] : vector<3x2xf32> to vector<2xf32>
    %75 = vector.shape_cast %74 : vector<2xf32> to vector<1x2xf32>
    %76 = tpu.reciprocal %75 {approx = true} : vector<1x2xf32> -> vector<1x2xf32>
    %77 = vector.broadcast %76 : vector<1x2xf32> to vector<3x2xf32>
    %78 = arith.mulf %73, %77 : vector<3x2xf32>
    %cst_37 = arith.constant 0.000000e+00 : f32
    %79 = vector.broadcast %cst_37 : f32 to vector<16x2xf32>
    %80 = vector.extract_strided_slice %20 {offsets = [0, 0], sizes = [16, 2], strides = [1, 1]} : vector<48x2xf32> to vector<16x2xf32>
    %81 = vector.extract_strided_slice %78 {offsets = [0, 0], sizes = [1, 2], strides = [1, 1]} : vector<3x2xf32> to vector<1x2xf32>
    %82 = vector.broadcast %81 : vector<1x2xf32> to vector<16x2xf32>
    %83 = arith.mulf %80, %82 : vector<16x2xf32>
    %84 = arith.addf %79, %83 : vector<16x2xf32>
    %85 = vector.extract_strided_slice %20 {offsets = [16, 0], sizes = [16, 2], strides = [1, 1]} : vector<48x2xf32> to vector<16x2xf32>
    %86 = vector.extract_strided_slice %78 {offsets = [1, 0], sizes = [1, 2], strides = [1, 1]} : vector<3x2xf32> to vector<1x2xf32>
    %87 = vector.broadcast %86 : vector<1x2xf32> to vector<16x2xf32>
    %88 = arith.mulf %85, %87 : vector<16x2xf32>
    %89 = arith.addf %84, %88 : vector<16x2xf32>
    %90 = vector.extract_strided_slice %20 {offsets = [32, 0], sizes = [16, 2], strides = [1, 1]} : vector<48x2xf32> to vector<16x2xf32>
    %91 = vector.extract_strided_slice %78 {offsets = [2, 0], sizes = [1, 2], strides = [1, 1]} : vector<3x2xf32> to vector<1x2xf32>
    %92 = vector.broadcast %91 : vector<1x2xf32> to vector<16x2xf32>
    %93 = arith.mulf %90, %92 : vector<16x2xf32>
    %94 = arith.addf %89, %93 : vector<16x2xf32>
    %c1 = arith.constant 1 : index
    %c0_38 = arith.constant 0 : index
    %95 = vector.load %arg11[%c1, %c0_38] : memref<2x16xf32, #tpu.memory_space<vmem>>, vector<1x16xf32>
    %cst_39 = arith.constant dense<0.000000e+00> : vector<1x2xf32>
    %96 = tpu.matmul %95, %94, %cst_39 {dimension_numbers = #tpu.dot_dimension_numbers<[1], [0], [0], [1], [0, 0, 1, 1], [], []>} : vector<1x16xf32>, vector<16x2xf32>, vector<1x2xf32> -> vector<1x2xf32>
    %c1_40 = arith.constant 1 : index
    %c0_41 = arith.constant 0 : index
    %97 = vector.load %arg12[%c1_40, %c0_41] : memref<2x1xf32, #tpu.memory_space<vmem>>, vector<1x1xf32>
    %98 = vector.broadcast %97 : vector<1x1xf32> to vector<1x2xf32>
    %99 = arith.addf %96, %98 : vector<1x2xf32>
    %c1_i32 = arith.constant 1 : i32
    %100 = vector.broadcast %c1_i32 : i32 to vector<2x1xi32>
    %101 = arith.cmpi eq, %27, %100 : vector<2x1xi32>
    %102 = arith.extui %101 : vector<2x1xi1> to vector<2x1xi32>
    %103 = arith.sitofp %102 : vector<2x1xi32> to vector<2x1xf32>
    %104 = vector.broadcast %103 : vector<2x1xf32> to vector<2x2xf32>
    %105 = vector.broadcast %99 : vector<1x2xf32> to vector<2x2xf32>
    %106 = arith.mulf %104, %105 : vector<2x2xf32>
    %107 = arith.addf %67, %106 : vector<2x2xf32>
    %c0_42 = arith.constant 0 : index
    %c0_43 = arith.constant 0 : index
    %108 = vector.load %arg13[%c0_42, %c0_43] : memref<2x2xf32, #tpu.memory_space<vmem>>, vector<2x2xf32>
    tpu.vector_store %arg13[%c0_42, %c0_43], %107 {strides = array<i32>} : memref<2x2xf32, #tpu.memory_space<vmem>>, vector<2x2xf32>,
    %c0_44 = arith.constant 0 : index
    %c0_45 = arith.constant 0 : index
    %109 = vector.load %arg14[%c0_44, %c0_45] : memref<32x2xf32, #tpu.memory_space<vmem>>, vector<32x2xf32>
    tpu.vector_store %arg14[%c0_44, %c0_45], %13 {strides = array<i32>} : memref<32x2xf32, #tpu.memory_space<vmem>>, vector<32x2xf32>,
    return
  }
}

</mosaic_0001>

<bundles_post_ra>
// kernel: light_mmoe_forward.5
= control target key start
LH: loop header
LB: loop body
LE: loop exit
PB: predicated region body
PF: predicated region fallthrough
CT: control target
= control target key end

     0   :  { %v556_v2 = vmov 0   ;;  %vm58_vm0 = vcmask 130048   ;;  %vm149_vm1 = vcmask 261120   ;;  %vm503_vm2 = vcmask 15360   ;;  %s802_s2 = inlined_call_operand.vmem [shape: f32[32,2], index: 2, kind: input, shape index: {}]   ;;  %s803_s1 = inlined_call_operand.vmem [shape: f32[16,2], index: 1, kind: input, shape index: {}]   ;;  %s804_s0 = inlined_call_operand.vmem [shape: f32[16,2], index: 0, kind: input, shape index: {}]   ;;  %s805_s4 = inlined_call_operand.vmem [shape: f32[32,16], index: 4, kind: input, shape index: {}]   ;;  %s806_s3 = inlined_call_operand.vmem [shape: f32[32,16], index: 3, kind: input, shape index: {}]   ;;  %s807_s6 = inlined_call_operand.vmem [shape: f32[32,1], index: 6, kind: input, shape index: {}]   ;;  %s808_s5 = inlined_call_operand.vmem [shape: f32[32,32], index: 5, kind: input, shape index: {}]   ;;  %s809_s8 = inlined_call_operand.vmem [shape: f32[48,1], index: 8, kind: input, shape index: {}]   ;;  %s810_s12 = inlined_call_operand.vmem [shape: f32[2,1], index: 12, kind: input, shape index: {}]   ;;  %s811_s14 = inlined_call_operand.vmem [shape: f32[32,2], index: 14, kind: output, shape index: {1}]   ;;  %s812_s10 = inlined_call_operand.vmem [shape: f32[6,1], index: 10, kind: input, shape index: {}]   ;;  %s813_s7 = inlined_call_operand.vmem [shape: f32[48,32], index: 7, kind: input, shape index: {}]   ;;  %s814_s9 = inlined_call_operand.vmem [shape: f32[6,32], index: 9, kind: input, shape index: {}]   ;;  %s815_s11 = inlined_call_operand.vmem [shape: f32[2,16], index: 11, kind: input, shape index: {}]   ;;  %s816_s13 = inlined_call_operand.vmem [shape: f32[2,2], index: 13, kind: output, shape index: {0}]  }
   0x1   :  { %v148_v0 = vld [vmem:[%s802_s2 + $0x18] sm:$0xff]  ;;  %v147_v1 = vld [vmem:[%s802_s2 + $0x10] sm:$0xff]  ;;  %545 = vset.pattern.permute.xlu0 %v556_v2  ;;  %546 = vset.pattern.permute.xlu1 %v556_v2  ;;  %v146_v3 = vld [vmem:[%s802_s2 + $0x8] sm:$0xff]  ;;  %vm356_vm3 = vcmask 10240   ;;  %vm427_vm4 = vcmask 13315   ;;  %vm501_vm7 = vcmask 9216  }
   0x2   :  { %174 = vmatpush.msra.mxu2 %v148_v0  ;;  %v57_v4 = vld [vmem:[%s803_s1 + $0x8] sm:$0xff]  ;;  %547 = vset.pattern.permute.xlu2 %v556_v2  ;;  %v56_v6 = vld [vmem:[%s803_s1] sm:$0xff]  ;;  %v198_v10 = vld [vmem:[%s807_s6 + $0x18] sm:$0xff] }
   0x3   :  { %85 = vmatpush.msra.mxu0 %v57_v4  ;;  %v51_v5 = vld [vmem:[%s804_s0 + $0x8] sm:$0xff]  ;;  %v50_v7 = vld [vmem:[%s804_s0] sm:$0xff]  ;;  %216 = vperm.xlu0 %545, %v198_v10   ;;  %v197_v14 = vld [vmem:[%s807_s6 + $0x10] sm:$0xff] }
   0x4   :  { %175 = vmatpush.msra.mxu2 %v147_v1  ;;  %126 = vmatpush.msra.mxu1 %v51_v5  ;;  %v52_v8 = vld [vmem:[%s805_s4] sm:$0xff]  ;;  %v196_v12 = vld [vmem:[%s807_s6 + $0x8] sm:$0xff]  ;;  %v232_v19 = vld [vmem:[%s809_s8 + $0x18] sm:$0xff] }
   0x5   :  { %v46_v9 = vld [vmem:[%s806_s3] sm:$0xff]  ;;  %86 = vmatpush.msra.mxu0 %v56_v6  ;;  %206 = vperm.xlu1 %546, %v196_v12   ;;  %v53_v15 = vld [vmem:[%s805_s4 + $0x8] sm:$0xff]  ;;  %v54_v20 = vld [vmem:[%s805_s4 + $0x10] sm:$0xff] }
   0x6   :  { %v145_v11 = vld [vmem:[%s802_s2] sm:$0xff]  ;;  %176 = vmatpush.msra.mxu2 %v146_v3  ;;  %127 = vmatpush.msra.mxu1 %v50_v7  ;;  %v47_v16 = vld [vmem:[%s806_s3 + $0x8] sm:$0xff]  ;;  %v48_v21 = vld [vmem:[%s806_s3 + $0x10] sm:$0xff] }
   0x7   :  { %v141_v13 = vld [vmem:[%s808_s5] sm:$0xff]  ;;  %516 = vmatmul.msk.f32.vlgmr.msra.gmra.mxu0 %vm58_vm0, %v52_v8  ;;  %520 = vmatmul.msk.f32.vlgmr.msra.gmra.mxu1 %vm58_vm0, %v46_v9  ;;  %v142_v18 = vld [vmem:[%s808_s5 + $0x8] sm:$0xff]  ;;  %v143_v23 = vld [vmem:[%s808_s5 + $0x10] sm:$0xff] }
   0x8   :  { %177 = vmatpush.msra.mxu2 %v145_v11  ;;  %v195_v17 = vld [vmem:[%s807_s6] sm:$0xff]  ;;  %v234_v24 = vld [vmem:[%s809_s8 + $0x28] sm:$0xff]  ;;  %v55_v25 = vld [vmem:[%s805_s4 + $0x18] sm:$0xff] }
   0x9   :  { %524 = vmatmul.msk.f32.vlgmr.msra.gmra.mxu2 %vm149_vm1, %v141_v13  ;;  %v229_v22 = vld [vmem:[%s809_s8] sm:$0xff]  ;;  %v49_v26 = vld [vmem:[%s806_s3 + $0x18] sm:$0xff]  ;;  %v230_v59 = vld [vmem:[%s809_s8 + $0x8] sm:$0xff] }
   0xa   :  { %v233_v27 = vld [vmem:[%s809_s8 + $0x20] sm:$0xff]  ;;  %v144_v28 = vld [vmem:[%s808_s5 + $0x18] sm:$0xff]  ;;  %v224_v61 = vld [vmem:[%s813_s7 + $0x8] sm:$0xff] }
   0xb   :  { %211 = vperm.xlu0 %545, %v197_v14   ;;  %v466_v29 = vld [vmem:[%s810_s12 + $0x1] sm:$0x1]  ;;  %v231_v62 = vld [vmem:[%s809_s8 + $0x10] sm:$0xff]  ;;  %v392_v1 = vld [vmem:[%s810_s12] sm:$0x1] }
   0xc   :  { %v325_v54 = vld [vmem:[%s812_s10] sm:$0x3f]  ;;  %v225_v63 = vld [vmem:[%s813_s7 + $0x10] sm:$0xff]  ;;  %v226_v2 = vld [vmem:[%s813_s7 + $0x18] sm:$0xff] }
   0xd   :  { %201 = vperm.xlu1 %546, %v195_v17   ;;  %328 = vperm.xlu2 %547, %v325_v54   ;;  %v223_v60 = vld [vmem:[%s813_s7] sm:$0xff]  ;;  %v228_v4 = vld [vmem:[%s813_s7 + $0x28] sm:$0xff] }
   0xe   :  { %v324_v0 = vld [vmem:[%s814_s9] sm:$0x3f] }
   0xf   :  { %517 = vmatmul.msk.f32.gmra.mxu0 %vm58_vm0, %v53_v15  ;;  %521 = vmatmul.msk.f32.gmra.mxu1 %vm58_vm0, %v47_v16  ;;  %v227_v3 = vld [vmem:[%s813_s7 + $0x20] sm:$0xff] }
  0x11   :  { %525 = vmatmul.msk.f32.gmra.mxu2 %vm149_vm1, %v142_v18 }
  0x13   :  { %252 = vperm.xlu0 %545, %v232_v19  }
  0x15   :  { %237 = vperm.xlu1 %546, %v229_v22   ;;  %242 = vperm.xlu2 %547, %v230_v59  }
  0x17   :  { %518 = vmatmul.msk.f32.gmra.mxu0 %vm58_vm0, %v54_v20  ;;  %522 = vmatmul.msk.f32.gmra.mxu1 %vm58_vm0, %v48_v21 }
  0x19   :  { %526 = vmatmul.msk.f32.gmra.mxu2 %vm149_vm1, %v143_v23 }
  0x1b   :  { %262 = vperm.xlu0 %545, %v234_v24  }
  0x1d   :  { %257 = vperm.xlu1 %546, %v233_v27   ;;  %247 = vperm.xlu2 %547, %v231_v62  }
  0x1f   :  { %519 = vmatmul.msk.f32.gmra.mxu0 %vm58_vm0, %v55_v25  ;;  %523 = vmatmul.msk.f32.gmra.mxu1 %vm58_vm0, %v49_v26 }
  0x21   :  { %527 = vmatmul.msk.f32.gmra.mxu2 %vm149_vm1, %v144_v28 }
  0x23   :  { %469 = vperm.xlu0 %545, %v466_v29  }
  0x25   :  { %395 = vperm.xlu2 %547, %v392_v1  }
  0x67   :  { %v329_v6 = vpop.permute.xlu2 %328 }
  0x75   :  { %v217_v41 = vpop.permute.xlu0 %216 }
  0x77   :  { %v207_v30 = vpop.permute.xlu1 %206 }
  0x7d   :  { %v212_v49 = vpop.permute.xlu0 %211 }
  0x7f   :  { %v202_v34 = vpop.permute.xlu1 %201 }
  0x84   :  { %v88_v31 = vpop.f32.mrf.mxu0  ;;  %v129_v32 = vpop.f32.mrf.mxu1 }
  0x85   :  { %v130_v33 = vadd.f32 %v129_v32, %v88_v31 }
  0x8c   :  { %v179_v35 = vpop.f32.mrf.mxu2  ;;  %v91_v36 = vpop.f32.mrf.mxu0 }
  0x8d   :  { %v191_v37 = vadd.f32 %v179_v35, %v130_v33  ;;  %v132_v38 = vpop.f32.mrf.mxu1 }
  0x8e   :  { %v133_v40 = vadd.f32 %v132_v38, %v91_v36 }
  0x8f   :  { %v219_v39 = vadd.f32 %v202_v34, %v191_v37 }
  0x91   :  { %504 = vst.msk [vmem:[%s811_s14] sm:$0xff] %vm503_vm2, %v219_v39 }
  0x94   :  { %v182_v42 = vpop.f32.mrf.mxu2  ;;  %v94_v43 = vpop.f32.mrf.mxu0 }
  0x95   :  { %v192_v44 = vadd.f32 %v182_v42, %v133_v40  ;;  %v135_v45 = vpop.f32.mrf.mxu1  ;;  %v243_v40 = vpop.permute.xlu2 %242 }
  0x96   :  { %v136_v47 = vadd.f32 %v135_v45, %v94_v43  ;;  %v253_v45 = vpop.permute.xlu0 %252 }
  0x97   :  { %v220_v46 = vadd.f32 %v207_v30, %v192_v44 }
  0x99   :  { %505 = vst.msk [vmem:[%s811_s14 + $0x8] sm:$0xff] %vm503_vm2, %v220_v46 }
  0x9c   :  { %v185_v48 = vpop.f32.mrf.mxu2  ;;  %v97_v51 = vpop.f32.mrf.mxu0 }
  0x9d   :  { %v193_v50 = vadd.f32 %v185_v48, %v136_v47  ;;  %v138_v52 = vpop.f32.mrf.mxu1  ;;  %v238_v48 = vpop.permute.xlu1 %237 }
  0x9e   :  { %v139_v55 = vadd.f32 %v138_v52, %v97_v51  ;;  %v248_v51 = vpop.permute.xlu2 %247 }
  0x9f   :  { %v221_v53 = vadd.f32 %v212_v49, %v193_v50 }
  0xa1   :  { %506 = vst.msk [vmem:[%s811_s14 + $0x10] sm:$0xff] %vm503_vm2, %v221_v53 }
  0xa4   :  { %v188_v56 = vpop.f32.mrf.mxu2 }
  0xa5   :  { %v194_v57 = vadd.f32 %v188_v56, %v139_v55 }
  0xa7   :  { %v222_v58 = vadd.f32 %v217_v41, %v194_v57 }
  0xa9   :  { %507 = vst.msk [vmem:[%s811_s14 + $0x18] sm:$0xff] %vm503_vm2, %v222_v58  ;;  %295 = vmatpush.msrb.mxu0 %v222_v58  ;;  %539 = vmatpush.msra.mxu3 %v222_v58 }
  0xab   :  { %296 = vmatpush.msrb.mxu0 %v221_v53  ;;  %540 = vmatpush.msra.mxu3 %v221_v53 }
  0xad   :  { %297 = vmatpush.msrb.mxu0 %v220_v46  ;;  %541 = vmatpush.msra.mxu3 %v220_v46 }
  0xaf   :  { %298 = vmatpush.msrb.mxu0 %v219_v39  ;;  %542 = vmatpush.msra.mxu3 %v219_v39 }
  0xb0   :  { %528 = vmatmul.msk.f32.vlgmr.msrb.gmra.mxu0 %vm149_vm1, %v223_v60  ;;  %529 = vmatmul.msk.f32.vlgmr.msra.gmra.mxu3 %vm149_vm1, %v224_v61 }
  0xb1   :  { %346 = vmatpush.msra.mxu0 %v222_v58  ;;  %v263_v58 = vpop.permute.xlu0 %262 }
  0xb3   :  { %347 = vmatpush.msra.mxu0 %v221_v53 }
  0xb5   :  { %348 = vmatpush.msra.mxu0 %v220_v46 }
  0xb7   :  { %349 = vmatpush.msra.mxu0 %v219_v39 }
  0xb8   :  { %530 = vmatmul.msk.f32.gmra.mxu3 %vm149_vm1, %v225_v63  ;;  %534 = vmatmul.msk.f32.vlgmr.msra.gmra.mxu0 %vm149_vm1, %v324_v0  ;;  %v258_v63 = vpop.permute.xlu1 %257 }
  0xc0   :  { %531 = vmatmul.msk.f32.gmra.mxu3 %vm149_vm1, %v226_v2 }
  0xc8   :  { %532 = vmatmul.msk.f32.gmra.mxu3 %vm149_vm1, %v227_v3 }
  0xd0   :  { %533 = vmatmul.msk.f32.gmra.mxu3 %vm149_vm1, %v228_v4 }
 0x12d   :  { %v300_v5 = vpop.f32.mrf.mxu0 }
 0x12e   :  { %v301_v52 = vadd.f32 %v300_v5, %v238_v48 }
 0x130   :  { %v318_v60 = vmax.f32 %v301_v52, 0.0 }
 0x133   :  { %v303_v13 = vpop.f32.mrf.mxu3 }
 0x134   :  { %v304_v57 = vadd.f32 %v303_v13, %v243_v40  ;;  %v470_v40 = vpop.permute.xlu0 %469 }
 0x135   :  { %v351_v7 = vpop.f32.mrf.mxu0 }
 0x136   :  { %v352_v8 = vadd.f32 %v351_v7, %v329_v6  ;;  %v319_v4 = vmax.f32 %v304_v57, 0.0 }
 0x138   :  { %v357_v9 = vsel %vm356_vm3, %v352_v8, -inf  ;;  %v428_v10 = vsel %vm427_vm4, %v352_v8, -inf }
 0x139   :  { %v358_v11 = vrot.slane %v357_v9, 4  ;;  %v429_v12 = vrot.slane %v428_v10, 4 }
 0x13b   :  { %v359_v14 = vmax.f32 %v357_v9, %v358_v11  ;;  %v430_v15 = vmax.f32 %v428_v10, %v429_v12  ;;  %v306_v24 = vpop.f32.mrf.mxu3 }
 0x13c   :  { %v307_v53 = vadd.f32 %v306_v24, %v248_v51 }
 0x13d   :  { %v360_v16 = vrot.slane %v359_v14, 2  ;;  %v431_v17 = vrot.slane %v430_v15, 2 }
 0x13e   :  { %v320_v0 = vmax.f32 %v307_v53, 0.0 }
 0x13f   :  { %v361_v18 = vmax.f32 %v359_v14, %v360_v16  ;;  %v432_v19 = vmax.f32 %v430_v15, %v431_v17 }
 0x141   :  { %v362_v20 = vrot.slane %v361_v18, 1  ;;  %v433_v21 = vrot.slane %v432_v19, 1 }
 0x143   :  { %v363_v22 = vmax.f32 %v361_v18, %v362_v20  ;;  %v434_v23 = vmax.f32 %v432_v19, %v433_v21  ;;  %v309_v29 = vpop.f32.mrf.mxu3 }
 0x144   :  { %v310_v54 = vadd.f32 %v309_v29, %v253_v45 }
 0x145   :  { %v364_v25 = vsub.f32 %v352_v8, %v363_v22  ;;  %v435_v26 = vsub.f32 %v352_v8, %v434_v23 }
 0x146   :  { %v321_v2 = vmax.f32 %v310_v54, 0.0 }
 0x147   :  { %v365_v27 = vmul.f32 1.442695, %v364_v25  ;;  %v436_v28 = vmul.f32 1.442695, %v435_v26 }
 0x149   :  { %548 = vpow2.f32 %v365_v27 }
 0x14a   :  { %550 = vpow2.f32 %v436_v28 }
 0x14b   :  { %v312_v43 = vpop.f32.mrf.mxu3 }
 0x14c   :  { %v313_v7 = vadd.f32 %v312_v43, %v258_v63 }
 0x14e   :  { %v322_v18 = vmax.f32 %v313_v7, 0.0 }
 0x14f   :  { %v549_v30 = vpop.eup %548 }
 0x150   :  { %v551_v31 = vpop.eup %550  ;;  %v367_v32 = vsel %vm356_vm3, %v549_v30, 0.0 }
 0x151   :  { %v368_v33 = vrot.slane %v367_v32, 4  ;;  %v439_v34 = vrot.slane %v551_v31, 3 }
 0x153   :  { %v369_v35 = vadd.f32 %v368_v33, %v367_v32  ;;  %v441_v36 = vsel %vm356_vm3, %v439_v34, 0.0  ;;  %v315_v55 = vpop.f32.mrf.mxu3  ;;  %v391_v32 = vld [vmem:[%s815_s11] sm:$0x1]  ;;  %v465_v34 = vld [vmem:[%s815_s11 + $0x1] sm:$0x1] }
 0x154   :  { %v442_v37 = vrot.slane %v441_v36, 4  ;;  %v316_v61 = vadd.f32 %v315_v55, %v263_v58 }
 0x155   :  { %v370_v38 = vrot.slane %v369_v35, 2 }
 0x156   :  { %v443_v39 = vadd.f32 %v442_v37, %v441_v36  ;;  %v323_v11 = vmax.f32 %v316_v61, 0.0 }
 0x157   :  { %v371_v41 = vadd.f32 %v370_v38, %v369_v35  ;;  %v354_v35 = vlaneseq  ;;  %v396_v38 = vpop.permute.xlu2 %395 }
 0x158   :  { %v444_v42 = vrot.slane %v443_v39, 2 }
 0x159   :  { %v372_v44 = vrot.slane %v371_v41, 1  ;;  %v355_v37 = vshrl.u32 %v354_v35, 7 }
 0x15a   :  { %v445_v46 = vadd.f32 %v444_v42, %v443_v39 }
 0x15b   :  { %v373_v47 = vadd.f32 %v372_v44, %v371_v41  ;;  %vm421_vm5 = vcmp.eq.s32.totalorder %v355_v37, 0  ;;  %vm495_vm6 = vcmp.eq.s32.totalorder %v355_v37, 1  ;;  %v557_v44 = vmov 0.0  }
 0x15c   :  { %v446_v49 = vrot.slane %v445_v46, 1  ;;  %v536_v45 = vsel %vm421_vm5, 1.0, %v557_v44 }
 0x15d   :  { %552 = vrcp.f32 %v373_v47 }
 0x15e   :  { %v447_v50 = vadd.f32 %v446_v49, %v445_v46  ;;  %v538_v46 = vsel %vm495_vm6, 1.0, %v557_v44 }
 0x160   :  { %554 = vrcp.f32 %v447_v50 }
 0x163   :  { %v553_v56 = vpop.eup %552 }
 0x164   :  { %v375_v59 = vmul.f32 %v553_v56, %v549_v30 }
 0x166   :  { %v555_v62 = vpop.eup %554  ;;  %v381_v1 = vperm.slane %v375_v59, 1  ;;  %v376_v3 = vperm.slane %v375_v59, 0  ;;  %v386_v8 = vperm.slane %v375_v59, 2 }
 0x167   :  { %v449_v6 = vmul.f32 %v555_v62, %v551_v31 }
 0x168   :  { %v382_v5 = vmul.f32 %v381_v1, %v320_v0  ;;  %v383_v9 = vmul.f32 %v381_v1, %v321_v2  ;;  %v378_v12 = vmul.f32 %v376_v3, %v319_v4  ;;  %v377_v13 = vmul.f32 %v376_v3, %v318_v60 }
 0x169   :  { %v455_v10 = vperm.slane %v449_v6, 4  ;;  %v460_v14 = vperm.slane %v449_v6, 5  ;;  %v450_v15 = vperm.slane %v449_v6, 3  ;;  %v388_v19 = vmul.f32 %v386_v8, %v323_v11 }
 0x16a   :  { %v385_v20 = vadd.f32 %v383_v9, %v378_v12  ;;  %v384_v21 = vadd.f32 %v382_v5, %v377_v13  ;;  %v387_v24 = vmul.f32 %v386_v8, %v322_v18 }
 0x16b   :  { %v456_v16 = vmul.f32 %v455_v10, %v320_v0  ;;  %v457_v17 = vmul.f32 %v455_v10, %v321_v2  ;;  %v452_v22 = vmul.f32 %v450_v15, %v319_v4  ;;  %v451_v23 = vmul.f32 %v450_v15, %v318_v60 }
 0x16c   :  { %v462_v25 = vmul.f32 %v460_v14, %v323_v11  ;;  %v390_v26 = vadd.f32 %v388_v19, %v385_v20  ;;  %v461_v29 = vmul.f32 %v460_v14, %v322_v18  ;;  %v389_v30 = vadd.f32 %v387_v24, %v384_v21 }
 0x16d   :  { %v459_v27 = vadd.f32 %v457_v17, %v452_v22  ;;  %v458_v28 = vadd.f32 %v456_v16, %v451_v23 }
 0x16e   :  { %415 = vmatpush.msrb.mxu1 %v390_v26 }
 0x16f   :  { %v464_v31 = vadd.f32 %v462_v25, %v459_v27  ;;  %v463_v33 = vadd.f32 %v461_v29, %v458_v28 }
 0x170   :  { %416 = vmatpush.msrb.mxu1 %v389_v30 }
 0x171   :  { %489 = vmatpush.msrb.mxu2 %v464_v31  ;;  %535 = vmatmul.msk.f32.vlgmr.msrb.gmra.mxu1 %vm58_vm0, %v391_v32 }
 0x173   :  { %490 = vmatpush.msrb.mxu2 %v463_v33 }
 0x174   :  { %537 = vmatmul.msk.f32.vlgmr.msrb.gmra.mxu2 %vm58_vm0, %v465_v34 }
 0x1ee   :  { %v418_v36 = vpop.f32.mrf.mxu1 }
 0x1ef   :  { %v419_v39 = vadd.f32 %v418_v36, %v396_v38 }
 0x1f1   :  { %v424_v42 = vperm.slane %v419_v39, 0 }
 0x1f3   :  { %v425_v48 = vmul.f32 %v536_v45, %v424_v42 }
 0x1f7   :  { %v492_v41 = vpop.f32.mrf.mxu2 }
 0x1f8   :  { %v493_v43 = vadd.f32 %v492_v41, %v470_v40 }
 0x1fa   :  { %v498_v47 = vperm.slane %v493_v43, 0 }
 0x1fc   :  { %v499_v49 = vmul.f32 %v538_v46, %v498_v47 }
 0x1fe   :  { %v500_v50 = vadd.f32 %v499_v49, %v425_v48 }
 0x200   :  { %502 = vst.msk [vmem:[%s816_s13] sm:$0x3] %vm501_vm7, %v500_v50 }

// kernel: light_mmoe_forward.4
= control target key start
LH: loop header
LB: loop body
LE: loop exit
PB: predicated region body
PF: predicated region fallthrough
CT: control target
= control target key end

     0   :  { %vm64_vm0 = vcmask 64512   ;;  %v699_v0 = vmov 0   ;;  %vm91_vm1 = vcmask 130048   ;;  %vm646_vm2 = vcmask 15360   ;;  %s959_s2 = inlined_call_operand.vmem [shape: f32[8,1], index: 2, kind: input, shape index: {}]   ;;  %s960_s0 = inlined_call_operand.vmem [shape: f32[8,16], index: 0, kind: input, shape index: {}]   ;;  %s961_s1 = inlined_call_operand.vmem [shape: f32[8,8], index: 1, kind: input, shape index: {}]   ;;  %s962_s4 = inlined_call_operand.vmem [shape: f32[16,1], index: 4, kind: input, shape index: {}]   ;;  %s963_s8 = inlined_call_operand.vmem [shape: f32[16,1], index: 8, kind: input, shape index: {}]   ;;  %s964_s12 = inlined_call_operand.vmem [shape: f32[16,1], index: 12, kind: input, shape index: {}]   ;;  %s965_s14 = inlined_call_operand.vmem [shape: f32[16,1], index: 14, kind: input, shape index: {}]   ;;  %s966_s15 = inlined_call_operand.vmem [shape: f32[2,16,16], index: 15, kind: input, shape index: {}]   ;;  %s967_s7 = inlined_call_operand.vmem [shape: f32[16,8], index: 7, kind: input, shape index: {}]   ;;  %s968_s3 = inlined_call_operand.vmem [shape: f32[2,16,8], index: 3, kind: input, shape index: {}]   ;;  %s969_s6 = inlined_call_operand.vmem [shape: f32[16,1], index: 6, kind: input, shape index: {}]   ;;  %s970_s10 = inlined_call_operand.vmem [shape: f32[16,1], index: 10, kind: input, shape index: {}]   ;;  %s971_s5 = inlined_call_operand.vmem [shape: f32[2,16,16], index: 5, kind: input, shape index: {}]   ;;  %s972_s9 = inlined_call_operand.vmem [shape: f32[2,16,16], index: 9, kind: input, shape index: {}]   ;;  %s973_s11 = inlined_call_operand.vmem [shape: f32[2,16,16], index: 11, kind: input, shape index: {}]   ;;  %s974_s16 = inlined_call_operand.vmem [shape: f32[16,2], index: 16, kind: input, shape index: {}]   ;;  %s975_s13 = inlined_call_operand.vmem [shape: f32[16,16], index: 13, kind: input, shape index: {}]   ;;  %s976_s17 = inlined_call_operand.vmem [shape: f32[16,2], index: 17, kind: output, shape index: {}]  }
   0x1   :  { %977 = sst [smem:[#allocation2_spill]] %s959_s2  ;;  %694 = vset.pattern.permute.xlu0 %v699_v0  ;;  %v56_v3 = vld [vmem:[%s961_s1] sm:$0xff]  ;;  %695 = vset.pattern.permute.xlu1 %v699_v0  ;;  %v197_v5 = vld [vmem:[%s963_s8 + $0x8] sm:$0xff]  ;;  %v655_v16 = vld [vmem:[%s968_s3 + $0x10] sm:$0xff] }
   0x2   :  { %978 = sst [smem:[#allocation3_spill]] %s960_s0  ;;  %696 = vset.pattern.permute.xlu2 %v699_v0  ;;  %v178_v4 = vld [vmem:[%s962_s4] sm:$0xff]  ;;  %v606_v7 = vld [vmem:[%s965_s14 + $0x8] sm:$0xff]  ;;  %v656_v18 = vld [vmem:[%s968_s3 + $0x18] sm:$0xff] }
   0x3   :  { %s979_s26 = sld [smem:[#allocation2_spill]]  ;;  %v552_v6 = vld [vmem:[%s964_s12] sm:$0xff]  ;;  %v90_v8 = vld [vmem:[%s966_s15 + $0x8] sm:$0xff]  ;;  %v665_v37 = vld [vmem:[%s971_s5 + $0x10] sm:$0xff] }
   0x4   :  { %s980_s29 = sld [smem:[#allocation3_spill]]  ;;  %v89_v9 = vld [vmem:[%s966_s15] sm:$0xff]  ;;  %109 = vmatpush.msra.mxu1 %v90_v8  ;;  %v195_v15 = vld [vmem:[%s967_s7 + $0x8] sm:$0xff]  ;;  %v666_v38 = vld [vmem:[%s971_s5 + $0x18] sm:$0xff] }
   0x5   :  { %v194_v14 = vld [vmem:[%s967_s7] sm:$0xff]  ;;  %v179_v17 = vld [vmem:[%s962_s4 + $0x8] sm:$0xff]  ;;  %v672_v47 = vld [vmem:[%s966_s15 + $0x18] sm:$0xff] }
   0x6   :  { %110 = vmatpush.msra.mxu1 %v89_v9  ;;  %187 = vperm.xlu1 %695, %v179_v17   ;;  %v329_v19 = vld [vmem:[%s969_s6] sm:$0xff]  ;;  %v553_v21 = vld [vmem:[%s964_s12 + $0x8] sm:$0xff]  ;;  %v671_v48 = vld [vmem:[%s966_s15 + $0x10] sm:$0xff] }
   0x7   :  { %v444_v20 = vld [vmem:[%s970_s10] sm:$0xff]  ;;  %v116_v24 = vld [vmem:[%s968_s3 + $0x8] sm:$0xff] }
   0x8   :  { %257 = vmatpush.msrb.mxu1 %v90_v8  ;;  %v115_v22 = vld [vmem:[%s968_s3] sm:$0xff]  ;;  %v330_v40 = vld [vmem:[%s969_s6 + $0x8] sm:$0xff]  ;;  %v676_v8 = vld [vmem:[%s972_s9 + $0x18] sm:$0xff] }
   0x9   :  { %v58_v1 = vld [vmem:[%s979_s26] sm:$0xff]  ;;  %v445_v42 = vld [vmem:[%s970_s10 + $0x8] sm:$0xff] }
   0xa   :  { %v57_v2 = vld [vmem:[%s980_s29] sm:$0xff]  ;;  %61 = vperm.xlu0 %694, %v58_v1   ;;  %258 = vmatpush.msrb.mxu1 %v89_v9  ;;  %v267_v46 = vld [vmem:[%s971_s5 + $0x8] sm:$0xff] }
   0xb   :  { %83 = vmatpush.msra.mxu0 %v57_v2  ;;  %v196_v39 = vld [vmem:[%s963_s8] sm:$0xff] }
   0xc   :  { %653 = vmatmul.msk.f32.vlgmr.msra.gmra.mxu0 %vm64_vm0, %v56_v3  ;;  %200 = vperm.xlu2 %696, %v196_v39   ;;  %v266_v44 = vld [vmem:[%s971_s5] sm:$0xff] }
   0xd   :  { %v605_v45 = vld [vmem:[%s965_s14] sm:$0xff] }
   0xe   :  { %333 = vperm.xlu1 %695, %v329_v19  }
  0x12   :  { %182 = vperm.xlu0 %694, %v178_v4  }
  0x14   :  { %338 = vperm.xlu2 %696, %v330_v40  }
  0x16   :  { %448 = vperm.xlu1 %695, %v444_v20  }
  0x1a   :  { %205 = vperm.xlu0 %694, %v197_v5  }
  0x1c   :  { %453 = vperm.xlu2 %696, %v445_v42  }
  0x1e   :  { %561 = vperm.xlu1 %695, %v553_v21  }
  0x22   :  { %556 = vperm.xlu0 %694, %v552_v6  }
  0x24   :  { %609 = vperm.xlu2 %696, %v605_v45  }
  0x2a   :  { %614 = vperm.xlu0 %694, %v606_v7   ;;  %v675_v7 = vld [vmem:[%s972_s9 + $0x10] sm:$0xff] }
  0x66   :  { %v201_v51 = vpop.permute.xlu2 %200 }
  0x6e   :  { %v339_v0 = vpop.permute.xlu2 %338 }
  0x78   :  { %v188_v34 = vpop.permute.xlu1 %187 }
  0x7c   :  { %v62_v10 = vpop.permute.xlu0 %61 }
  0x80   :  { %v334_v54 = vpop.permute.xlu1 %333 }
  0x84   :  { %v183_v28 = vpop.permute.xlu0 %182 }
  0x89   :  { %v85_v11 = vpop.f32.mrf.mxu0 }
  0x8a   :  { %v86_v12 = vadd.f32 %v85_v11, %v62_v10  ;;  %v381_v11 = vld [vmem:[%s972_s9] sm:$0xff] }
  0x8c   :  { %697 = vtanh.f32 %v86_v12  ;;  %v206_v2 = vpop.permute.xlu0 %205  ;;  %v382_v12 = vld [vmem:[%s972_s9 + $0x8] sm:$0xff] }
  0x92   :  { %v698_v13 = vpop.eup %697 }
  0x93   :  { %654 = vmatmul.msk.f32.vlgmr.msra.gmra.mxu1 %vm91_vm1, %v698_v13  ;;  %141 = vmatpush.msra.mxu2 %v698_v13 }
  0x94   :  { %229 = vmatpush.msrb.mxu0 %v698_v13  ;;  %657 = vmatmul.msk.f32.vlgmr.msra.gmra.mxu2 %vm64_vm0, %v655_v16  ;;  %v449_v16 = vpop.permute.xlu1 %448 }
  0x95   :  { %661 = vmatmul.msk.f32.vlgmr.msrb.gmra.mxu0 %vm64_vm0, %v194_v14 }
  0x96   :  { %372 = vmatpush.msra.mxu0 %v672_v47 }
  0x98   :  { %373 = vmatpush.msra.mxu0 %v671_v48 }
  0x9c   :  { %658 = vmatmul.msk.f32.gmra.mxu2 %vm64_vm0, %v656_v18 }
  0x9d   :  { %662 = vmatmul.msk.f32.gmra.mxu0 %vm64_vm0, %v195_v15 }
 0x110   :  { %v112_v23 = vpop.f32.mrf.mxu1 }
 0x111   :  { %170 = vmatpush.msra.mxu3 %v112_v23 }
 0x112   :  { %659 = vmatmul.msk.f32.vlgmr.msra.gmra.mxu3 %vm64_vm0, %v115_v22  ;;  %v231_v50 = vpop.f32.mrf.mxu0  ;;  %v454_v22 = vpop.permute.xlu2 %453 }
 0x113   :  { %v232_v56 = vadd.f32 %v231_v50, %v201_v51  ;;  %v603_v51 = vld [vmem:[%s975_s13] sm:$0xff] }
 0x117   :  { %v143_v25 = vpop.f32.mrf.mxu2 }
 0x11a   :  { %660 = vmatmul.msk.f32.gmra.mxu3 %vm64_vm0, %v116_v24  ;;  %v234_v63 = vpop.f32.mrf.mxu0 }
 0x11b   :  { %v235_v3 = vadd.f32 %v234_v63, %v206_v2 }
 0x11f   :  { %v146_v31 = vpop.f32.mrf.mxu2 }
 0x195   :  { %v172_v26 = vpop.f32.mrf.mxu3 }
 0x196   :  { %v173_v27 = vadd.f32 %v172_v26, %v143_v25  ;;  %v683_v25 = vld [vmem:[%s973_s11 + $0x10] sm:$0xff]  ;;  %v684_v26 = vld [vmem:[%s973_s11 + $0x18] sm:$0xff] }
 0x198   :  { %v190_v29 = vadd.f32 %v183_v28, %v173_v27 }
 0x19a   :  { %v192_v30 = vmax.f32 %v190_v29, 0.0  ;;  %v489_v29 = vld [vmem:[%s973_s11] sm:$0xff] }
 0x19c   :  { %663 = vmatmul.msk.f32.vlgmr.msrb.gmra.mxu1 %vm91_vm1, %v192_v30 }
 0x19d   :  { %v175_v32 = vpop.f32.mrf.mxu3 }
 0x19e   :  { %v176_v33 = vadd.f32 %v175_v32, %v146_v31  ;;  %v573_v31 = vld [vmem:[%s974_s16 + $0x8] sm:$0xff]  ;;  %v572_v32 = vld [vmem:[%s974_s16] sm:$0xff] }
 0x1a0   :  { %v191_v35 = vadd.f32 %v188_v34, %v176_v33 }
 0x1a2   :  { %v193_v36 = vmax.f32 %v191_v35, 0.0 }
 0x1a4   :  { %664 = vmatmul.msk.f32.gmra.mxu1 %vm91_vm1, %v193_v36  ;;  %291 = vmatpush.msrb.mxu2 %v193_v36  ;;  %v557_v36 = vpop.permute.xlu0 %556 }
 0x1a6   :  { %292 = vmatpush.msrb.mxu2 %v192_v30  ;;  %v490_v30 = vld [vmem:[%s973_s11 + $0x8] sm:$0xff] }
 0x1a7   :  { %667 = vmatmul.msk.f32.vlgmr.msrb.gmra.mxu2 %vm91_vm1, %v665_v37 }
 0x1af   :  { %668 = vmatmul.msk.f32.gmra.mxu2 %vm91_vm1, %v666_v38 }
 0x219   :  { %v260_v41 = vpop.f32.mrf.mxu1 }
 0x221   :  { %v263_v43 = vpop.f32.mrf.mxu1 }
 0x222   :  { %320 = vmatpush.msrb.mxu3 %v263_v43 }
 0x224   :  { %321 = vmatpush.msrb.mxu3 %v260_v41 }
 0x225   :  { %669 = vmatmul.msk.f32.vlgmr.msrb.gmra.mxu3 %vm91_vm1, %v266_v44  ;;  %v562_v44 = vpop.permute.xlu1 %561 }
 0x226   :  { %480 = vmatpush.msra.mxu3 %v672_v47 }
 0x228   :  { %481 = vmatpush.msra.mxu3 %v671_v48 }
 0x22a   :  { %v294_v49 = vpop.f32.mrf.mxu2 }
 0x22d   :  { %670 = vmatmul.msk.f32.gmra.mxu3 %vm91_vm1, %v267_v46 }
 0x232   :  { %v297_v58 = vpop.f32.mrf.mxu2 }
 0x2a8   :  { %v323_v52 = vpop.f32.mrf.mxu3 }
 0x2a9   :  { %v324_v53 = vadd.f32 %v323_v52, %v294_v49  ;;  %v604_v52 = vld [vmem:[%s975_s13 + $0x8] sm:$0xff] }
 0x2ab   :  { %v341_v55 = vadd.f32 %v334_v54, %v324_v53  ;;  %v610_v53 = vpop.permute.xlu2 %609 }
 0x2ad   :  { %v343_v57 = vmax.f32 %v341_v55, 0.0 }
 0x2af   :  { %v345_v59 = vadd.f32 %v343_v57, %v232_v56  ;;  %v615_v56 = vpop.permute.xlu0 %614 }
 0x2b0   :  { %v326_v60 = vpop.f32.mrf.mxu3 }
 0x2b1   :  { %v891_v61 = vmax.f32 %v345_v59, 0.0  ;;  %v327_v62 = vadd.f32 %v326_v60, %v297_v58 }
 0x2b3   :  { %v342_v1 = vadd.f32 %v339_v0, %v327_v62  ;;  %673 = vmatmul.msk.f32.vlgmr.msra.gmra.mxu0 %vm91_vm1, %v891_v61 }
 0x2b5   :  { %v344_v4 = vmax.f32 %v342_v1, 0.0 }
 0x2b7   :  { %v346_v5 = vadd.f32 %v344_v4, %v235_v3 }
 0x2b9   :  { %v895_v6 = vmax.f32 %v346_v5, 0.0 }
 0x2bb   :  { %674 = vmatmul.msk.f32.gmra.mxu0 %vm91_vm1, %v895_v6  ;;  %406 = vmatpush.msra.mxu1 %v895_v6 }
 0x2bd   :  { %407 = vmatpush.msra.mxu1 %v891_v61 }
 0x2be   :  { %677 = vmatmul.msk.f32.vlgmr.msra.gmra.mxu1 %vm91_vm1, %v675_v7 }
 0x2c6   :  { %678 = vmatmul.msk.f32.gmra.mxu1 %vm91_vm1, %v676_v8 }
 0x330   :  { %v375_v9 = vpop.f32.mrf.mxu0 }
 0x338   :  { %v378_v10 = vpop.f32.mrf.mxu0 }
 0x339   :  { %435 = vmatpush.msra.mxu2 %v378_v10 }
 0x33b   :  { %436 = vmatpush.msra.mxu2 %v375_v9  ;;  %v409_v13 = vpop.f32.mrf.mxu1 }
 0x33c   :  { %679 = vmatmul.msk.f32.vlgmr.msra.gmra.mxu2 %vm91_vm1, %v381_v11 }
 0x33d   :  { %594 = vmatpush.msrb.mxu2 %v573_v31 }
 0x33f   :  { %595 = vmatpush.msrb.mxu2 %v572_v32 }
 0x343   :  { %v412_v19 = vpop.f32.mrf.mxu1 }
 0x344   :  { %680 = vmatmul.msk.f32.gmra.mxu2 %vm91_vm1, %v382_v12 }
 0x3bf   :  { %v438_v14 = vpop.f32.mrf.mxu2 }
 0x3c0   :  { %v439_v15 = vadd.f32 %v438_v14, %v409_v13 }
 0x3c2   :  { %v456_v17 = vadd.f32 %v449_v16, %v439_v15 }
 0x3c4   :  { %v458_v18 = vmax.f32 %v456_v17, 0.0 }
 0x3c6   :  { %681 = vmatmul.msk.f32.vlgmr.msra.gmra.mxu3 %vm91_vm1, %v458_v18 }
 0x3c7   :  { %v441_v20 = vpop.f32.mrf.mxu2 }
 0x3c8   :  { %v442_v21 = vadd.f32 %v441_v20, %v412_v19 }
 0x3ca   :  { %v457_v23 = vadd.f32 %v454_v22, %v442_v21 }
 0x3cc   :  { %v459_v24 = vmax.f32 %v457_v23, 0.0 }
 0x3ce   :  { %682 = vmatmul.msk.f32.gmra.mxu3 %vm91_vm1, %v459_v24  ;;  %514 = vmatpush.msrb.mxu0 %v459_v24 }
 0x3d0   :  { %515 = vmatpush.msrb.mxu0 %v458_v18 }
 0x3d1   :  { %685 = vmatmul.msk.f32.vlgmr.msrb.gmra.mxu0 %vm91_vm1, %v683_v25 }
 0x3d9   :  { %686 = vmatmul.msk.f32.gmra.mxu0 %vm91_vm1, %v684_v26 }
 0x449   :  { %v483_v27 = vpop.f32.mrf.mxu3 }
 0x44e   :  { %v517_v33 = vpop.f32.mrf.mxu0 }
 0x451   :  { %v486_v28 = vpop.f32.mrf.mxu3 }
 0x452   :  { %543 = vmatpush.msrb.mxu1 %v486_v28 }
 0x454   :  { %544 = vmatpush.msrb.mxu1 %v483_v27 }
 0x455   :  { %687 = vmatmul.msk.f32.vlgmr.msrb.gmra.mxu1 %vm91_vm1, %v489_v29 }
 0x456   :  { %v520_v39 = vpop.f32.mrf.mxu0 }
 0x45d   :  { %688 = vmatmul.msk.f32.gmra.mxu1 %vm91_vm1, %v490_v30 }
 0x4d2   :  { %v546_v34 = vpop.f32.mrf.mxu1 }
 0x4d3   :  { %v547_v35 = vadd.f32 %v546_v34, %v517_v33 }
 0x4d5   :  { %v564_v37 = vadd.f32 %v557_v36, %v547_v35 }
 0x4d7   :  { %v566_v38 = vmax.f32 %v564_v37, 0.0 }
 0x4d9   :  { %v568_v40 = vadd.f32 %v566_v38, %v891_v61 }
 0x4da   :  { %v549_v41 = vpop.f32.mrf.mxu1 }
 0x4db   :  { %v570_v42 = vmax.f32 %v568_v40, 0.0  ;;  %v550_v43 = vadd.f32 %v549_v41, %v520_v39 }
 0x4dd   :  { %v565_v45 = vadd.f32 %v562_v44, %v550_v43  ;;  %689 = vmatmul.msk.f32.vlgmr.msrb.gmra.mxu2 %vm91_vm1, %v570_v42 }
 0x4df   :  { %v567_v46 = vmax.f32 %v565_v45, 0.0 }
 0x4e1   :  { %v569_v47 = vadd.f32 %v567_v46, %v895_v6 }
 0x4e3   :  { %v571_v48 = vmax.f32 %v569_v47, 0.0 }
 0x4e5   :  { %690 = vmatmul.msk.f32.gmra.mxu2 %vm91_vm1, %v571_v48 }
 0x560   :  { %v597_v49 = vpop.f32.mrf.mxu2 }
 0x568   :  { %v600_v50 = vpop.f32.mrf.mxu2 }
 0x569   :  { %637 = vmatpush.msrb.mxu3 %v600_v50 }
 0x56b   :  { %638 = vmatpush.msrb.mxu3 %v597_v49 }
 0x56c   :  { %691 = vmatmul.msk.f32.vlgmr.msrb.gmra.mxu3 %vm91_vm1, %v603_v51 }
 0x574   :  { %692 = vmatmul.msk.f32.gmra.mxu3 %vm91_vm1, %v604_v52 }
 0x5ef   :  { %v640_v54 = vpop.f32.mrf.mxu3 }
 0x5f0   :  { %v641_v55 = vadd.f32 %v640_v54, %v610_v53 }
 0x5f2   :  { %647 = vst.msk [vmem:[%s976_s17] sm:$0xff] %vm646_vm2, %v641_v55 }
 0x5f7   :  { %v643_v57 = vpop.f32.mrf.mxu3 }
 0x5f8   :  { %v644_v58 = vadd.f32 %v643_v57, %v615_v56 }
 0x5fa   :  { %648 = vst.msk [vmem:[%s976_s17 + $0x8] sm:$0xff] %vm646_vm2, %v644_v58 }

// kernel: light_mmoe_forward.3
= control target key start
LH: loop header
LB: loop body
LE: loop exit
PB: predicated region body
PF: predicated region fallthrough
CT: control target
= control target key end

     0   :  { %v96_v0 = vlaneseq  ;;  %v2271_v1 = vmov 0   ;;  %vm3775_vm0 = vcmask 130048   ;;  %vm116_vm1 = vcmask 1046528   ;;  %s3735_s8 = inlined_call_operand.vmem [shape: f32[32,1], index: 8, kind: input, shape index: {}]   ;;  %s3736_s0 = inlined_call_operand.vmem [shape: f32[16,2], index: 0, kind: input, shape index: {}]   ;;  %s3737_s4 = inlined_call_operand.vmem [shape: f32[32,16], index: 4, kind: input, shape index: {}]   ;;  %s3738_s1 = inlined_call_operand.vmem [shape: s32[1,2], index: 1, kind: input, shape index: {}]   ;;  %s3739_s5 = inlined_call_operand.vmem [shape: f32[32,7], index: 5, kind: input, shape index: {}]   ;;  %s3740_s2 = inlined_call_operand.vmem [shape: s32[1,2], index: 2, kind: input, shape index: {}]   ;;  %s3741_s3 = inlined_call_operand.vmem [shape: s32[1,2], index: 3, kind: input, shape index: {}]   ;;  %s3742_s6 = inlined_call_operand.vmem [shape: f32[32,4], index: 6, kind: input, shape index: {}]   ;;  %s3743_s10 = inlined_call_operand.vmem [shape: f32[128,1], index: 10, kind: input, shape index: {}]   ;;  %s3744_s7 = inlined_call_operand.vmem [shape: f32[32,16], index: 7, kind: input, shape index: {}]   ;;  %s3745_s12 = inlined_call_operand.vmem [shape: f32[128,1], index: 12, kind: input, shape index: {}]   ;;  %s3746_s14 = inlined_call_operand.vmem [shape: f32[128,1], index: 14, kind: input, shape index: {}]   ;;  %s3747_s16 = inlined_call_operand.vmem [shape: f32[64,1], index: 16, kind: input, shape index: {}]   ;;  %s3748_s18 = inlined_call_operand.vmem [shape: f32[64,1], index: 18, kind: input, shape index: {}]   ;;  %s3749_s20 = inlined_call_operand.vmem [shape: f32[64,1], index: 20, kind: input, shape index: {}]   ;;  %s3750_s22 = inlined_call_operand.vmem [shape: f32[16,1], index: 22, kind: input, shape index: {}]   ;;  %s3751_s24 = inlined_call_operand.vmem [shape: f32[16,1], index: 24, kind: input, shape index: {}]   ;;  %s3752_s26 = inlined_call_operand.vmem [shape: f32[16,1], index: 26, kind: input, shape index: {}]   ;;  %s3753_s9 = inlined_call_operand.vmem [shape: f32[128,32], index: 9, kind: input, shape index: {}]   ;;  %s3754_s11 = inlined_call_operand.vmem [shape: f32[128,128], index: 11, kind: input, shape index: {}]   ;;  %s3755_s13 = inlined_call_operand.vmem [shape: f32[128,128], index: 13, kind: input, shape index: {}]   ;;  %s3756_s15 = inlined_call_operand.vmem [shape: f32[64,128], index: 15, kind: input, shape index: {}]   ;;  %s3757_s17 = inlined_call_operand.vmem [shape: f32[64,64], index: 17, kind: input, shape index: {}]   ;;  %s3758_s19 = inlined_call_operand.vmem [shape: f32[64,64], index: 19, kind: input, shape index: {}]   ;;  %s3759_s21 = inlined_call_operand.vmem [shape: f32[16,64], index: 21, kind: input, shape index: {}]   ;;  %s3760_s23 = inlined_call_operand.vmem [shape: f32[16,16], index: 23, kind: input, shape index: {}]   ;;  %s3761_s25 = inlined_call_operand.vmem [shape: f32[16,16], index: 25, kind: input, shape index: {}]   ;;  %s3762_s27 = inlined_call_operand.vmem [shape: f32[16,2], index: 27, kind: output, shape index: {}]  }
   0x1   :  { %3777 = sst [smem:[#allocation8_spill]] %s3735_s8  ;;  %2146 = vset.pattern.permute.xlu1 %v2271_v1  ;;  %2145 = vset.pattern.permute.xlu0 %v2271_v1  ;;  %vm103_vm2 = vcmask 56320   ;;  %v2272_v13 = vmov 0.0   ;;  %vm213_vm4 = vcmask 1043456   ;;  %v2273_v21 = vmov 1.0  }
   0x2   :  { %3778 = sst [smem:[#allocation9_spill]] %s3736_s0  ;;  %v97_v6 = vshrl.u32 %v96_v0, 7  ;;  %2147 = vset.pattern.permute.xlu2 %v2271_v1  ;;  %vm200_vm8 = vcmask 31744  }
   0x3   :  { %3779 = sst [smem:[#allocation10_spill]] %s3737_s4 }
   0x4   :  { %3780 = sst [smem:[#allocation11_spill]] %s3738_s1  ;;  %v254_v12 = vadd.s32 8, %v97_v6 }
   0x5   :  { %3781 = sst [smem:[#allocation12_spill]] %s3739_s5 }
   0x6   :  { %3782 = sst [smem:[#allocation13_spill]] %s3740_s2 }
   0x7   :  { %3783 = sst [smem:[#allocation14_spill]] %s3741_s3 }
   0x8   :  { %3784 = sst [smem:[#allocation15_spill]] %s3742_s6 }
   0x9   :  { %3785 = sst [smem:[#allocation16_spill]] %s3743_s10 }
   0xa   :  { %3786 = sst [smem:[#allocation17_spill]] %s3744_s7 }
   0xb   :  { %3787 = sst [smem:[#allocation18_spill]] %s3745_s12 }
   0xc   :  { %3788 = sst [smem:[#allocation19_spill]] %s3746_s14 }
   0xd   :  { %s3789_s10 = sld [smem:[#allocation8_spill]] }
   0xe   :  { %s3790_s0 = sld [smem:[#allocation9_spill]] }
   0xf   :  { %s3791_s14 = sld [smem:[#allocation10_spill]] }
  0x10   :  { %s3792_s8 = sld [smem:[#allocation11_spill]] }
  0x11   :  { %s3793_s7 = sld [smem:[#allocation12_spill]] }
  0x12   :  { %s3794_s29 = sld [smem:[#allocation13_spill]] }
  0x13   :  { %v311_v2 = vld [vmem:[%s3789_s10 + $0x18] sm:$0xff]  ;;  %v309_v3 = vld [vmem:[%s3789_s10 + $0x8] sm:$0xff]  ;;  %v310_v15 = vld [vmem:[%s3789_s10 + $0x10] sm:$0xff]  ;;  %s3795_s30 = sld [smem:[#allocation14_spill]] }
  0x14   :  { %v91_v4 = vld [vmem:[%s3790_s0 + $0x8] sm:$0xff]  ;;  %329 = vperm.xlu0 %2145, %v311_v2   ;;  %319 = vperm.xlu1 %2146, %v309_v3   ;;  %v90_v5 = vld [vmem:[%s3790_s0] sm:$0xff]  ;;  %s3796_s6 = sld [smem:[#allocation15_spill]]  ;;  %v1359_v2 = vld [vmem:[%s3747_s16 + $0x38] sm:$0xff] }
  0x15   :  { %176 = vmatpush.msra.mxu1 %v91_v4  ;;  %v86_v7 = vld [vmem:[%s3791_s14] sm:$0xff]  ;;  %v87_v20 = vld [vmem:[%s3791_s14 + $0x8] sm:$0xff]  ;;  %s3797_s5 = sld [smem:[#allocation16_spill]]  ;;  %v88_v26 = vld [vmem:[%s3791_s14 + $0x10] sm:$0xff] }
  0x16   :  { %v2148_v8 = vld [vmem:[%s3792_s8] ss:$0 sm:$0xff]  ;;  %s3798_s1 = sld [smem:[#allocation17_spill]]  ;;  %v89_v31 = vld [vmem:[%s3791_s14 + $0x18] sm:$0xff] }
  0x17   :  { %v93_v9 = vld [vmem:[%s3793_s7 + $0x8] sm:$0xff]  ;;  %177 = vmatpush.msra.mxu1 %v90_v5  ;;  %vm100_vm3 = vcmp.eq.s32.totalorder %v97_v6, %v2148_v8  ;;  %v94_v10 = vld [vmem:[%s3793_s7 + $0x10] sm:$0xff]  ;;  %v308_v16 = vld [vmem:[%s3789_s10] sm:$0xff]  ;;  %s3800_s8 = sld [smem:[#allocation19_spill]] }
  0x18   :  { %v2149_v11 = vld [vmem:[%s3794_s29] ss:$0 sm:$0xff]  ;;  %2046 = vmatmul.msk.f32.vlgmr.msra.gmra.mxu1 %vm3775_vm0, %v86_v7  ;;  %v2040_v14 = vsel %vm100_vm3, 1.0, %v2272_v13  ;;  %v95_v22 = vld [vmem:[%s3793_s7 + $0x18] sm:$0xff]  ;;  %v1357_v7 = vld [vmem:[%s3747_s16 + $0x28] sm:$0xff] }
  0x19   :  { %2132 = vmatpush.msk.msra.mxu2 %vm116_vm1, %v2040_v14  ;;  %2133 = vmatpush.msk.msra.mxu3 %vm116_vm1, %v2040_v14  ;;  %vm197_vm5 = vcmp.eq.s32.totalorder %v97_v6, %v2149_v11  ;;  %v2150_v17 = vld [vmem:[%s3795_s30] ss:$0 sm:$0xff] }
  0x1a   :  { %2043 = vmatmul.msk.f32.vlgmr.msra.gmra.mxu2 %vm103_vm2, %v93_v9  ;;  %2044 = vmatmul.msk.f32.vlgmr.msra.gmra.mxu3 %vm103_vm2, %v94_v10  ;;  %v2050_v18 = vsel %vm197_vm5, 1.0, %v2272_v13  ;;  %v92_v19 = vld [vmem:[%s3793_s7] sm:$0xff]  ;;  %vm258_vm6 = vcmp.eq.s32.totalorder %v254_v12, %v2150_v17  ;;  %vm257_vm7 = vcmp.eq.s32.totalorder %v97_v6, %v2150_v17  ;;  %v192_v27 = vld [vmem:[%s3796_s6 + $0x8] sm:$0xff]  ;;  %v193_v32 = vld [vmem:[%s3796_s6 + $0x10] sm:$0xff]  ;;  %s3799_s7 = sld [smem:[#allocation18_spill]] }
  0x1b   :  { %2051 = vmatpush.msk.msrb.mxu2 %vm213_vm4, %v2050_v18  ;;  %2041 = vmatpush.msk.msra.mxu0 %vm116_vm1, %v2040_v14  ;;  %v191_v23 = vld [vmem:[%s3796_s6] sm:$0xff]  ;;  %v441_v24 = vld [vmem:[%s3797_s5 + $0x68] sm:$0xff]  ;;  %v438_v29 = vld [vmem:[%s3797_s5 + $0x50] sm:$0xff] }
  0x1c   :  { %324 = vperm.xlu0 %2145, %v310_v15   ;;  %314 = vperm.xlu1 %2146, %v308_v16   ;;  %v440_v25 = vld [vmem:[%s3797_s5 + $0x60] sm:$0xff]  ;;  %v437_v30 = vld [vmem:[%s3797_s5 + $0x48] sm:$0xff]  ;;  %v435_v34 = vld [vmem:[%s3797_s5 + $0x38] sm:$0xff] }
  0x1d   :  { %2058 = vmatpush.msk.msrb.mxu3 %vm258_vm6, %v2273_v21  ;;  %2042 = vmatmul.msk.f32.vlgmr.msra.gmra.mxu0 %vm103_vm2, %v92_v19  ;;  %v250_v28 = vld [vmem:[%s3798_s1] sm:$0xff]  ;;  %v251_v33 = vld [vmem:[%s3798_s1 + $0x8] sm:$0xff]  ;;  %v434_v35 = vld [vmem:[%s3797_s5 + $0x30] sm:$0xff] }
  0x1e   :  { %v194_v36 = vld [vmem:[%s3796_s6 + $0x18] sm:$0xff]  ;;  %v252_v37 = vld [vmem:[%s3798_s1 + $0x10] sm:$0xff]  ;;  %v432_v38 = vld [vmem:[%s3797_s5 + $0x20] sm:$0xff] }
  0x1f   :  { %2059 = vmatpush.msk.msrb.mxu3 %vm257_vm7, %v2273_v21  ;;  %v431_v39 = vld [vmem:[%s3797_s5 + $0x18] sm:$0xff]  ;;  %v429_v41 = vld [vmem:[%s3797_s5 + $0x8] sm:$0xff]  ;;  %v428_v42 = vld [vmem:[%s3797_s5] sm:$0xff] }
  0x20   :  { %2047 = vmatmul.msk.f32.gmra.mxu1 %vm3775_vm0, %v87_v20  ;;  %v253_v40 = vld [vmem:[%s3798_s1 + $0x18] sm:$0xff]  ;;  %v668_v43 = vld [vmem:[%s3799_s7 + $0x70] sm:$0xff]  ;;  %v667_v44 = vld [vmem:[%s3799_s7 + $0x68] sm:$0xff] }
  0x21   :  { %v665_v45 = vld [vmem:[%s3799_s7 + $0x58] sm:$0xff]  ;;  %v664_v46 = vld [vmem:[%s3799_s7 + $0x50] sm:$0xff]  ;;  %v662_v47 = vld [vmem:[%s3799_s7 + $0x40] sm:$0xff] }
  0x22   :  { %2045 = vmatmul.msk.f32.gmra.mxu3 %vm103_vm2, %v95_v22  ;;  %2052 = vmatmul.msk.f32.vlgmr.msrb.gmra.mxu2 %vm200_vm8, %v191_v23  ;;  %v661_v48 = vld [vmem:[%s3799_s7 + $0x38] sm:$0xff]  ;;  %v659_v49 = vld [vmem:[%s3799_s7 + $0x28] sm:$0xff]  ;;  %v658_v50 = vld [vmem:[%s3799_s7 + $0x20] sm:$0xff] }
  0x23   :  { %v656_v51 = vld [vmem:[%s3799_s7 + $0x10] sm:$0xff]  ;;  %v655_v52 = vld [vmem:[%s3799_s7 + $0x8] sm:$0xff]  ;;  %v654_v53 = vld [vmem:[%s3799_s7] sm:$0xff] }
  0x24   :  { %511 = vperm.xlu0 %2145, %v441_v24   ;;  %506 = vperm.xlu1 %2146, %v440_v25   ;;  %v1149_v54 = vld [vmem:[%s3800_s8 + $0x70] sm:$0xff]  ;;  %v1147_v55 = vld [vmem:[%s3800_s8 + $0x60] sm:$0xff]  ;;  %v1146_v56 = vld [vmem:[%s3800_s8 + $0x58] sm:$0xff] }
  0x25   :  { %v1144_v57 = vld [vmem:[%s3800_s8 + $0x48] sm:$0xff]  ;;  %v1143_v58 = vld [vmem:[%s3800_s8 + $0x40] sm:$0xff]  ;;  %v443_v59 = vld [vmem:[%s3797_s5 + $0x78] sm:$0xff] }
  0x26   :  { %521 = vperm.xlu2 %2147, %v443_v59   ;;  %v1141_v60 = vld [vmem:[%s3800_s8 + $0x30] sm:$0xff]  ;;  %v1140_v61 = vld [vmem:[%s3800_s8 + $0x28] sm:$0xff]  ;;  %v1138_v62 = vld [vmem:[%s3800_s8 + $0x18] sm:$0xff] }
  0x27   :  { %v1137_v63 = vld [vmem:[%s3800_s8 + $0x10] sm:$0xff]  ;;  %v1135_v1 = vld [vmem:[%s3800_s8] sm:$0xff]  ;;  %v439_v3 = vld [vmem:[%s3797_s5 + $0x58] sm:$0xff] }
  0x28   :  { %2048 = vmatmul.msk.f32.gmra.mxu1 %vm3775_vm0, %v88_v26  ;;  %v442_v0 = vld [vmem:[%s3797_s5 + $0x70] sm:$0xff]  ;;  %v1356_v8 = vld [vmem:[%s3747_s16 + $0x20] sm:$0xff]  ;;  %v1353_v13 = vld [vmem:[%s3747_s16 + $0x8] sm:$0xff] }
  0x29   :  { %v436_v9 = vld [vmem:[%s3797_s5 + $0x40] sm:$0xff]  ;;  %v1354_v12 = vld [vmem:[%s3747_s16 + $0x10] sm:$0xff]  ;;  %v433_v15 = vld [vmem:[%s3797_s5 + $0x28] sm:$0xff] }
  0x2a   :  { %2053 = vmatmul.msk.f32.gmra.mxu2 %vm200_vm8, %v192_v27  ;;  %2060 = vmatmul.msk.f32.vlgmr.msrb.gmra.mxu3 %vm3775_vm0, %v250_v28  ;;  %v1456_v22 = vld [vmem:[%s3748_s18 + $0x38] sm:$0xff]  ;;  %v1455_v23 = vld [vmem:[%s3748_s18 + $0x30] sm:$0xff] }
  0x2b   :  { %v430_v25 = vld [vmem:[%s3797_s5 + $0x10] sm:$0xff] }
  0x2c   :  { %496 = vperm.xlu0 %2145, %v438_v29   ;;  %491 = vperm.xlu1 %2146, %v437_v30  }
  0x2e   :  { %516 = vperm.xlu2 %2147, %v442_v0  }
  0x30   :  { %2049 = vmatmul.msk.f32.gmra.mxu1 %vm3775_vm0, %v89_v31 }
  0x32   :  { %2054 = vmatmul.msk.f32.gmra.mxu2 %vm200_vm8, %v193_v32  ;;  %2061 = vmatmul.msk.f32.gmra.mxu3 %vm3775_vm0, %v251_v33 }
  0x34   :  { %481 = vperm.xlu0 %2145, %v435_v34   ;;  %476 = vperm.xlu1 %2146, %v434_v35   ;;  %v669_v35 = vld [vmem:[%s3799_s7 + $0x78] sm:$0xff] }
  0x36   :  { %501 = vperm.xlu2 %2147, %v439_v3  }
  0x3a   :  { %2055 = vmatmul.msk.f32.gmra.mxu2 %vm200_vm8, %v194_v36  ;;  %2062 = vmatmul.msk.f32.gmra.mxu3 %vm3775_vm0, %v252_v37  ;;  %v1453_v37 = vld [vmem:[%s3748_s18 + $0x20] sm:$0xff] }
  0x3c   :  { %466 = vperm.xlu0 %2145, %v432_v38   ;;  %461 = vperm.xlu1 %2146, %v431_v39   ;;  %v1452_v38 = vld [vmem:[%s3748_s18 + $0x18] sm:$0xff] }
  0x3e   :  { %486 = vperm.xlu2 %2147, %v436_v9  }
  0x42   :  { %2063 = vmatmul.msk.f32.gmra.mxu3 %vm3775_vm0, %v253_v40 }
  0x44   :  { %451 = vperm.xlu0 %2145, %v429_v41   ;;  %446 = vperm.xlu1 %2146, %v428_v42  }
  0x46   :  { %471 = vperm.xlu2 %2147, %v433_v15  }
  0x4c   :  { %742 = vperm.xlu0 %2145, %v668_v43   ;;  %737 = vperm.xlu1 %2146, %v667_v44  }
  0x4e   :  { %456 = vperm.xlu2 %2147, %v430_v25  }
  0x54   :  { %727 = vperm.xlu0 %2145, %v665_v45   ;;  %722 = vperm.xlu1 %2146, %v664_v46  }
  0x56   :  { %747 = vperm.xlu2 %2147, %v669_v35  }
  0x5c   :  { %712 = vperm.xlu0 %2145, %v662_v47   ;;  %707 = vperm.xlu1 %2146, %v661_v48   ;;  %v666_v48 = vld [vmem:[%s3799_s7 + $0x60] sm:$0xff] }
  0x5e   :  { %732 = vperm.xlu2 %2147, %v666_v48  }
  0x64   :  { %697 = vperm.xlu0 %2145, %v659_v49   ;;  %692 = vperm.xlu1 %2146, %v658_v50   ;;  %v1450_v50 = vld [vmem:[%s3748_s18 + $0x8] sm:$0xff] }
  0x6c   :  { %682 = vperm.xlu0 %2145, %v656_v51   ;;  %677 = vperm.xlu1 %2146, %v655_v52   ;;  %v1449_v51 = vld [vmem:[%s3748_s18] sm:$0xff] }
  0x74   :  { %672 = vperm.xlu0 %2145, %v654_v53   ;;  %1223 = vperm.xlu1 %2146, %v1149_v54  }
  0x7c   :  { %1213 = vperm.xlu0 %2145, %v1147_v55   ;;  %1208 = vperm.xlu1 %2146, %v1146_v56  }
  0x84   :  { %1198 = vperm.xlu0 %2145, %v1144_v57   ;;  %1193 = vperm.xlu1 %2146, %v1143_v58  }
  0x86   :  { %v320_v20 = vpop.permute.xlu1 %319  ;;  %v330_v26 = vpop.permute.xlu0 %329 }
  0x8c   :  { %1183 = vperm.xlu0 %2145, %v1141_v60   ;;  %1178 = vperm.xlu1 %2146, %v1140_v61   ;;  %v663_v61 = vld [vmem:[%s3799_s7 + $0x48] sm:$0xff] }
  0x8d   :  { %717 = vperm.xlu2 %2147, %v663_v61   ;;  %v413_v61 = vld [vmem:[%s3753_s9 + $0x8] sm:$0xff] }
  0x8e   :  { %v315_v33 = vpop.permute.xlu1 %314  ;;  %v325_v45 = vpop.permute.xlu0 %324 }
  0x94   :  { %1168 = vperm.xlu0 %2145, %v1138_v62   ;;  %1163 = vperm.xlu1 %2146, %v1137_v63   ;;  %v1729_v62 = vld [vmem:[%s3749_s20 + $0x30] sm:$0xff]  ;;  %v1728_v63 = vld [vmem:[%s3749_s20 + $0x28] sm:$0xff] }
  0x95   :  { %v179_v6 = vpop.f32.mrf.mxu1 }
  0x9a   :  { %v137_v14 = vpop.f32.mrf.mxu0 }
  0x9b   :  { %v180_v17 = vadd.f32 %v179_v6, %v137_v14  ;;  %v1726_v6 = vld [vmem:[%s3749_s20 + $0x18] sm:$0xff] }
  0x9c   :  { %1153 = vperm.xlu0 %2145, %v1135_v1   ;;  %1397 = vperm.xlu1 %2146, %v1359_v2  }
  0x9d   :  { %v140_v4 = vpop.f32.mrf.mxu2  ;;  %v143_v5 = vpop.f32.mrf.mxu3 }
  0x9e   :  { %v182_v16 = vpop.f32.mrf.mxu1 }
  0x9f   :  { %v183_v24 = vadd.f32 %v182_v16, %v140_v4  ;;  %v660_v4 = vld [vmem:[%s3799_s7 + $0x30] sm:$0xff]  ;;  %v657_v16 = vld [vmem:[%s3799_s7 + $0x18] sm:$0xff] }
  0xa0   :  { %702 = vperm.xlu2 %2147, %v660_v4   ;;  %v1358_v4 = vld [vmem:[%s3747_s16 + $0x30] sm:$0xff] }
  0xa4   :  { %1387 = vperm.xlu0 %2145, %v1357_v7   ;;  %1382 = vperm.xlu1 %2146, %v1356_v8   ;;  %v1725_v7 = vld [vmem:[%s3749_s20 + $0x10] sm:$0xff] }
  0xa5   :  { %v146_v10 = vpop.f32.mrf.mxu3  ;;  %v234_v11 = vpop.f32.mrf.mxu2 }
  0xa6   :  { %v246_v21 = vadd.f32 %v234_v11, %v180_v17  ;;  %v185_v28 = vpop.f32.mrf.mxu1  ;;  %v1723_v17 = vld [vmem:[%s3749_s20] sm:$0xff] }
  0xa7   :  { %v186_v39 = vadd.f32 %v185_v28, %v143_v5 }
  0xa8   :  { %687 = vperm.xlu2 %2147, %v657_v16   ;;  %v1727_v16 = vld [vmem:[%s3749_s20 + $0x20] sm:$0xff] }
  0xac   :  { %1372 = vperm.xlu0 %2145, %v1354_v12   ;;  %1367 = vperm.xlu1 %2146, %v1353_v13  }
  0xad   :  { %v237_v18 = vpop.f32.mrf.mxu2  ;;  %v292_v19 = vpop.f32.mrf.mxu3 }
  0xae   :  { %v247_v27 = vadd.f32 %v237_v18, %v183_v24  ;;  %v304_v29 = vadd.f32 %v292_v19, %v246_v21  ;;  %v188_v46 = vpop.f32.mrf.mxu1  ;;  %v1863_v18 = vld [vmem:[%s3750_s22 + $0x8] sm:$0xff] }
  0xaf   :  { %v189_v52 = vadd.f32 %v188_v46, %v146_v10 }
  0xb0   :  { %v332_v36 = vadd.f32 %v315_v33, %v304_v29  ;;  %v1906_v33 = vld [vmem:[%s3751_s24 + $0x8] sm:$0xff] }
  0xb2   :  { %v2064_v42 = vmul.f32 -1.442695, %v332_v36 }
  0xb4   :  { %1494 = vperm.xlu0 %2145, %v1456_v22   ;;  %1489 = vperm.xlu1 %2146, %v1455_v23  }
  0xb5   :  { %v295_v30 = vpop.f32.mrf.mxu3  ;;  %v240_v32 = vpop.f32.mrf.mxu2 }
  0xb6   :  { %v305_v31 = vadd.f32 %v295_v30, %v247_v27  ;;  %v248_v41 = vadd.f32 %v240_v32, %v186_v39  ;;  %v1905_v32 = vld [vmem:[%s3751_s24] sm:$0xff] }
  0xb8   :  { %v333_v34 = vadd.f32 %v320_v20, %v305_v31  ;;  %v1150_v31 = vld [vmem:[%s3800_s8 + $0x78] sm:$0xff] }
  0xb9   :  { %1228 = vperm.xlu2 %2147, %v1150_v31  }
  0xba   :  { %v2065_v40 = vmul.f32 -1.442695, %v333_v34 }
  0xbc   :  { %1479 = vperm.xlu0 %2145, %v1453_v37   ;;  %1474 = vperm.xlu1 %2146, %v1452_v38   ;;  %2151 = vpow2.f32 %v2065_v40 }
  0xbd   :  { %v298_v43 = vpop.f32.mrf.mxu3  ;;  %2153 = vpow2.f32 %v2064_v42  ;;  %v243_v49 = vpop.f32.mrf.mxu2 }
  0xbe   :  { %v306_v44 = vadd.f32 %v298_v43, %v248_v41  ;;  %v249_v55 = vadd.f32 %v243_v49, %v189_v52 }
  0xc0   :  { %v334_v47 = vadd.f32 %v325_v45, %v306_v44 }
  0xc2   :  { %v2066_v53 = vmul.f32 -1.442695, %v334_v47  ;;  %v2152_v54 = vpop.eup %2151 }
  0xc3   :  { %v2154_v58 = vpop.eup %2153  ;;  %v2658_v59 = vadd.f32 1.0, %v2152_v54  ;;  %v1148_v54 = vld [vmem:[%s3800_s8 + $0x68] sm:$0xff] }
  0xc4   :  { %2155 = vpow2.f32 %v2066_v53  ;;  %1464 = vperm.xlu0 %2145, %v1450_v50   ;;  %1459 = vperm.xlu1 %2146, %v1449_v51   ;;  %v2669_v1 = vadd.f32 1.0, %v2154_v58  ;;  %v412_v58 = vld [vmem:[%s3753_s9] sm:$0xff] }
  0xc5   :  { %v301_v56 = vpop.f32.mrf.mxu3  ;;  %2157 = vrcp.f32 %v2658_v59  ;;  %vm372_vm2 = vweird.f32 %v2658_v59  ;;  %v376_v40 = vand.u32 2147483647, %v2658_v59  ;;  %v378_v41 = vand.u32 2147483648, %v2658_v59  ;;  %1218 = vperm.xlu2 %2147, %v1148_v54  }
  0xc6   :  { %v307_v57 = vadd.f32 %v301_v56, %v249_v55  ;;  %v363_v48 = vand.u32 2147483648, %v2669_v1  ;;  %vm357_vm6 = vweird.f32 %v2669_v1  ;;  %v361_v50 = vand.u32 2147483647, %v2669_v1 }
  0xc7   :  { %v379_v52 = vor.u32 1.1754944e-38, %v378_v41  ;;  %vm377_vm8 = vcmp.eq.f32.partialorder %v376_v40, 8.507059e+37  ;;  %v512_v41 = vpop.permute.xlu0 %511 }
  0xc8   :  { %v335_v60 = vadd.f32 %v330_v26, %v307_v57  ;;  %v364_v56 = vor.u32 1.1754944e-38, %v363_v48  ;;  %v1987_v57 = vld [vmem:[%s3752_s26 + $0x8] sm:$0xff] }
  0xca   :  { %v2156_v0 = vpop.eup %2155  ;;  %v2067_v2 = vmul.f32 -1.442695, %v335_v60  ;;  %v1145_v60 = vld [vmem:[%s3800_s8 + $0x50] sm:$0xff] }
  0xcb   :  { %v2672_v3 = vadd.f32 1.0, %v2156_v0  ;;  %v2679_v5 = vpop.eup %2157  ;;  %v1139_v0 = vld [vmem:[%s3800_s8 + $0x20] sm:$0xff] }
  0xcc   :  { %2159 = vpow2.f32 %v2067_v2  ;;  %1763 = vperm.xlu0 %2145, %v1729_v62   ;;  %1758 = vperm.xlu1 %2146, %v1728_v63   ;;  %v368_v13 = vmul.f32 %v2679_v5, %v2658_v59  ;;  %vm373_vm12 = vweird.f32 %v2679_v5  ;;  %v1142_v62 = vld [vmem:[%s3800_s8 + $0x38] sm:$0xff]  ;;  %v414_v63 = vld [vmem:[%s3753_s9 + $0x10] sm:$0xff]  ;;  %v1136_v2 = vld [vmem:[%s3800_s8 + $0x8] sm:$0xff] }
  0xcd   :  { %2161 = vrcp.f32 %v2672_v3  ;;  %vm387_vm11 = vweird.f32 %v2672_v3  ;;  %v393_v34 = vand.u32 2147483648, %v2672_v3  ;;  %v391_v37 = vand.u32 2147483647, %v2672_v3  ;;  %vm2742_vm4 = vmor %vm372_vm2, %vm373_vm12  ;;  %1203 = vperm.xlu2 %2147, %v1145_v60  }
  0xce   :  { %2163 = vrcp.f32 %v2669_v1  ;;  %v369_v19 = vsub.f32 1.0, %v368_v13  ;;  %v421_v13 = vld [vmem:[%s3753_s9 + $0x48] sm:$0xff] }
  0xcf   :  { %v394_v46 = vor.u32 1.1754944e-38, %v393_v34  ;;  %vm392_vm5 = vcmp.eq.f32.partialorder %v391_v37, 8.507059e+37  ;;  %v522_v37 = vpop.permute.xlu2 %521 }
  0xd0   :  { %v370_v25 = vmul.f32 %v2679_v5, %v369_v19  ;;  %v424_v19 = vld [vmem:[%s3753_s9 + $0x60] sm:$0xff] }
  0xd2   :  { %v2160_v8 = vpop.eup %2159  ;;  %v371_v38 = vadd.f32 %v2679_v5, %v370_v25 }
  0xd3   :  { %v2687_v9 = vpop.eup %2161  ;;  %v351_v10 = vadd.f32 1.0, %v2160_v8  ;;  %v1352_v8 = vld [vmem:[%s3747_s16] sm:$0xff] }
  0xd4   :  { %v2689_v11 = vpop.eup %2163  ;;  %1748 = vperm.xlu0 %2145, %v1726_v6   ;;  %1743 = vperm.xlu1 %2146, %v1725_v7   ;;  %v383_v12 = vmul.f32 %v2687_v9, %v2672_v3  ;;  %vm388_vm9 = vweird.f32 %v2687_v9  ;;  %v375_v49 = vsel %vm2742_vm4, %v2679_v5, %v371_v38  ;;  %v416_v3 = vld [vmem:[%s3753_s9 + $0x20] sm:$0xff]  ;;  %v417_v5 = vld [vmem:[%s3753_s9 + $0x28] sm:$0xff]  ;;  %v1355_v6 = vld [vmem:[%s3747_s16 + $0x18] sm:$0xff] }
  0xd5   :  { %2165 = vrcp.f32 %v351_v10  ;;  %v353_v14 = vmul.f32 %v2689_v11, %v2669_v1  ;;  %v408_v26 = vand.u32 2147483648, %v351_v10  ;;  %v406_v29 = vand.u32 2147483647, %v351_v10  ;;  %vm2726_vm15 = vmor %vm387_vm11, %vm388_vm9  ;;  %1188 = vperm.xlu2 %2147, %v1142_v62   ;;  %v415_v1 = vld [vmem:[%s3753_s9 + $0x18] sm:$0xff]  ;;  %v418_v7 = vld [vmem:[%s3753_s9 + $0x30] sm:$0xff] }
  0xd6   :  { %v384_v15 = vsub.f32 1.0, %v383_v12  ;;  %vm358_vm13 = vweird.f32 %v2689_v11  ;;  %vm402_vm14 = vweird.f32 %v351_v10  ;;  %v380_v55 = vsel %vm377_vm8, %v379_v52, %v375_v49  ;;  %v1451_v12 = vld [vmem:[%s3748_s18 + $0x10] sm:$0xff] }
  0xd7   :  { %v354_v21 = vsub.f32 1.0, %v353_v14  ;;  %v409_v39 = vor.u32 1.1754944e-38, %v408_v26  ;;  %vm407_vm3 = vcmp.eq.f32.partialorder %v406_v29, 8.507059e+37  ;;  %vm359_vm7 = vmor %vm357_vm6, %vm358_vm13  ;;  %vm362_vm9 = vcmp.eq.f32.partialorder %v361_v50, 8.507059e+37  ;;  %v1730_v14 = vld [vmem:[%s3749_s20 + $0x38] sm:$0xff]  ;;  %v517_v40 = vpop.permute.xlu2 %516 }
  0xd8   :  { %v385_v23 = vmul.f32 %v2687_v9, %v384_v15  ;;  %v422_v15 = vld [vmem:[%s3753_s9 + $0x50] sm:$0xff] }
  0xd9   :  { %v355_v27 = vmul.f32 %v2689_v11, %v354_v21  ;;  %v425_v21 = vld [vmem:[%s3753_s9 + $0x68] sm:$0xff] }
  0xda   :  { %v386_v30 = vadd.f32 %v2687_v9, %v385_v23  ;;  %v426_v23 = vld [vmem:[%s3753_s9 + $0x70] sm:$0xff] }
  0xdb   :  { %v2166_v20 = vpop.eup %2165  ;;  %v356_v44 = vadd.f32 %v2689_v11, %v355_v27 }
  0xdc   :  { %1733 = vperm.xlu0 %2145, %v1723_v17   ;;  %1871 = vperm.xlu1 %2146, %v1863_v18   ;;  %v398_v22 = vmul.f32 %v2166_v20, %v351_v10  ;;  %vm403_vm10 = vweird.f32 %v2166_v20  ;;  %v390_v43 = vsel %vm2726_vm15, %v2687_v9, %v386_v30  ;;  %v419_v9 = vld [vmem:[%s3753_s9 + $0x38] sm:$0xff]  ;;  %v1454_v10 = vld [vmem:[%s3748_s18 + $0x28] sm:$0xff] }
  0xdd   :  { %vm404_vm1 = vmor %vm402_vm14, %vm403_vm10  ;;  %v395_v51 = vsel %vm392_vm5, %v394_v46, %v390_v43  ;;  %v360_v53 = vsel %vm359_vm7, %v2689_v11, %v356_v44  ;;  %vm524_vm10 = vcmask 261120   ;;  %1173 = vperm.xlu2 %2147, %v1139_v0   ;;  %v420_v11 = vld [vmem:[%s3753_s9 + $0x40] sm:$0xff]  ;;  %v423_v17 = vld [vmem:[%s3753_s9 + $0x58] sm:$0xff] }
  0xde   :  { %v399_v24 = vsub.f32 1.0, %v398_v22  ;;  %v365_v59 = vsel %vm362_vm9, %v364_v56, %v360_v53  ;;  %v1724_v18 = vld [vmem:[%s3749_s20 + $0x8] sm:$0xff]  ;;  %v1986_v22 = vld [vmem:[%s3752_s26] sm:$0xff] }
  0xdf   :  { %v502_v44 = vpop.permute.xlu2 %501 }
  0xe0   :  { %v400_v28 = vmul.f32 %v2166_v20, %v399_v24  ;;  %v427_v24 = vld [vmem:[%s3753_s9 + $0x78] sm:$0xff] }
  0xe2   :  { %v401_v35 = vadd.f32 %v2166_v20, %v400_v28 }
  0xe4   :  { %1909 = vperm.xlu0 %2145, %v1905_v32   ;;  %1914 = vperm.xlu1 %2146, %v1906_v33   ;;  %v405_v42 = vsel %vm404_vm1, %v2166_v20, %v401_v35  ;;  %v1862_v20 = vld [vmem:[%s3750_s22] sm:$0xff] }
  0xe5   :  { %v410_v45 = vsel %vm407_vm3, %v409_v39, %v405_v42  ;;  %1158 = vperm.xlu2 %2147, %v1136_v2   ;;  %v507_v42 = vpop.permute.xlu1 %506 }
  0xe6   :  { %585 = vmatpush.msrb.mxu0 %v410_v45  ;;  %v497_v45 = vpop.permute.xlu0 %496 }
  0xe8   :  { %586 = vmatpush.msrb.mxu0 %v395_v51  ;;  %v487_v51 = vpop.permute.xlu2 %486 }
  0xea   :  { %587 = vmatpush.msrb.mxu0 %v380_v55 }
  0xec   :  { %588 = vmatpush.msrb.mxu0 %v365_v59  ;;  %1995 = vperm.xlu0 %2145, %v1987_v57  }
  0xed   :  { %2068 = vmatmul.msk.f32.vlgmr.msrb.gmra.mxu0 %vm524_vm10, %v412_v58  ;;  %1392 = vperm.xlu2 %2147, %v1358_v4   ;;  %v492_v46 = vpop.permute.xlu1 %491 }
  0xee   :  { %v482_v53 = vpop.permute.xlu0 %481 }
  0xf0   :  { %v472_v59 = vpop.permute.xlu2 %471 }
  0xf5   :  { %2069 = vmatmul.msk.f32.gmra.mxu0 %vm524_vm10, %v413_v61  ;;  %1377 = vperm.xlu2 %2147, %v1355_v6   ;;  %v477_v55 = vpop.permute.xlu1 %476 }
  0xf6   :  { %v467_v61 = vpop.permute.xlu0 %466 }
  0xfd   :  { %2070 = vmatmul.msk.f32.gmra.mxu0 %vm524_vm10, %v414_v63  ;;  %1362 = vperm.xlu2 %2147, %v1352_v8   ;;  %v462_v63 = vpop.permute.xlu1 %461 }
 0x105   :  { %2071 = vmatmul.msk.f32.gmra.mxu0 %vm524_vm10, %v415_v1  ;;  %1484 = vperm.xlu2 %2147, %v1454_v10   ;;  %v1119_v10 = vld [vmem:[%s3755_s13] sm:$0xff] }
 0x10d   :  { %2072 = vmatmul.msk.f32.gmra.mxu0 %vm524_vm10, %v416_v3  ;;  %1469 = vperm.xlu2 %2147, %v1451_v12   ;;  %v457_v3 = vpop.permute.xlu2 %456  ;;  %v1120_v12 = vld [vmem:[%s3755_s13 + $0x8] sm:$0xff] }
 0x115   :  { %2073 = vmatmul.msk.f32.gmra.mxu0 %vm524_vm10, %v417_v5  ;;  %1768 = vperm.xlu2 %2147, %v1730_v14   ;;  %v452_v5 = vpop.permute.xlu0 %451  ;;  %v1121_v14 = vld [vmem:[%s3755_s13 + $0x10] sm:$0xff] }
 0x11d   :  { %2074 = vmatmul.msk.f32.gmra.mxu0 %vm524_vm10, %v418_v7  ;;  %1753 = vperm.xlu2 %2147, %v1727_v16   ;;  %v447_v7 = vpop.permute.xlu1 %446  ;;  %v1122_v16 = vld [vmem:[%s3755_s13 + $0x18] sm:$0xff] }
 0x125   :  { %2075 = vmatmul.msk.f32.gmra.mxu0 %vm524_vm10, %v419_v9  ;;  %1738 = vperm.xlu2 %2147, %v1724_v18   ;;  %v638_v9 = vld [vmem:[%s3754_s11] sm:$0xff] }
 0x126   :  { %v1123_v18 = vld [vmem:[%s3755_s13 + $0x20] sm:$0xff] }
 0x12d   :  { %2076 = vmatmul.msk.f32.gmra.mxu0 %vm524_vm10, %v420_v11  ;;  %1866 = vperm.xlu2 %2147, %v1862_v20   ;;  %v639_v11 = vld [vmem:[%s3754_s11 + $0x8] sm:$0xff] }
 0x12e   :  { %v1124_v20 = vld [vmem:[%s3755_s13 + $0x28] sm:$0xff] }
 0x135   :  { %2077 = vmatmul.msk.f32.gmra.mxu0 %vm524_vm10, %v421_v13  ;;  %1990 = vperm.xlu2 %2147, %v1986_v22   ;;  %v640_v13 = vld [vmem:[%s3754_s11 + $0x10] sm:$0xff] }
 0x136   :  { %v1125_v22 = vld [vmem:[%s3755_s13 + $0x30] sm:$0xff] }
 0x13d   :  { %2078 = vmatmul.msk.f32.gmra.mxu0 %vm524_vm10, %v422_v15  ;;  %v641_v15 = vld [vmem:[%s3754_s11 + $0x18] sm:$0xff] }
 0x145   :  { %2079 = vmatmul.msk.f32.gmra.mxu0 %vm524_vm10, %v423_v17  ;;  %v642_v17 = vld [vmem:[%s3754_s11 + $0x20] sm:$0xff] }
 0x14d   :  { %2080 = vmatmul.msk.f32.gmra.mxu0 %vm524_vm10, %v424_v19  ;;  %v643_v19 = vld [vmem:[%s3754_s11 + $0x28] sm:$0xff] }
 0x155   :  { %2081 = vmatmul.msk.f32.gmra.mxu0 %vm524_vm10, %v425_v21  ;;  %v644_v21 = vld [vmem:[%s3754_s11 + $0x30] sm:$0xff] }
 0x15d   :  { %2082 = vmatmul.msk.f32.gmra.mxu0 %vm524_vm10, %v426_v23  ;;  %v645_v23 = vld [vmem:[%s3754_s11 + $0x38] sm:$0xff] }
 0x165   :  { %2083 = vmatmul.msk.f32.gmra.mxu0 %vm524_vm10, %v427_v24  ;;  %v1126_v24 = vld [vmem:[%s3755_s13 + $0x38] sm:$0xff] }
 0x16a   :  { %v2867_v25 = vpop.f32.mrf.mxu0 }
 0x16b   :  { %v2934_v8 = vadd.f32 %v2867_v25, %v447_v7  ;;  %v2988_v25 = vpop.permute.xlu0 %742 }
 0x16d   :  { %3807 = vst [vmem:[#allocation4_spill] sm:$0xff] %v2934_v8 }
 0x172   :  { %v2869_v26 = vpop.f32.mrf.mxu0 }
 0x173   :  { %v2929_v6 = vadd.f32 %v2869_v26, %v452_v5  ;;  %v646_v26 = vld [vmem:[%s3754_s11 + $0x40] sm:$0xff]  ;;  %v1134_v5 = vld [vmem:[%s3755_s13 + $0x78] sm:$0xff] }
 0x175   :  { %3806 = vst [vmem:[#allocation3_spill] sm:$0xff] %v2929_v6 }
 0x17a   :  { %v2871_v27 = vpop.f32.mrf.mxu0 }
 0x17b   :  { %v2924_v4 = vadd.f32 %v2871_v27, %v457_v3  ;;  %v1127_v27 = vld [vmem:[%s3755_s13 + $0x40] sm:$0xff]  ;;  %v653_v3 = vld [vmem:[%s3754_s11 + $0x78] sm:$0xff] }
 0x17d   :  { %3805 = vst [vmem:[#allocation2_spill] sm:$0xff] %v2924_v4 }
 0x182   :  { %v599_v28 = vpop.f32.mrf.mxu0 }
 0x183   :  { %v2919_v2 = vadd.f32 %v599_v28, %v462_v63  ;;  %v2996_v28 = vpop.permute.xlu2 %747 }
 0x18a   :  { %v602_v29 = vpop.f32.mrf.mxu0 }
 0x18b   :  { %v2915_v1 = vadd.f32 %v602_v29, %v467_v61  ;;  %v647_v29 = vld [vmem:[%s3754_s11 + $0x48] sm:$0xff] }
 0x192   :  { %v605_v30 = vpop.f32.mrf.mxu0 }
 0x193   :  { %v2911_v0 = vadd.f32 %v605_v30, %v472_v59  ;;  %v1128_v30 = vld [vmem:[%s3755_s13 + $0x48] sm:$0xff]  ;;  %v1133_v59 = vld [vmem:[%s3755_s13 + $0x70] sm:$0xff] }
 0x19a   :  { %v608_v31 = vpop.f32.mrf.mxu0 }
 0x19b   :  { %v2907_v62 = vadd.f32 %v608_v31, %v477_v55  ;;  %v3004_v31 = vpop.permute.xlu0 %727  ;;  %v652_v55 = vld [vmem:[%s3754_s11 + $0x70] sm:$0xff] }
 0x1a2   :  { %v611_v32 = vpop.f32.mrf.mxu0 }
 0x1a3   :  { %v2903_v60 = vadd.f32 %v611_v32, %v482_v53  ;;  %v648_v32 = vld [vmem:[%s3754_s11 + $0x50] sm:$0xff] }
 0x1aa   :  { %v614_v33 = vpop.f32.mrf.mxu0 }
 0x1ab   :  { %v2899_v58 = vadd.f32 %v614_v33, %v487_v51  ;;  %v1129_v33 = vld [vmem:[%s3755_s13 + $0x50] sm:$0xff] }
 0x1b2   :  { %v617_v34 = vpop.f32.mrf.mxu0 }
 0x1b3   :  { %v2895_v57 = vadd.f32 %v617_v34, %v492_v46  ;;  %v3012_v34 = vpop.permute.xlu2 %732  ;;  %v651_v46 = vld [vmem:[%s3754_s11 + $0x68] sm:$0xff] }
 0x1ba   :  { %v620_v35 = vpop.f32.mrf.mxu0 }
 0x1bb   :  { %v2891_v56 = vadd.f32 %v620_v35, %v497_v45  ;;  %v3014_v35 = vpop.permute.xlu0 %712 }
 0x1c2   :  { %v623_v36 = vpop.f32.mrf.mxu0 }
 0x1c3   :  { %v2887_v54 = vadd.f32 %v623_v36, %v502_v44  ;;  %v649_v36 = vld [vmem:[%s3754_s11 + $0x58] sm:$0xff] }
 0x1ca   :  { %v626_v38 = vpop.f32.mrf.mxu0 }
 0x1cb   :  { %v2883_v52 = vadd.f32 %v626_v38, %v507_v42  ;;  %v3022_v38 = vpop.permute.xlu1 %737  ;;  %v1131_v42 = vld [vmem:[%s3755_s13 + $0x60] sm:$0xff] }
 0x1d2   :  { %v629_v39 = vpop.f32.mrf.mxu0 }
 0x1d3   :  { %v2879_v50 = vadd.f32 %v629_v39, %v512_v41  ;;  %v3024_v39 = vpop.permute.xlu2 %717  ;;  %v650_v41 = vld [vmem:[%s3754_s11 + $0x60] sm:$0xff] }
 0x1da   :  { %v632_v43 = vpop.f32.mrf.mxu0 }
 0x1db   :  { %v2875_v49 = vadd.f32 %v632_v43, %v517_v40  ;;  %v3026_v40 = vpop.permute.xlu0 %697  ;;  %v3034_v43 = vpop.permute.xlu1 %722 }
 0x1dc   :  { %v3036_v44 = vpop.permute.xlu2 %702 }
 0x1e2   :  { %v635_v47 = vpop.f32.mrf.mxu0 }
 0x1e3   :  { %v2873_v48 = vadd.f32 %v635_v47, %v522_v37  ;;  %v1130_v37 = vld [vmem:[%s3755_s13 + $0x58] sm:$0xff]  ;;  %v683_v45 = vpop.permute.xlu0 %682  ;;  %v1132_v47 = vld [vmem:[%s3755_s13 + $0x68] sm:$0xff]  ;;  %v3044_v51 = vpop.permute.xlu1 %707 }
 0x1e4   :  { %v688_v53 = vpop.permute.xlu2 %687 }
 0x1e5   :  { %750 = vmatpush.msra.mxu2 %v2873_v48  ;;  %1231 = vmatpush.msrb.mxu1 %v2873_v48 }
 0x1e7   :  { %751 = vmatpush.msra.mxu2 %v2875_v49  ;;  %1232 = vmatpush.msrb.mxu1 %v2875_v49 }
 0x1e9   :  { %752 = vmatpush.msra.mxu2 %v2879_v50  ;;  %1233 = vmatpush.msrb.mxu1 %v2879_v50 }
 0x1eb   :  { %753 = vmatpush.msra.mxu2 %v2883_v52  ;;  %1234 = vmatpush.msrb.mxu1 %v2883_v52  ;;  %v673_v61 = vpop.permute.xlu0 %672  ;;  %v3052_v63 = vpop.permute.xlu1 %692 }
 0x1ec   :  { %v3060_v7 = vpop.permute.xlu2 %1228 }
 0x1ed   :  { %754 = vmatpush.msra.mxu2 %v2887_v54  ;;  %1235 = vmatpush.msrb.mxu1 %v2887_v54 }
 0x1ef   :  { %755 = vmatpush.msra.mxu2 %v2891_v56  ;;  %1236 = vmatpush.msrb.mxu1 %v2891_v56 }
 0x1f1   :  { %756 = vmatpush.msra.mxu2 %v2895_v57  ;;  %1237 = vmatpush.msrb.mxu1 %v2895_v57 }
 0x1f3   :  { %757 = vmatpush.msra.mxu2 %v2899_v58  ;;  %1238 = vmatpush.msrb.mxu1 %v2899_v58 }
 0x1f5   :  { %758 = vmatpush.msra.mxu2 %v2903_v60  ;;  %1239 = vmatpush.msrb.mxu1 %v2903_v60 }
 0x1f7   :  { %759 = vmatpush.msra.mxu2 %v2907_v62  ;;  %1240 = vmatpush.msrb.mxu1 %v2907_v62 }
 0x1f9   :  { %760 = vmatpush.msra.mxu2 %v2911_v0  ;;  %1241 = vmatpush.msrb.mxu1 %v2911_v0 }
 0x1fb   :  { %761 = vmatpush.msra.mxu2 %v2915_v1  ;;  %1242 = vmatpush.msrb.mxu1 %v2915_v1 }
 0x1fd   :  { %762 = vmatpush.msra.mxu2 %v2919_v2  ;;  %1243 = vmatpush.msrb.mxu1 %v2919_v2 }
 0x1ff   :  { %763 = vmatpush.msra.mxu2 %v2924_v4  ;;  %1244 = vmatpush.msrb.mxu1 %v2924_v4 }
 0x201   :  { %764 = vmatpush.msra.mxu2 %v2929_v6  ;;  %1245 = vmatpush.msrb.mxu1 %v2929_v6 }
 0x203   :  { %765 = vmatpush.msra.mxu2 %v2934_v8  ;;  %1246 = vmatpush.msrb.mxu1 %v2934_v8 }
 0x204   :  { %766 = vmatmul.f32.vlgmr.msra.gmra.mxu2 %v638_v9  ;;  %1247 = vmatmul.f32.vlgmr.msrb.gmra.mxu1 %v1119_v10  ;;  %v3062_v9 = vpop.permute.xlu0 %1213  ;;  %v678_v10 = vpop.permute.xlu1 %677 }
 0x20c   :  { %769 = vmatmul.f32.gmra.mxu2 %v639_v11  ;;  %1250 = vmatmul.f32.gmra.mxu1 %v1120_v12  ;;  %v3064_v12 = vpop.permute.xlu2 %1218 }
 0x214   :  { %772 = vmatmul.f32.gmra.mxu2 %v640_v13  ;;  %1253 = vmatmul.f32.gmra.mxu1 %v1121_v14  ;;  %v3066_v13 = vpop.permute.xlu0 %1198 }
 0x21c   :  { %775 = vmatmul.f32.gmra.mxu2 %v641_v15  ;;  %1256 = vmatmul.f32.gmra.mxu1 %v1122_v16 }
 0x224   :  { %778 = vmatmul.f32.gmra.mxu2 %v642_v17  ;;  %1259 = vmatmul.f32.gmra.mxu1 %v1123_v18  ;;  %v3068_v17 = vpop.permute.xlu1 %1223 }
 0x22c   :  { %781 = vmatmul.f32.gmra.mxu2 %v643_v19  ;;  %1262 = vmatmul.f32.gmra.mxu1 %v1124_v20  ;;  %v3072_v19 = vpop.permute.xlu2 %1203 }
 0x234   :  { %784 = vmatmul.f32.gmra.mxu2 %v644_v21  ;;  %1265 = vmatmul.f32.gmra.mxu1 %v1125_v22  ;;  %v3074_v21 = vpop.permute.xlu0 %1183 }
 0x23c   :  { %787 = vmatmul.f32.gmra.mxu2 %v645_v23  ;;  %1268 = vmatmul.f32.gmra.mxu1 %v1126_v24 }
 0x244   :  { %790 = vmatmul.f32.gmra.mxu2 %v646_v26  ;;  %1271 = vmatmul.f32.gmra.mxu1 %v1127_v27  ;;  %v3076_v27 = vpop.permute.xlu1 %1208 }
 0x24c   :  { %793 = vmatmul.f32.gmra.mxu2 %v647_v29  ;;  %1274 = vmatmul.f32.gmra.mxu1 %v1128_v30 }
 0x254   :  { %796 = vmatmul.f32.gmra.mxu2 %v648_v32  ;;  %1277 = vmatmul.f32.gmra.mxu1 %v1129_v33  ;;  %v3080_v32 = vpop.permute.xlu2 %1188 }
 0x25c   :  { %799 = vmatmul.f32.gmra.mxu2 %v649_v36  ;;  %1280 = vmatmul.f32.gmra.mxu1 %v1130_v37  ;;  %v3082_v37 = vpop.permute.xlu0 %1168 }
 0x264   :  { %802 = vmatmul.f32.gmra.mxu2 %v650_v41  ;;  %1283 = vmatmul.f32.gmra.mxu1 %v1131_v42 }
 0x26c   :  { %805 = vmatmul.f32.gmra.mxu2 %v651_v46  ;;  %1286 = vmatmul.f32.gmra.mxu1 %v1132_v47 }
 0x274   :  { %808 = vmatmul.f32.gmra.mxu2 %v652_v55  ;;  %1289 = vmatmul.f32.gmra.mxu1 %v1133_v59 }
 0x27c   :  { %811 = vmatmul.f32.gmra.mxu2 %v653_v3  ;;  %1292 = vmatmul.f32.gmra.mxu1 %v1134_v5 }
 0x281   :  { %v1248_v11 = vpop.f32.mrf.mxu1 }
 0x287   :  { %v767_v14 = vpop.f32.mrf.mxu2 }
 0x288   :  { %v768_v15 = vadd.f32 %v767_v14, %v673_v61  ;;  %v3084_v61 = vpop.permute.xlu1 %1193 }
 0x289   :  { %v3070_v18 = vpop.f32.mrf.mxu1 }
 0x28a   :  { %v2084_v16 = vmul.f32 -1.442695, %v768_v15 }
 0x28c   :  { %2167 = vpow2.f32 %v2084_v16  ;;  %v3088_v16 = vpop.permute.xlu2 %1173 }
 0x28f   :  { %v770_v20 = vpop.f32.mrf.mxu2 }
 0x290   :  { %v771_v22 = vadd.f32 %v770_v20, %v678_v10  ;;  %v3093_v4 = vpop.permute.xlu1 %1178 }
 0x291   :  { %v3078_v29 = vpop.f32.mrf.mxu1 }
 0x292   :  { %v2168_v23 = vpop.eup %2167  ;;  %v2085_v24 = vmul.f32 -1.442695, %v771_v22 }
 0x293   :  { %v863_v26 = vadd.f32 1.0, %v2168_v23 }
 0x294   :  { %2169 = vpow2.f32 %v2085_v24 }
 0x295   :  { %2171 = vrcp.f32 %v863_v26  ;;  %v890_v14 = vand.u32 2147483648, %v863_v26  ;;  %vm884_vm12 = vweird.f32 %v863_v26 }
 0x297   :  { %v773_v30 = vpop.f32.mrf.mxu2 }
 0x298   :  { %v774_v33 = vadd.f32 %v773_v30, %v683_v45  ;;  %v888_v45 = vand.u32 2147483647, %v863_v26  ;;  %v1154_v30 = vpop.permute.xlu0 %1153 }
 0x299   :  { %v3086_v3 = vpop.f32.mrf.mxu1 }
 0x29a   :  { %v2170_v36 = vpop.eup %2169  ;;  %v2086_v41 = vmul.f32 -1.442695, %v774_v33  ;;  %vm889_vm14 = vcmp.eq.f32.partialorder %v888_v45, 8.507059e+37 }
 0x29b   :  { %v2172_v42 = vpop.eup %2171  ;;  %v864_v46 = vadd.f32 1.0, %v2170_v36 }
 0x29c   :  { %v880_v47 = vmul.f32 %v2172_v42, %v863_v26  ;;  %2173 = vpow2.f32 %v2086_v41  ;;  %vm885_vm11 = vweird.f32 %v2172_v42  ;;  %v891_v41 = vor.u32 1.1754944e-38, %v890_v14 }
 0x29d   :  { %2175 = vrcp.f32 %v864_v46  ;;  %vm886_vm13 = vmor %vm884_vm12, %vm885_vm11  ;;  %v905_v26 = vand.u32 2147483648, %v864_v46  ;;  %vm899_vm1 = vweird.f32 %v864_v46 }
 0x29e   :  { %v881_v55 = vsub.f32 1.0, %v880_v47  ;;  %v1249_v47 = vadd.f32 %v1248_v11, %v1154_v30 }
 0x29f   :  { %v776_v59 = vpop.f32.mrf.mxu2 }
 0x2a0   :  { %v777_v5 = vadd.f32 %v776_v59, %v688_v53  ;;  %v882_v10 = vmul.f32 %v2172_v42, %v881_v55 }
 0x2a2   :  { %v2174_v15 = vpop.eup %2173  ;;  %v2087_v20 = vmul.f32 -1.442695, %v777_v5  ;;  %v883_v22 = vadd.f32 %v2172_v42, %v882_v10 }
 0x2a3   :  { %v2176_v23 = vpop.eup %2175  ;;  %v865_v24 = vadd.f32 1.0, %v2174_v15  ;;  %v903_v15 = vand.u32 2147483647, %v864_v46 }
 0x2a4   :  { %v895_v33 = vmul.f32 %v2176_v23, %v864_v46  ;;  %2177 = vpow2.f32 %v2087_v20  ;;  %v887_v36 = vsel %vm886_vm13, %v2172_v42, %v883_v22  ;;  %vm900_vm15 = vweird.f32 %v2176_v23  ;;  %v3095_v20 = vpop.f32.mrf.mxu1  ;;  %v1159_v22 = vpop.permute.xlu2 %1158 }
 0x2a5   :  { %2179 = vrcp.f32 %v865_v24  ;;  %v892_v55 = vsel %vm889_vm14, %v891_v41, %v887_v36  ;;  %vm901_vm2 = vmor %vm899_vm1, %vm900_vm15  ;;  %v1252_v36 = vadd.f32 %v3070_v18, %v1159_v22  ;;  %vm904_vm3 = vcmp.eq.f32.partialorder %v903_v15, 8.507059e+37  ;;  %v1164_v18 = vpop.permute.xlu1 %1163 }
 0x2a6   :  { %v896_v53 = vsub.f32 1.0, %v895_v33  ;;  %v3090_v8 = vmul.f32 %v1249_v47, %v892_v55  ;;  %vm914_vm5 = vweird.f32 %v865_v24 }
 0x2a7   :  { %v779_v59 = vpop.f32.mrf.mxu2 }
 0x2a8   :  { %3808 = vst [vmem:[#allocation5_spill] sm:$0xff] %v3090_v8  ;;  %v780_v5 = vadd.f32 %v779_v59, %v3052_v63  ;;  %v897_v10 = vmul.f32 %v2176_v23, %v896_v53  ;;  %v906_v63 = vor.u32 1.1754944e-38, %v905_v26 }
 0x2aa   :  { %v2178_v6 = vpop.eup %2177  ;;  %v2088_v42 = vmul.f32 -1.442695, %v780_v5  ;;  %v898_v11 = vadd.f32 %v2176_v23, %v897_v10  ;;  %v918_v5 = vand.u32 2147483647, %v865_v24 }
 0x2ab   :  { %v2180_v14 = vpop.eup %2179  ;;  %v866_v45 = vadd.f32 1.0, %v2178_v6  ;;  %v920_v6 = vand.u32 2147483648, %v865_v24 }
 0x2ac   :  { %v910_v30 = vmul.f32 %v2180_v14, %v865_v24  ;;  %2181 = vpow2.f32 %v2088_v42  ;;  %v902_v33 = vsel %vm901_vm2, %v2176_v23, %v898_v11  ;;  %vm915_vm4 = vweird.f32 %v2180_v14  ;;  %v3101_v11 = vpop.f32.mrf.mxu1 }
 0x2ad   :  { %2183 = vrcp.f32 %v866_v45  ;;  %v907_v47 = vsel %vm904_vm3, %v906_v63, %v902_v33  ;;  %vm916_vm6 = vmor %vm914_vm5, %vm915_vm4  ;;  %vm919_vm7 = vcmp.eq.f32.partialorder %v918_v5, 8.507059e+37  ;;  %vm929_vm9 = vweird.f32 %v866_v45 }
 0x2ae   :  { %v911_v41 = vsub.f32 1.0, %v910_v30  ;;  %v3098_v55 = vmul.f32 %v1252_v36, %v907_v47  ;;  %v921_v30 = vor.u32 1.1754944e-38, %v920_v6 }
 0x2af   :  { %v782_v53 = vpop.f32.mrf.mxu2 }
 0x2b0   :  { %3809 = vst [vmem:[#allocation6_spill] sm:$0xff] %v3098_v55  ;;  %v783_v59 = vadd.f32 %v782_v53, %v3026_v40  ;;  %v912_v46 = vmul.f32 %v2180_v14, %v911_v41  ;;  %v1255_v40 = vadd.f32 %v3078_v29, %v1164_v18  ;;  %v935_v53 = vand.u32 2147483648, %v866_v45 }
 0x2b1   :  { %v1258_v18 = vadd.f32 %v3086_v3, %v3082_v37 }
 0x2b2   :  { %v2182_v10 = vpop.eup %2181  ;;  %v2089_v8 = vmul.f32 -1.442695, %v783_v59  ;;  %v913_v42 = vadd.f32 %v2180_v14, %v912_v46  ;;  %v933_v59 = vand.u32 2147483647, %v866_v45 }
 0x2b3   :  { %v2184_v23 = vpop.eup %2183  ;;  %v867_v26 = vadd.f32 1.0, %v2182_v10 }
 0x2b4   :  { %v925_v15 = vmul.f32 %v2184_v23, %v866_v45  ;;  %2185 = vpow2.f32 %v2089_v8  ;;  %v917_v22 = vsel %vm916_vm6, %v2180_v14, %v913_v42  ;;  %vm930_vm8 = vweird.f32 %v2184_v23 }
 0x2b5   :  { %2187 = vrcp.f32 %v867_v26  ;;  %v922_v63 = vsel %vm919_vm7, %v921_v30, %v917_v22  ;;  %vm931_vm10 = vmor %vm929_vm9, %vm930_vm8  ;;  %v936_v42 = vor.u32 1.1754944e-38, %v935_v53  ;;  %vm934_vm11 = vcmp.eq.f32.partialorder %v933_v59, 8.507059e+37 }
 0x2b6   :  { %v926_v33 = vsub.f32 1.0, %v925_v15  ;;  %v3104_v41 = vmul.f32 %v1255_v40, %v922_v63  ;;  %v3109_v15 = vpop.f32.mrf.mxu1  ;;  %v950_v63 = vand.u32 2147483648, %v867_v26  ;;  %vm944_vm13 = vweird.f32 %v867_v26 }
 0x2b7   :  { %v785_v36 = vpop.f32.mrf.mxu2 }
 0x2b8   :  { %3810 = vst [vmem:[#allocation7_spill] sm:$0xff] %v3104_v41  ;;  %v786_v24 = vadd.f32 %v785_v36, %v3036_v44  ;;  %v927_v47 = vmul.f32 %v2184_v23, %v926_v33  ;;  %v948_v36 = vand.u32 2147483647, %v867_v26 }
 0x2ba   :  { %v2186_v46 = vpop.eup %2185  ;;  %v2090_v10 = vmul.f32 -1.442695, %v786_v24  ;;  %v928_v8 = vadd.f32 %v2184_v23, %v927_v47  ;;  %vm949_vm15 = vcmp.eq.f32.partialorder %v948_v36, 8.507059e+37 }
 0x2bb   :  { %v2188_v14 = vpop.eup %2187  ;;  %v868_v6 = vadd.f32 1.0, %v2186_v46  ;;  %v951_v46 = vor.u32 1.1754944e-38, %v950_v63 }
 0x2bc   :  { %v940_v29 = vmul.f32 %v2188_v14, %v867_v26  ;;  %2189 = vpow2.f32 %v2090_v10  ;;  %v932_v5 = vsel %vm931_vm10, %v2184_v23, %v928_v8  ;;  %vm945_vm12 = vweird.f32 %v2188_v14 }
 0x2bd   :  { %2191 = vrcp.f32 %v868_v6  ;;  %v937_v22 = vsel %vm934_vm11, %v936_v42, %v932_v5  ;;  %vm946_vm14 = vmor %vm944_vm13, %vm945_vm12  ;;  %v1261_v10 = vadd.f32 %v3095_v20, %v3088_v16  ;;  %vm959_vm2 = vweird.f32 %v868_v6 }
 0x2be   :  { %v941_v44 = vsub.f32 1.0, %v940_v29  ;;  %v3111_v40 = vmul.f32 %v1258_v18, %v937_v22  ;;  %v1269_v42 = vpop.f32.mrf.mxu1  ;;  %v963_v22 = vand.u32 2147483647, %v868_v6 }
 0x2bf   :  { %v788_v30 = vpop.f32.mrf.mxu2 }
 0x2c0   :  { %v789_v45 = vadd.f32 %v788_v30, %v3044_v51  ;;  %v942_v33 = vmul.f32 %v2188_v14, %v941_v44  ;;  %v965_v44 = vand.u32 2147483648, %v868_v6  ;;  %vm964_vm4 = vcmp.eq.f32.partialorder %v963_v22, 8.507059e+37 }
 0x2c2   :  { %v2190_v23 = vpop.eup %2189  ;;  %v2091_v24 = vmul.f32 -1.442695, %v789_v45  ;;  %v943_v47 = vadd.f32 %v2188_v14, %v942_v33  ;;  %v966_v36 = vor.u32 1.1754944e-38, %v965_v44 }
 0x2c3   :  { %v2192_v37 = vpop.eup %2191  ;;  %v869_v3 = vadd.f32 1.0, %v2190_v23  ;;  %v1264_v23 = vadd.f32 %v3101_v11, %v3093_v4 }
 0x2c4   :  { %v955_v53 = vmul.f32 %v2192_v37, %v868_v6  ;;  %2193 = vpow2.f32 %v2091_v24  ;;  %v947_v59 = vsel %vm946_vm14, %v2188_v14, %v943_v47  ;;  %vm960_vm1 = vweird.f32 %v2192_v37 }
 0x2c5   :  { %2195 = vrcp.f32 %v869_v3  ;;  %v952_v8 = vsel %vm949_vm15, %v951_v46, %v947_v59  ;;  %vm961_vm3 = vmor %vm959_vm2, %vm960_vm1  ;;  %v980_v6 = vand.u32 2147483648, %v869_v3  ;;  %v978_v46 = vand.u32 2147483647, %v869_v3 }
 0x2c6   :  { %v956_v51 = vsub.f32 1.0, %v955_v53  ;;  %v3116_v5 = vmul.f32 %v1261_v10, %v952_v8  ;;  %vm974_vm6 = vweird.f32 %v869_v3 }
 0x2c7   :  { %v791_v29 = vpop.f32.mrf.mxu2  ;;  %v981_v11 = vor.u32 1.1754944e-38, %v980_v6  ;;  %vm979_vm8 = vcmp.eq.f32.partialorder %v978_v46, 8.507059e+37 }
 0x2c8   :  { %v792_v26 = vadd.f32 %v791_v29, %v3014_v35  ;;  %v957_v18 = vmul.f32 %v2192_v37, %v956_v51  ;;  %v1272_v51 = vpop.f32.mrf.mxu1 }
 0x2ca   :  { %v2194_v30 = vpop.eup %2193  ;;  %v2092_v14 = vmul.f32 -1.442695, %v792_v26  ;;  %v958_v45 = vadd.f32 %v2192_v37, %v957_v18  ;;  %v1267_v18 = vadd.f32 %v3109_v15, %v3074_v21  ;;  %v1270_v15 = vadd.f32 %v1269_v42, %v3080_v32 }
 0x2cb   :  { %v2196_v33 = vpop.eup %2195  ;;  %v870_v16 = vadd.f32 1.0, %v2194_v30 }
 0x2cc   :  { %v970_v20 = vmul.f32 %v2196_v33, %v869_v3  ;;  %2197 = vpow2.f32 %v2092_v14  ;;  %v962_v63 = vsel %vm961_vm3, %v2192_v37, %v958_v45  ;;  %vm975_vm5 = vweird.f32 %v2196_v33 }
 0x2cd   :  { %2199 = vrcp.f32 %v870_v16  ;;  %v967_v24 = vsel %vm964_vm4, %v966_v36, %v962_v63  ;;  %vm976_vm7 = vmor %vm974_vm6, %vm975_vm5  ;;  %v993_v3 = vand.u32 2147483647, %v870_v16  ;;  %vm989_vm10 = vweird.f32 %v870_v16 }
 0x2ce   :  { %v971_v35 = vsub.f32 1.0, %v970_v20  ;;  %v3121_v53 = vmul.f32 %v1264_v23, %v967_v24  ;;  %v995_v20 = vand.u32 2147483648, %v870_v16 }
 0x2cf   :  { %v794_v47 = vpop.f32.mrf.mxu2  ;;  %vm994_vm12 = vcmp.eq.f32.partialorder %v993_v3, 8.507059e+37 }
 0x2d0   :  { %v972_v59 = vmul.f32 %v2196_v33, %v971_v35  ;;  %v3127_v23 = vpop.f32.mrf.mxu1  ;;  %v996_v21 = vor.u32 1.1754944e-38, %v995_v20  ;;  %v795_v32 = vadd.f32 %v794_v47, %v3024_v39 }
 0x2d2   :  { %v2198_v10 = vpop.eup %2197  ;;  %v973_v8 = vadd.f32 %v2196_v33, %v972_v59 }
 0x2d3   :  { %v2200_v37 = vpop.eup %2199  ;;  %v871_v29 = vadd.f32 1.0, %v2198_v10 }
 0x2d4   :  { %v985_v26 = vmul.f32 %v2200_v37, %v870_v16  ;;  %v977_v4 = vsel %vm976_vm7, %v2196_v33, %v973_v8  ;;  %vm990_vm9 = vweird.f32 %v2200_v37 }
 0x2d5   :  { %2201 = vrcp.f32 %v871_v29  ;;  %v982_v22 = vsel %vm979_vm8, %v981_v11, %v977_v4  ;;  %vm991_vm11 = vmor %vm989_vm10, %vm990_vm9  ;;  %v1010_v8 = vand.u32 2147483648, %v871_v29  ;;  %vm1004_vm14 = vweird.f32 %v871_v29 }
 0x2d6   :  { %v986_v44 = vsub.f32 1.0, %v985_v26  ;;  %v3125_v14 = vmul.f32 %v1267_v18, %v982_v22  ;;  %v1008_v26 = vand.u32 2147483647, %v871_v29 }
 0x2d7   :  { %v797_v30 = vpop.f32.mrf.mxu2  ;;  %v1011_v11 = vor.u32 1.1754944e-38, %v1010_v8 }
 0x2d8   :  { %v987_v45 = vmul.f32 %v2200_v37, %v986_v44  ;;  %vm1009_vm1 = vcmp.eq.f32.partialorder %v1008_v26, 8.507059e+37  ;;  %v3134_v42 = vpop.f32.mrf.mxu1  ;;  %v798_v20 = vadd.f32 %v797_v30, %v3034_v43 }
 0x2da   :  { %v988_v63 = vadd.f32 %v2200_v37, %v987_v45  ;;  %v2093_v45 = vmul.f32 -1.442695, %v795_v32 }
 0x2db   :  { %v2202_v36 = vpop.eup %2201 }
 0x2dc   :  { %v1000_v33 = vmul.f32 %v2202_v36, %v871_v29  ;;  %v992_v35 = vsel %vm991_vm11, %v2200_v37, %v988_v63  ;;  %vm1005_vm13 = vweird.f32 %v2202_v36  ;;  %v1273_v37 = vadd.f32 %v1272_v51, %v3084_v61 }
 0x2dd   :  { %v997_v59 = vsel %vm994_vm12, %v996_v21, %v992_v35  ;;  %vm1006_vm15 = vmor %vm1004_vm14, %vm1005_vm13  ;;  %2203 = vpow2.f32 %v2093_v45  ;;  %v2094_v63 = vmul.f32 -1.442695, %v798_v20 }
 0x2de   :  { %v1001_v24 = vsub.f32 1.0, %v1000_v33  ;;  %v3130_v46 = vmul.f32 %v1270_v15, %v997_v59 }
 0x2df   :  { %v800_v6 = vpop.f32.mrf.mxu2  ;;  %2205 = vpow2.f32 %v2094_v63 }
 0x2e0   :  { %v1002_v10 = vmul.f32 %v2202_v36, %v1001_v24  ;;  %v801_v29 = vadd.f32 %v800_v6, %v3004_v31  ;;  %v3141_v51 = vpop.f32.mrf.mxu1 }
 0x2e2   :  { %v1003_v16 = vadd.f32 %v2202_v36, %v1002_v10  ;;  %v2095_v47 = vmul.f32 -1.442695, %v801_v29 }
 0x2e3   :  { %v2204_v35 = vpop.eup %2203 }
 0x2e4   :  { %v1007_v4 = vsel %vm1006_vm15, %v2202_v36, %v1003_v16  ;;  %v3144_v43 = vadd.f32 1.0, %v2204_v35 }
 0x2e5   :  { %v1012_v18 = vsel %vm1009_vm1, %v1011_v11, %v1007_v4  ;;  %v2206_v30 = vpop.eup %2205 }
 0x2e6   :  { %v3136_v22 = vmul.f32 %v1273_v37, %v1012_v18  ;;  %v3152_v10 = vadd.f32 1.0, %v2206_v30  ;;  %vm1019_vm14 = vweird.f32 %v3144_v43 }
 0x2e7   :  { %v803_v44 = vpop.f32.mrf.mxu2 }
 0x2e8   :  { %v804_v3 = vadd.f32 %v803_v44, %v3012_v34  ;;  %v3147_v24 = vpop.f32.mrf.mxu1  ;;  %vm1034_vm9 = vweird.f32 %v3152_v10 }
 0x2ea   :  { %v2096_v36 = vmul.f32 -1.442695, %v804_v3 }
 0x2ec   :  { %2207 = vpow2.f32 %v2096_v36 }
 0x2ef   :  { %v806_v61 = vpop.f32.mrf.mxu2 }
 0x2f0   :  { %v807_v39 = vadd.f32 %v806_v61, %v3022_v38  ;;  %v1287_v44 = vpop.f32.mrf.mxu1 }
 0x2f2   :  { %v2097_v33 = vmul.f32 -1.442695, %v807_v39  ;;  %v2208_v21 = vpop.eup %2207 }
 0x2f3   :  { %v3154_v8 = vadd.f32 1.0, %v2208_v21 }
 0x2f4   :  { %2209 = vpow2.f32 %v2097_v33 }
 0x2f5   :  { %2211 = vpow2.f32 %v2095_v47  ;;  %vm1064_vm5 = vweird.f32 %v3154_v8 }
 0x2f6   :  { %2213 = vrcp.f32 %v3144_v43 }
 0x2f7   :  { %v809_v34 = vpop.f32.mrf.mxu2 }
 0x2f8   :  { %v810_v31 = vadd.f32 %v809_v34, %v2988_v25 }
 0x2fa   :  { %v2210_v15 = vpop.eup %2209  ;;  %v2098_v59 = vmul.f32 -1.442695, %v810_v31 }
 0x2fb   :  { %v2212_v6 = vpop.eup %2211  ;;  %v3150_v38 = vadd.f32 1.0, %v2210_v15 }
 0x2fc   :  { %2215 = vpow2.f32 %v2098_v59  ;;  %v3156_v26 = vadd.f32 1.0, %v2212_v6  ;;  %v3161_v4 = vpop.eup %2213  ;;  %v1290_v59 = vpop.f32.mrf.mxu1 }
 0x2fd   :  { %2217 = vrcp.f32 %v3150_v38  ;;  %v1015_v18 = vmul.f32 %v3161_v4, %v3144_v43  ;;  %vm1020_vm10 = vweird.f32 %v3161_v4  ;;  %vm1079_vm12 = vweird.f32 %v3150_v38 }
 0x2fe   :  { %2219 = vrcp.f32 %v3152_v10  ;;  %vm1049_vm2 = vweird.f32 %v3156_v26 }
 0x2ff   :  { %v812_v25 = vpop.f32.mrf.mxu2  ;;  %2221 = vrcp.f32 %v3154_v8  ;;  %v1016_v29 = vsub.f32 1.0, %v1015_v18 }
 0x300   :  { %v813_v16 = vadd.f32 %v812_v25, %v2996_v28  ;;  %2223 = vrcp.f32 %v3156_v26 }
 0x301   :  { %v1017_v31 = vmul.f32 %v3161_v4, %v1016_v29 }
 0x302   :  { %v2216_v11 = vpop.eup %2215  ;;  %v2099_v37 = vmul.f32 -1.442695, %v813_v16 }
 0x303   :  { %v3165_v32 = vadd.f32 1.0, %v2216_v11  ;;  %v3169_v45 = vpop.eup %2217 }
 0x304   :  { %2225 = vpow2.f32 %v2099_v37  ;;  %v3172_v28 = vpop.eup %2219  ;;  %v1075_v63 = vmul.f32 %v3169_v45, %v3150_v38  ;;  %v3197_v37 = vadd.f32 %v1287_v44, %v3064_v12  ;;  %v1055_v12 = vand.u32 2147483648, %v3156_v26 }
 0x305   :  { %2227 = vrcp.f32 %v3165_v32  ;;  %v3174_v20 = vpop.eup %2221  ;;  %v1030_v36 = vmul.f32 %v3172_v28, %v3152_v10  ;;  %vm1035_vm6 = vweird.f32 %v3172_v28  ;;  %vm1094_vm7 = vweird.f32 %v3165_v32 }
 0x306   :  { %v3176_v3 = vpop.eup %2223  ;;  %v1060_v39 = vmul.f32 %v3174_v20, %v3154_v8  ;;  %v1076_v34 = vsub.f32 1.0, %v1075_v63  ;;  %vm1080_vm8 = vweird.f32 %v3169_v45  ;;  %vm1065_vm13 = vweird.f32 %v3174_v20 }
 0x307   :  { %v1045_v33 = vmul.f32 %v3176_v3, %v3156_v26  ;;  %v1031_v21 = vsub.f32 1.0, %v1030_v36  ;;  %vm1050_vm3 = vweird.f32 %v3176_v3  ;;  %v1083_v63 = vand.u32 2147483647, %v3150_v38  ;;  %vm3246_vm1 = vmor %vm1079_vm12, %vm1080_vm8 }
 0x308   :  { %v1061_v15 = vsub.f32 1.0, %v1060_v39  ;;  %v1077_v36 = vmul.f32 %v3169_v45, %v1076_v34  ;;  %v3205_v39 = vadd.f32 %v3161_v4, %v1017_v31 }
 0x309   :  { %v1046_v11 = vsub.f32 1.0, %v1045_v33  ;;  %v1032_v44 = vmul.f32 %v3172_v28, %v1031_v21  ;;  %vm1084_vm12 = vcmp.eq.f32.partialorder %v1083_v63, 8.507059e+37 }
 0x30a   :  { %v2226_v61 = vpop.eup %2225  ;;  %v1062_v34 = vmul.f32 %v3174_v20, %v1061_v15  ;;  %v1293_v15 = vpop.f32.mrf.mxu1 }
 0x30b   :  { %v3184_v47 = vpop.eup %2227  ;;  %v3188_v35 = vadd.f32 1.0, %v2226_v61  ;;  %v1047_v25 = vmul.f32 %v3176_v3, %v1046_v11  ;;  %v1085_v11 = vand.u32 2147483648, %v3150_v38 }
 0x30c   :  { %v1090_v30 = vmul.f32 %v3184_v47, %v3165_v32  ;;  %vm1095_vm4 = vweird.f32 %v3184_v47  ;;  %v1063_v18 = vadd.f32 %v3174_v20, %v1062_v34 }
 0x30d   :  { %2229 = vrcp.f32 %v3188_v35  ;;  %vm3229_vm11 = vmor %vm1094_vm7, %vm1095_vm4  ;;  %v1115_v61 = vand.u32 2147483648, %v3188_v35  ;;  %v1113_v38 = vand.u32 2147483647, %v3188_v35 }
 0x30e   :  { %v1091_v6 = vsub.f32 1.0, %v1090_v30  ;;  %v1291_v30 = vadd.f32 %v1290_v59, %v3068_v17  ;;  %v1098_v17 = vand.u32 2147483647, %v3165_v32  ;;  %v1100_v59 = vand.u32 2147483648, %v3165_v32  ;;  %vm3259_vm7 = vmor %vm1064_vm5, %vm1065_vm13 }
 0x30f   :  { %v1070_v32 = vand.u32 2147483648, %v3154_v8  ;;  %vm3276_vm5 = vmor %vm1049_vm2, %vm1050_vm3 }
 0x310   :  { %v1092_v29 = vmul.f32 %v3184_v47, %v1091_v6  ;;  %v1068_v6 = vand.u32 2147483647, %v3154_v8  ;;  %vm1099_vm15 = vcmp.eq.f32.partialorder %v1098_v17, 8.507059e+37  ;;  %v1101_v55 = vor.u32 1.1754944e-38, %v1100_v59  ;;  %vm3292_vm2 = vmor %vm1034_vm9, %vm1035_vm6 }
 0x311   :  { %v1086_v17 = vor.u32 1.1754944e-38, %v1085_v11  ;;  %vm1021_vm9 = vmor %vm1019_vm14, %vm1020_vm10  ;;  %v3827_v59 = vand.u32 2147483647, %v3144_v43  ;;  %v1319_v8 = vadd.f32 %v3130_v46, %v2903_v60  ;;  %v1315_v60 = vadd.f32 %v3111_v40, %v2919_v2  ;;  %v1344_v2 = vld [vmem:[%s3756_s15] sm:$0xff]  ;;  %v1345_v40 = vld [vmem:[%s3756_s15 + $0x8] sm:$0xff] }
 0x312   :  { %v1093_v33 = vadd.f32 %v3184_v47, %v1092_v29  ;;  %v1078_v29 = vadd.f32 %v3169_v45, %v1077_v36  ;;  %vm3263_vm8 = vcmp.eq.f32.partialorder %v1068_v6, 8.507059e+37  ;;  %vm3776_vm14 = vcmask 523264  }
 0x313   :  { %v2230_v31 = vpop.eup %2229  ;;  %vm1024_vm10 = vcmp.eq.f32.partialorder %v3827_v59, 8.507059e+37 }
 0x314   :  { %v1105_v21 = vmul.f32 %v2230_v31, %v3188_v35  ;;  %v1097_v16 = vsel %vm3229_vm11, %v3184_v47, %v1093_v33  ;;  %vm1110_vm4 = vweird.f32 %v2230_v31  ;;  %v1082_v33 = vsel %vm3246_vm1, %v3169_v45, %v1078_v29 }
 0x315   :  { %v1102_v34 = vsel %vm1099_vm15, %v1101_v55, %v1097_v16  ;;  %vm1109_vm11 = vweird.f32 %v3188_v35  ;;  %v1067_v55 = vsel %vm3259_vm7, %v3174_v20, %v1063_v18  ;;  %v1294_v45 = vadd.f32 %v1293_v15, %v3060_v7  ;;  %v1348_v7 = vld [vmem:[%s3756_s15 + $0x20] sm:$0xff] }
 0x316   :  { %v1106_v36 = vsub.f32 1.0, %v1105_v21  ;;  %v1048_v21 = vadd.f32 %v3176_v3, %v1047_v25  ;;  %vm1111_vm13 = vmor %vm1109_vm11, %vm1110_vm4  ;;  %v1116_v16 = vor.u32 1.1754944e-38, %v1115_v61  ;;  %v1071_v35 = vor.u32 1.1754944e-38, %v1070_v32 }
 0x317   :  { %vm1114_vm15 = vcmp.eq.f32.partialorder %v1113_v38, 8.507059e+37  ;;  %v1310_v63 = vmul.f32 %v1291_v30, %v1102_v34  ;;  %v1285_v18 = vadd.f32 %v3147_v24, %v3062_v9  ;;  %v1282_v24 = vadd.f32 %v3141_v51, %v3076_v27 }
 0x318   :  { %v1107_v47 = vmul.f32 %v2230_v31, %v1106_v36  ;;  %v1033_v36 = vadd.f32 %v3172_v28, %v1032_v44  ;;  %v1087_v44 = vsel %vm1084_vm12, %v1086_v17, %v1082_v33  ;;  %v1052_v20 = vsel %vm3276_vm5, %v3176_v3, %v1048_v21 }
 0x319   :  { %v1072_v11 = vsel %vm3263_vm8, %v1071_v35, %v1067_v55  ;;  %v1309_v30 = vmul.f32 %v3197_v37, %v1087_v44  ;;  %v3823_v3 = vand.u32 2147483647, %v3156_v26  ;;  %v3825_v32 = vand.u32 2147483648, %v3152_v10  ;;  %v3828_v44 = vld [vmem:[#allocation2_spill] sm:$0xff]  ;;  %v3829_v35 = vld [vmem:[#allocation7_spill] sm:$0xff] }
 0x31a   :  { %v1108_v41 = vadd.f32 %v2230_v31, %v1107_v47  ;;  %v1056_v47 = vor.u32 1.1754944e-38, %v1055_v12  ;;  %v1037_v9 = vsel %vm3292_vm2, %v3172_v28, %v1033_v36  ;;  %v1326_v37 = vadd.f32 %v1310_v63, %v2875_v49  ;;  %v3831_v63 = vld [vmem:[#allocation6_spill] sm:$0xff] }
 0x31b   :  { %vm1054_vm3 = vcmp.eq.f32.partialorder %v3823_v3, 8.507059e+37  ;;  %v1041_v21 = vor.u32 1.1754944e-38, %v3825_v32  ;;  %v1308_v28 = vmul.f32 %v1285_v18, %v1072_v11  ;;  %v1022_v27 = vsel %vm1021_vm9, %v3161_v4, %v3205_v39  ;;  %v3833_v18 = vld [vmem:[#allocation5_spill] sm:$0xff]  ;;  %v1346_v11 = vld [vmem:[%s3756_s15 + $0x10] sm:$0xff] }
 0x31c   :  { %v1112_v6 = vsel %vm1111_vm13, %v2230_v31, %v1108_v41  ;;  %v1057_v12 = vsel %vm1054_vm3, %v1056_v47, %v1052_v20  ;;  %v3824_v31 = vand.u32 2147483647, %v3152_v10  ;;  %v1279_v51 = vadd.f32 %v3134_v42, %v3072_v19  ;;  %v3832_v20 = vld [vmem:[#allocation4_spill] sm:$0xff]  ;;  %v1347_v47 = vld [vmem:[%s3756_s15 + $0x18] sm:$0xff] }
 0x31d   :  { %v1117_v29 = vsel %vm1114_vm15, %v1116_v16, %v1112_v6  ;;  %v3826_v10 = vand.u32 2147483648, %v3144_v43  ;;  %v1325_v34 = vadd.f32 %v1309_v30, %v2879_v50  ;;  %v1307_v17 = vmul.f32 %v1282_v24, %v1057_v12  ;;  %v3830_v6 = vld [vmem:[#allocation3_spill] sm:$0xff]  ;;  %v1350_v30 = vld [vmem:[%s3756_s15 + $0x30] sm:$0xff]  ;;  %v1351_v3 = vld [vmem:[%s3756_s15 + $0x38] sm:$0xff] }
 0x31e   :  { %v1311_v61 = vmul.f32 %v1294_v45, %v1117_v29  ;;  %vm1039_vm6 = vcmp.eq.f32.partialorder %v3824_v31, 8.507059e+37  ;;  %v1276_v49 = vadd.f32 %v3127_v23, %v3066_v13  ;;  %v1342_v4 = vmul.f32 0.70710677, %v1326_v37 }
 0x31f   :  { %v1042_v15 = vsel %vm1039_vm6, %v1041_v21, %v1037_v9  ;;  %v1026_v38 = vor.u32 1.1754944e-38, %v3826_v10  ;;  %v1324_v39 = vadd.f32 %v1308_v28, %v2883_v52  ;;  %v1341_v42 = vmul.f32 0.70710677, %v1325_v34  ;;  %v1393_v28 = vpop.permute.xlu2 %1392 }
 0x320   :  { %v1327_v26 = vadd.f32 %v1311_v61, %v2873_v48  ;;  %v1306_v19 = vmul.f32 %v1279_v51, %v1042_v15  ;;  %v1323_v25 = vadd.f32 %v1307_v17, %v2887_v54  ;;  %v1320_v23 = vadd.f32 %v3136_v22, %v2899_v58  ;;  %v1349_v61 = vld [vmem:[%s3756_s15 + $0x28] sm:$0xff] }
 0x321   :  { %v1027_v48 = vsel %vm1024_vm10, %v1026_v38, %v1022_v27  ;;  %v1340_v50 = vmul.f32 0.70710677, %v1324_v39  ;;  %v1318_v45 = vadd.f32 %v3125_v14, %v2907_v62  ;;  %v1316_v58 = vadd.f32 %v3116_v5, %v2915_v1  ;;  %v1388_v27 = vpop.permute.xlu0 %1387 }
 0x322   :  { %v1343_v33 = vmul.f32 0.70710677, %v1327_v26  ;;  %v1305_v36 = vmul.f32 %v1276_v49, %v1027_v48  ;;  %v1322_v41 = vadd.f32 %v1306_v19, %v2891_v56  ;;  %v1339_v43 = vmul.f32 0.70710677, %v1323_v25  ;;  %v1398_v26 = vpop.permute.xlu1 %1397  ;;  %v1441_v25 = vld [vmem:[%s3757_s17] sm:$0xff] }
 0x323   :  { %v1336_v54 = vmul.f32 0.70710677, %v1320_v23  ;;  %v1335_v56 = vmul.f32 0.70710677, %v1319_v8  ;;  %v1334_v16 = vmul.f32 0.70710677, %v1318_v45  ;;  %v1314_v62 = vadd.f32 %v3829_v35, %v3828_v44 }
 0x324   :  { %1400 = vmatpush.msra.mxu3 %v1343_v33  ;;  %v1321_v55 = vadd.f32 %v1305_v36, %v2895_v57  ;;  %v1338_v13 = vmul.f32 0.70710677, %v1322_v41  ;;  %v1317_v57 = vadd.f32 %v3121_v53, %v2911_v0  ;;  %v1332_v46 = vmul.f32 0.70710677, %v1316_v58  ;;  %v1715_v36 = vld [vmem:[%s3758_s19] sm:$0xff]  ;;  %v1442_v41 = vld [vmem:[%s3757_s17 + $0x8] sm:$0xff] }
 0x325   :  { %v1331_v14 = vmul.f32 0.70710677, %v1315_v60  ;;  %v1313_v0 = vadd.f32 %v3831_v63, %v3830_v6  ;;  %v1330_v53 = vmul.f32 0.70710677, %v1314_v62  ;;  %v1312_v1 = vadd.f32 %v3833_v18, %v3832_v20  ;;  %v1444_v23 = vld [vmem:[%s3757_s17 + $0x18] sm:$0xff]  ;;  %v1445_v8 = vld [vmem:[%s3757_s17 + $0x20] sm:$0xff] }
 0x326   :  { %1401 = vmatpush.msra.mxu3 %v1342_v4  ;;  %v1337_v52 = vmul.f32 0.70710677, %v1321_v55  ;;  %v1333_v22 = vmul.f32 0.70710677, %v1317_v57  ;;  %v1443_v55 = vld [vmem:[%s3757_s17 + $0x10] sm:$0xff]  ;;  %v1446_v45 = vld [vmem:[%s3757_s17 + $0x28] sm:$0xff] }
 0x327   :  { %v1329_v5 = vmul.f32 0.70710677, %v1313_v0  ;;  %v1328_v29 = vmul.f32 0.70710677, %v1312_v1  ;;  %v1378_v33 = vpop.permute.xlu2 %1377  ;;  %v1447_v57 = vld [vmem:[%s3757_s17 + $0x30] sm:$0xff]  ;;  %v1448_v58 = vld [vmem:[%s3757_s17 + $0x38] sm:$0xff] }
 0x328   :  { %1402 = vmatpush.msra.mxu3 %v1341_v42 }
 0x329   :  { %v1373_v48 = vpop.permute.xlu0 %1372 }
 0x32a   :  { %1403 = vmatpush.msra.mxu3 %v1340_v50  ;;  %v1383_v10 = vpop.permute.xlu1 %1382  ;;  %v1722_v50 = vld [vmem:[%s3758_s19 + $0x38] sm:$0xff] }
 0x32c   :  { %1404 = vmatpush.msra.mxu3 %v1339_v43  ;;  %v1716_v43 = vld [vmem:[%s3758_s19 + $0x8] sm:$0xff] }
 0x32e   :  { %1405 = vmatpush.msra.mxu3 %v1338_v13  ;;  %v1717_v13 = vld [vmem:[%s3758_s19 + $0x10] sm:$0xff] }
 0x32f   :  { %v1363_v19 = vpop.permute.xlu2 %1362 }
 0x330   :  { %1406 = vmatpush.msra.mxu3 %v1337_v52  ;;  %v1718_v52 = vld [vmem:[%s3758_s19 + $0x18] sm:$0xff] }
 0x331   :  { %v1495_v44 = vpop.permute.xlu0 %1494 }
 0x332   :  { %1407 = vmatpush.msra.mxu3 %v1336_v54  ;;  %v1368_v4 = vpop.permute.xlu1 %1367  ;;  %v1719_v54 = vld [vmem:[%s3758_s19 + $0x20] sm:$0xff] }
 0x334   :  { %1408 = vmatpush.msra.mxu3 %v1335_v56  ;;  %v1720_v56 = vld [vmem:[%s3758_s19 + $0x28] sm:$0xff] }
 0x336   :  { %1409 = vmatpush.msra.mxu3 %v1334_v16  ;;  %v1721_v16 = vld [vmem:[%s3758_s19 + $0x30] sm:$0xff] }
 0x337   :  { %v1485_v63 = vpop.permute.xlu2 %1484 }
 0x338   :  { %1410 = vmatpush.msra.mxu3 %v1333_v22 }
 0x339   :  { %v1480_v6 = vpop.permute.xlu0 %1479 }
 0x33a   :  { %1411 = vmatpush.msra.mxu3 %v1332_v46  ;;  %v1490_v46 = vpop.permute.xlu1 %1489 }
 0x33c   :  { %1412 = vmatpush.msra.mxu3 %v1331_v14 }
 0x33e   :  { %1413 = vmatpush.msra.mxu3 %v1330_v53 }
 0x340   :  { %1414 = vmatpush.msra.mxu3 %v1329_v5 }
 0x341   :  { %v1465_v18 = vpop.permute.xlu0 %1464 }
 0x342   :  { %1415 = vmatpush.msra.mxu3 %v1328_v29  ;;  %v1475_v62 = vpop.permute.xlu1 %1474 }
 0x343   :  { %1416 = vmatmul.f32.vlgmr.msra.gmra.mxu3 %v1344_v2  ;;  %v1470_v2 = vpop.permute.xlu2 %1469 }
 0x34a   :  { %v1460_v53 = vpop.permute.xlu1 %1459 }
 0x34b   :  { %1419 = vmatmul.f32.gmra.mxu3 %v1345_v40 }
 0x353   :  { %1422 = vmatmul.f32.gmra.mxu3 %v1346_v11 }
 0x35b   :  { %1425 = vmatmul.f32.gmra.mxu3 %v1347_v47 }
 0x363   :  { %1428 = vmatmul.f32.gmra.mxu3 %v1348_v7 }
 0x36b   :  { %1431 = vmatmul.f32.gmra.mxu3 %v1349_v61 }
 0x373   :  { %1434 = vmatmul.f32.gmra.mxu3 %v1350_v30 }
 0x37b   :  { %1437 = vmatmul.f32.gmra.mxu3 %v1351_v3 }
 0x3c6   :  { %v1417_v9 = vpop.f32.mrf.mxu3 }
 0x3c7   :  { %v3403_v42 = vadd.f32 %v1417_v9, %v1363_v19 }
 0x3ce   :  { %v1420_v24 = vpop.f32.mrf.mxu3 }
 0x3cf   :  { %v3398_v39 = vadd.f32 %v1420_v24, %v1368_v4 }
 0x3d6   :  { %v1423_v12 = vpop.f32.mrf.mxu3 }
 0x3d7   :  { %v3393_v49 = vadd.f32 %v1423_v12, %v1373_v48 }
 0x3de   :  { %v1426_v31 = vpop.f32.mrf.mxu3 }
 0x3df   :  { %v3388_v59 = vadd.f32 %v1426_v31, %v1378_v33 }
 0x3e6   :  { %v1429_v32 = vpop.f32.mrf.mxu3 }
 0x3e7   :  { %v3383_v17 = vadd.f32 %v1429_v32, %v1383_v10 }
 0x3ee   :  { %v1432_v21 = vpop.f32.mrf.mxu3 }
 0x3ef   :  { %v3378_v34 = vadd.f32 %v1432_v21, %v1388_v27 }
 0x3f6   :  { %v1435_v37 = vpop.f32.mrf.mxu3 }
 0x3f7   :  { %v3373_v38 = vadd.f32 %v1435_v37, %v1393_v28 }
 0x3fe   :  { %v1438_v51 = vpop.f32.mrf.mxu3 }
 0x3ff   :  { %v3371_v15 = vadd.f32 %v1438_v51, %v1398_v26 }
 0x401   :  { %1530 = vmatpush.msrb.mxu3 %v3371_v15  ;;  %1803 = vmatpush.msra.mxu0 %v3371_v15 }
 0x402   :  { %2134 = vmatpush.msra.mxu1 %v3371_v15 }
 0x403   :  { %1531 = vmatpush.msrb.mxu3 %v3373_v38  ;;  %1804 = vmatpush.msra.mxu0 %v3373_v38 }
 0x404   :  { %2135 = vmatpush.msra.mxu1 %v3373_v38 }
 0x405   :  { %1532 = vmatpush.msrb.mxu3 %v3378_v34  ;;  %1805 = vmatpush.msra.mxu0 %v3378_v34 }
 0x406   :  { %2136 = vmatpush.msra.mxu1 %v3378_v34 }
 0x407   :  { %1533 = vmatpush.msrb.mxu3 %v3383_v17  ;;  %1806 = vmatpush.msra.mxu0 %v3383_v17 }
 0x408   :  { %2137 = vmatpush.msra.mxu1 %v3383_v17 }
 0x409   :  { %1534 = vmatpush.msrb.mxu3 %v3388_v59  ;;  %1807 = vmatpush.msra.mxu0 %v3388_v59 }
 0x40a   :  { %2138 = vmatpush.msra.mxu1 %v3388_v59 }
 0x40b   :  { %1535 = vmatpush.msrb.mxu3 %v3393_v49  ;;  %1808 = vmatpush.msra.mxu0 %v3393_v49 }
 0x40c   :  { %2139 = vmatpush.msra.mxu1 %v3393_v49 }
 0x40d   :  { %1536 = vmatpush.msrb.mxu3 %v3398_v39  ;;  %1809 = vmatpush.msra.mxu0 %v3398_v39 }
 0x40e   :  { %2140 = vmatpush.msra.mxu1 %v3398_v39 }
 0x40f   :  { %1537 = vmatpush.msrb.mxu3 %v3403_v42  ;;  %1810 = vmatpush.msra.mxu0 %v3403_v42 }
 0x410   :  { %2141 = vmatpush.msra.mxu1 %v3403_v42  ;;  %2100 = vmatmul.msk.f32.vlgmr.msrb.gmra.mxu3 %vm3776_vm14, %v1441_v25 }
 0x411   :  { %2116 = vmatmul.msk.f32.vlgmr.msra.gmra.mxu0 %vm3776_vm14, %v1715_v36  ;;  %2123 = vmatmul.msk.f32.vlgmr.msra.gmra.mxu1 %vm3776_vm14, %v1722_v50 }
 0x418   :  { %2101 = vmatmul.msk.f32.gmra.mxu3 %vm3776_vm14, %v1442_v41 }
 0x419   :  { %2117 = vmatmul.msk.f32.gmra.mxu0 %vm3776_vm14, %v1716_v43 }
 0x420   :  { %2102 = vmatmul.msk.f32.gmra.mxu3 %vm3776_vm14, %v1443_v55 }
 0x421   :  { %2118 = vmatmul.msk.f32.gmra.mxu0 %vm3776_vm14, %v1717_v13 }
 0x428   :  { %2103 = vmatmul.msk.f32.gmra.mxu3 %vm3776_vm14, %v1444_v23 }
 0x429   :  { %2119 = vmatmul.msk.f32.gmra.mxu0 %vm3776_vm14, %v1718_v52 }
 0x430   :  { %2104 = vmatmul.msk.f32.gmra.mxu3 %vm3776_vm14, %v1445_v8 }
 0x431   :  { %2120 = vmatmul.msk.f32.gmra.mxu0 %vm3776_vm14, %v1719_v54 }
 0x438   :  { %2105 = vmatmul.msk.f32.gmra.mxu3 %vm3776_vm14, %v1446_v45 }
 0x439   :  { %2121 = vmatmul.msk.f32.gmra.mxu0 %vm3776_vm14, %v1720_v56 }
 0x440   :  { %2106 = vmatmul.msk.f32.gmra.mxu3 %vm3776_vm14, %v1447_v57 }
 0x441   :  { %2122 = vmatmul.msk.f32.gmra.mxu0 %vm3776_vm14, %v1721_v16 }
 0x448   :  { %2107 = vmatmul.msk.f32.gmra.mxu3 %vm3776_vm14, %v1448_v58 }
 0x48e   :  { %v3475_v14 = vpop.f32.mrf.mxu0 }
 0x493   :  { %v1539_v22 = vpop.f32.mrf.mxu3 }
 0x494   :  { %v1540_v1 = vadd.f32 %v1539_v22, %v1460_v53 }
 0x496   :  { %v3477_v20 = vpop.f32.mrf.mxu0  ;;  %v2108_v40 = vmul.f32 -1.442695, %v1540_v1  ;;  %v1769_v1 = vpop.permute.xlu2 %1768 }
 0x498   :  { %2231 = vpow2.f32 %v2108_v40 }
 0x49b   :  { %v1542_v60 = vpop.f32.mrf.mxu3 }
 0x49c   :  { %v1543_v5 = vadd.f32 %v1542_v60, %v1465_v18 }
 0x49e   :  { %v2109_v11 = vmul.f32 -1.442695, %v1543_v5  ;;  %v3479_v30 = vpop.f32.mrf.mxu0  ;;  %v2232_v21 = vpop.eup %2231 }
 0x49f   :  { %v3481_v37 = vadd.f32 1.0, %v2232_v21 }
 0x4a0   :  { %2233 = vpow2.f32 %v2109_v11 }
 0x4a1   :  { %vm1600_vm0 = vweird.f32 %v3481_v37 }
 0x4a3   :  { %v1545_v35 = vpop.f32.mrf.mxu3 }
 0x4a4   :  { %v1546_v47 = vadd.f32 %v1545_v35, %v1470_v2 }
 0x4a6   :  { %v2110_v3 = vmul.f32 -1.442695, %v1546_v47  ;;  %v2234_v26 = vpop.eup %2233  ;;  %v3485_v10 = vpop.f32.mrf.mxu0 }
 0x4a7   :  { %v3483_v28 = vadd.f32 1.0, %v2234_v26  ;;  %v1759_v26 = vpop.permute.xlu1 %1758 }
 0x4a8   :  { %2235 = vpow2.f32 %v2110_v3 }
 0x4a9   :  { %v1621_v21 = vand.u32 2147483648, %v3483_v28  ;;  %vm1615_vm9 = vweird.f32 %v3483_v28 }
 0x4ab   :  { %v1548_v0 = vpop.f32.mrf.mxu3 }
 0x4ac   :  { %v1549_v61 = vadd.f32 %v1548_v0, %v1475_v62 }
 0x4ae   :  { %v2111_v31 = vmul.f32 -1.442695, %v1549_v61  ;;  %v2236_v51 = vpop.eup %2235  ;;  %v3505_v54 = vpop.f32.mrf.mxu0 }
 0x4af   :  { %v3491_v50 = vadd.f32 1.0, %v2236_v51 }
 0x4b1   :  { %v1634_v51 = vand.u32 2147483647, %v3491_v50  ;;  %vm1630_vm13 = vweird.f32 %v3491_v50 }
 0x4b3   :  { %v1551_v29 = vpop.f32.mrf.mxu3 }
 0x4b4   :  { %v1552_v7 = vadd.f32 %v1551_v29, %v1480_v6  ;;  %v1833_v6 = vpop.f32.mrf.mxu1 }
 0x4b5   :  { %v3535_v40 = vadd.f32 %v1833_v6, %v1769_v1 }
 0x4b6   :  { %v2112_v9 = vmul.f32 -1.442695, %v1552_v7  ;;  %v1827_v11 = vpop.f32.mrf.mxu0 }
 0x4b8   :  { %2237 = vpow2.f32 %v2112_v9  ;;  %v1604_v9 = vand.u32 2147483647, %v3481_v37 }
 0x4bb   :  { %v1554_v24 = vpop.f32.mrf.mxu3 }
 0x4bc   :  { %v1555_v12 = vadd.f32 %v1554_v24, %v1485_v63  ;;  %v1606_v24 = vand.u32 2147483648, %v3481_v37 }
 0x4be   :  { %v2113_v32 = vmul.f32 -1.442695, %v1555_v12  ;;  %v2238_v48 = vpop.eup %2237 }
 0x4bf   :  { %v3493_v41 = vadd.f32 1.0, %v2238_v48 }
 0x4c0   :  { %2239 = vpow2.f32 %v2113_v32  ;;  %v1619_v32 = vand.u32 2147483647, %v3483_v28 }
 0x4c1   :  { %2241 = vpow2.f32 %v2111_v31  ;;  %vm1660_vm8 = vweird.f32 %v3493_v41 }
 0x4c2   :  { %2243 = vrcp.f32 %v3481_v37 }
 0x4c3   :  { %v1557_v27 = vpop.f32.mrf.mxu3  ;;  %2245 = vrcp.f32 %v3483_v28 }
 0x4c4   :  { %v1558_v33 = vadd.f32 %v1557_v27, %v1490_v46 }
 0x4c6   :  { %v2240_v4 = vpop.eup %2239  ;;  %v2114_v19 = vmul.f32 -1.442695, %v1558_v33  ;;  %v1636_v33 = vand.u32 2147483648, %v3491_v50 }
 0x4c7   :  { %v2242_v25 = vpop.eup %2241  ;;  %v3489_v36 = vadd.f32 1.0, %v2240_v4  ;;  %v3550_v4 = vadd.f32 %v1827_v11, %v1759_v26  ;;  %v1830_v11 = vpop.f32.mrf.mxu0 }
 0x4c8   :  { %2247 = vpow2.f32 %v2114_v19  ;;  %v3495_v43 = vadd.f32 1.0, %v2242_v25  ;;  %v3498_v13 = vpop.eup %2243 }
 0x4c9   :  { %2249 = vrcp.f32 %v3489_v36  ;;  %v3501_v52 = vpop.eup %2245  ;;  %v1596_v56 = vmul.f32 %v3498_v13, %v3481_v37  ;;  %vm1675_vm3 = vweird.f32 %v3489_v36  ;;  %vm1601_vm10 = vweird.f32 %v3498_v13 }
 0x4ca   :  { %2251 = vrcp.f32 %v3491_v50  ;;  %v1611_v16 = vmul.f32 %v3501_v52, %v3483_v28  ;;  %vm1645_vm1 = vweird.f32 %v3495_v43  ;;  %vm1616_vm15 = vweird.f32 %v3501_v52 }
 0x4cb   :  { %v1560_v55 = vpop.f32.mrf.mxu3  ;;  %2253 = vrcp.f32 %v3493_v41  ;;  %v1597_v46 = vsub.f32 1.0, %v1596_v56 }
 0x4cc   :  { %v1561_v23 = vadd.f32 %v1560_v55, %v1495_v44  ;;  %2255 = vrcp.f32 %v3495_v43  ;;  %v1612_v35 = vsub.f32 1.0, %v1611_v16 }
 0x4cd   :  { %v1598_v2 = vmul.f32 %v3498_v13, %v1597_v46 }
 0x4ce   :  { %v2248_v8 = vpop.eup %2247  ;;  %v2115_v45 = vmul.f32 -1.442695, %v1561_v23  ;;  %v1613_v61 = vmul.f32 %v3501_v52, %v1612_v35  ;;  %v1764_v23 = vpop.permute.xlu0 %1763 }
 0x4cf   :  { %v3509_v57 = vadd.f32 1.0, %v2248_v8  ;;  %v3513_v58 = vpop.eup %2249  ;;  %v3548_v48 = vadd.f32 %v3498_v13, %v1598_v2  ;;  %v1649_v8 = vand.u32 2147483647, %v3495_v43  ;;  %v1681_v2 = vand.u32 2147483648, %v3489_v36 }
 0x4d0   :  { %2257 = vpow2.f32 %v2115_v45  ;;  %v3516_v22 = vpop.eup %2251  ;;  %v1671_v62 = vmul.f32 %v3513_v58, %v3489_v36  ;;  %v3555_v55 = vadd.f32 %v3501_v52, %v1613_v61  ;;  %v1651_v45 = vand.u32 2147483648, %v3495_v43 }
 0x4d1   :  { %2259 = vrcp.f32 %v3509_v57  ;;  %v3518_v60 = vpop.eup %2253  ;;  %v1626_v63 = vmul.f32 %v3516_v22, %v3491_v50  ;;  %vm1631_vm11 = vweird.f32 %v3516_v22  ;;  %v1696_v6 = vand.u32 2147483648, %v3509_v57 }
 0x4d2   :  { %v3520_v44 = vpop.eup %2255  ;;  %v1656_v53 = vmul.f32 %v3518_v60, %v3493_v41  ;;  %v1672_v47 = vsub.f32 1.0, %v1671_v62  ;;  %v1694_v62 = vand.u32 2147483647, %v3509_v57  ;;  %vm1690_vm12 = vweird.f32 %v3509_v57 }
 0x4d3   :  { %v1641_v5 = vmul.f32 %v3520_v44, %v3495_v43  ;;  %v1627_v3 = vsub.f32 1.0, %v1626_v63  ;;  %vm1646_vm4 = vweird.f32 %v3520_v44  ;;  %v1664_v63 = vand.u32 2147483647, %v3493_v41 }
 0x4d4   :  { %v1657_v12 = vsub.f32 1.0, %v1656_v53  ;;  %v1673_v25 = vmul.f32 %v3513_v58, %v1672_v47  ;;  %vm1676_vm5 = vweird.f32 %v3513_v58  ;;  %vm1661_vm6 = vweird.f32 %v3518_v60 }
 0x4d5   :  { %v1642_v27 = vsub.f32 1.0, %v1641_v5  ;;  %v1628_v56 = vmul.f32 %v3516_v22, %v1627_v3  ;;  %v1679_v61 = vand.u32 2147483647, %v3489_v36 }
 0x4d6   :  { %v2258_v0 = vpop.eup %2257  ;;  %v1658_v46 = vmul.f32 %v3518_v60, %v1657_v12  ;;  %v1674_v1 = vadd.f32 %v3513_v58, %v1673_v25 }
 0x4d7   :  { %v3528_v18 = vpop.eup %2259  ;;  %v3532_v29 = vadd.f32 1.0, %v2258_v0  ;;  %v1643_v0 = vmul.f32 %v3520_v44, %v1642_v27  ;;  %v1754_v27 = vpop.permute.xlu2 %1753  ;;  %vm1680_vm14 = vcmp.eq.f32.partialorder %v1679_v61, 8.507059e+37  ;;  %v1652_v61 = vor.u32 1.1754944e-38, %v1651_v45 }
 0x4d8   :  { %v1686_v7 = vmul.f32 %v3528_v18, %v3509_v57  ;;  %vm1691_vm7 = vweird.f32 %v3528_v18  ;;  %v1666_v57 = vand.u32 2147483648, %v3493_v41  ;;  %v1659_v3 = vadd.f32 %v3518_v60, %v1658_v46  ;;  %v1984_v41 = vld [vmem:[%s3761_s25] sm:$0xff] }
 0x4d9   :  { %2261 = vrcp.f32 %v3532_v29  ;;  %vm3579_vm2 = vmor %vm1690_vm12, %vm1691_vm7  ;;  %v1711_v12 = vand.u32 2147483648, %v3532_v29  ;;  %vm1695_vm7 = vcmp.eq.f32.partialorder %v1694_v62, 8.507059e+37  ;;  %v1682_v62 = vor.u32 1.1754944e-38, %v1681_v2 }
 0x4da   :  { %v1687_v31 = vsub.f32 1.0, %v1686_v7  ;;  %vm3597_vm12 = vmor %vm1675_vm3, %vm1676_vm5  ;;  %vm1705_vm3 = vweird.f32 %v3532_v29 }
 0x4db   :  { %v1678_v25 = vsel %vm3597_vm12, %v3513_v58, %v1674_v1  ;;  %vm3611_vm5 = vmor %vm1660_vm8, %vm1661_vm6  ;;  %vm1665_vm6 = vcmp.eq.f32.partialorder %v1664_v63, 8.507059e+37 }
 0x4dc   :  { %v1688_v19 = vmul.f32 %v3528_v18, %v1687_v31  ;;  %v1697_v31 = vor.u32 1.1754944e-38, %v1696_v6  ;;  %v1663_v58 = vsel %vm3611_vm5, %v3518_v60, %v1659_v3  ;;  %v1683_v1 = vsel %vm1680_vm14, %v1682_v62, %v1678_v25  ;;  %vm3639_vm14 = vmor %vm1630_vm13, %vm1631_vm11 }
 0x4dd   :  { %v1637_v3 = vor.u32 1.1754944e-38, %v1636_v33  ;;  %vm3659_vm11 = vmor %vm1615_vm9, %vm1616_vm15  ;;  %vm1620_vm13 = vcmp.eq.f32.partialorder %v1619_v32, 8.507059e+37  ;;  %vm3848_vm9 = vcmask 523264  }
 0x4de   :  { %v1689_v16 = vadd.f32 %v3528_v18, %v1688_v19  ;;  %v1709_v19 = vand.u32 2147483647, %v3532_v29  ;;  %v1618_v50 = vsel %vm3659_vm11, %v3501_v52, %v3555_v55  ;;  %vm3678_vm15 = vmor %vm1600_vm0, %vm1601_vm10  ;;  %v1607_v55 = vor.u32 1.1754944e-38, %v1606_v24 }
 0x4df   :  { %v2262_v35 = vpop.eup %2261  ;;  %v1603_v32 = vsel %vm3678_vm15, %v3498_v13, %v3548_v48  ;;  %vm1605_vm0 = vcmp.eq.f32.partialorder %v1604_v9, 8.507059e+37  ;;  %vm3849_vm10 = vmmov %vm3848_vm9 }
 0x4e0   :  { %v1701_v53 = vmul.f32 %v2262_v35, %v3532_v29  ;;  %v1693_v7 = vsel %vm3579_vm2, %v3528_v18, %v1689_v16  ;;  %v1644_v18 = vadd.f32 %v3520_v44, %v1643_v0  ;;  %vm1706_vm2 = vweird.f32 %v2262_v35 }
 0x4e1   :  { %v1831_v16 = vadd.f32 %v1830_v11, %v1764_v23  ;;  %v1698_v46 = vsel %vm1695_vm7, %v1697_v31, %v1693_v7  ;;  %v1629_v0 = vadd.f32 %v3516_v22, %v1628_v56  ;;  %vm3624_vm7 = vmor %vm1645_vm1, %vm1646_vm4  ;;  %v1749_v23 = vpop.permute.xlu0 %1748  ;;  %v1712_v56 = vor.u32 1.1754944e-38, %v1711_v12 }
 0x4e2   :  { %v1702_v47 = vsub.f32 1.0, %v1701_v53  ;;  %vm1707_vm8 = vmor %vm1705_vm3, %vm1706_vm2  ;;  %v1667_v29 = vor.u32 1.1754944e-38, %v1666_v57  ;;  %vm1710_vm12 = vcmp.eq.f32.partialorder %v1709_v19, 8.507059e+37  ;;  %v1648_v60 = vsel %vm3624_vm7, %v3520_v44, %v1644_v18 }
 0x4e3   :  { %v1842_v2 = vmul.f32 %v1831_v16, %v1698_v46  ;;  %v1825_v11 = vadd.f32 %v3505_v54, %v1754_v27  ;;  %v1841_v57 = vmul.f32 %v3550_v4, %v1683_v1  ;;  %vm1650_vm1 = vcmp.eq.f32.partialorder %v1649_v8, 8.507059e+37 }
 0x4e4   :  { %v1703_v36 = vmul.f32 %v2262_v35, %v1702_v47  ;;  %v1668_v7 = vsel %vm1665_vm6, %v1667_v29, %v1663_v58  ;;  %v1633_v54 = vsel %vm3639_vm14, %v3516_v22, %v1629_v0  ;;  %v1822_v44 = vadd.f32 %v3485_v10, %v1749_v23  ;;  %v1903_v58 = vld [vmem:[%s3760_s23] sm:$0xff]  ;;  %v1904_v23 = vld [vmem:[%s3760_s23 + $0x8] sm:$0xff] }
 0x4e5   :  { %v1653_v45 = vsel %vm1650_vm1, %v1652_v61, %v1648_v60  ;;  %vm1635_vm4 = vcmp.eq.f32.partialorder %v1634_v51, 8.507059e+37  ;;  %v1850_v10 = vadd.f32 %v1842_v2, %v3373_v38  ;;  %v1840_v4 = vmul.f32 %v1825_v11, %v1668_v7  ;;  %v1739_v38 = vpop.permute.xlu2 %1738 }
 0x4e6   :  { %v1704_v53 = vadd.f32 %v2262_v35, %v1703_v36  ;;  %v1638_v33 = vsel %vm1635_vm4, %v1637_v3, %v1633_v54  ;;  %v1622_v8 = vor.u32 1.1754944e-38, %v1621_v21  ;;  %v1849_v52 = vadd.f32 %v1841_v57, %v3378_v34 }
 0x4e7   :  { %v1816_v28 = vadd.f32 %v3477_v20, %v1739_v38  ;;  %v1858_v31 = vmul.f32 0.70710677, %v1850_v10  ;;  %v1848_v26 = vadd.f32 %v1840_v4, %v3383_v17  ;;  %v1608_v27 = vsel %vm1605_vm0, %v1607_v55, %v1603_v32 }
 0x4e8   :  { %v1708_v5 = vsel %vm1707_vm8, %v2262_v35, %v1704_v53  ;;  %v1623_v21 = vsel %vm1620_vm13, %v1622_v8, %v1618_v50  ;;  %v1857_v13 = vmul.f32 0.70710677, %v1849_v52  ;;  %vm3850_vm2 = vcmask 130048  }
 0x4e9   :  { %v1713_v47 = vsel %vm1710_vm12, %v1712_v56, %v1708_v5  ;;  %v1734_v34 = vpop.permute.xlu0 %1733  ;;  %v1837_v48 = vmul.f32 %v1816_v28, %v1623_v21  ;;  %v1856_v19 = vmul.f32 0.70710677, %v1848_v26  ;;  %vm3851_vm5 = vmmov %vm3850_vm2  ;;  %v1985_v56 = vld [vmem:[%s3761_s25 + $0x8] sm:$0xff]  ;;  %vm2033_vm4 = vcmask 15360  }
 0x4ea   :  { %v1843_v35 = vmul.f32 %v3535_v40, %v1713_v47  ;;  %v1744_v40 = vpop.permute.xlu1 %1743  ;;  %v1813_v36 = vadd.f32 %v3475_v14, %v1734_v34  ;;  %vm3852_vm3 = vmmov %vm3850_vm2 }
 0x4eb   :  { %v1819_v51 = vadd.f32 %v3479_v30, %v1744_v40  ;;  %v1839_v30 = vmul.f32 %v1822_v44, %v1653_v45  ;;  %v1845_v16 = vadd.f32 %v1837_v48, %v3398_v39  ;;  %vm3853_vm7 = vmmov %vm3850_vm2 }
 0x4ec   :  { %v1851_v22 = vadd.f32 %v1843_v35, %v3371_v15  ;;  %v1836_v25 = vmul.f32 %v1813_v36, %v1608_v27 }
 0x4ed   :  { %v1838_v18 = vmul.f32 %v1819_v51, %v1638_v33  ;;  %v1847_v20 = vadd.f32 %v1839_v30, %v3388_v59  ;;  %v1853_v14 = vmul.f32 0.70710677, %v1845_v16  ;;  %v1860_v59 = vld [vmem:[%s3759_s21] sm:$0xff]  ;;  %v1867_v0 = vpop.permute.xlu2 %1866 }
 0x4ee   :  { %v1859_v12 = vmul.f32 0.70710677, %v1851_v22  ;;  %v1844_v9 = vadd.f32 %v1836_v25, %v3403_v42 }
 0x4ef   :  { %v1846_v24 = vadd.f32 %v1838_v18, %v3393_v49  ;;  %v1855_v17 = vmul.f32 0.70710677, %v1847_v20  ;;  %v1861_v49 = vld [vmem:[%s3759_s21 + $0x8] sm:$0xff] }
 0x4f0   :  { %1888 = vmatpush.msrb.mxu2 %v1859_v12  ;;  %v1852_v46 = vmul.f32 0.70710677, %v1844_v9 }
 0x4f1   :  { %v1854_v37 = vmul.f32 0.70710677, %v1846_v24  ;;  %v1910_v1 = vpop.permute.xlu0 %1909 }
 0x4f2   :  { %1889 = vmatpush.msrb.mxu2 %v1858_v31  ;;  %v1872_v62 = vpop.permute.xlu1 %1871 }
 0x4f4   :  { %1890 = vmatpush.msrb.mxu2 %v1857_v13 }
 0x4f5   :  { %v1991_v50 = vpop.permute.xlu2 %1990 }
 0x4f6   :  { %1891 = vmatpush.msrb.mxu2 %v1856_v19 }
 0x4f8   :  { %1892 = vmatpush.msrb.mxu2 %v1855_v17 }
 0x4f9   :  { %v1996_v18 = vpop.permute.xlu0 %1995 }
 0x4fa   :  { %1893 = vmatpush.msrb.mxu2 %v1854_v37  ;;  %v1915_v60 = vpop.permute.xlu1 %1914 }
 0x4fc   :  { %1894 = vmatpush.msrb.mxu2 %v1853_v14 }
 0x4fe   :  { %1895 = vmatpush.msrb.mxu2 %v1852_v46 }
 0x4ff   :  { %2124 = vmatmul.msk.f32.vlgmr.msrb.gmra.mxu2 %vm3848_vm9, %v1860_v59 }
 0x507   :  { %2125 = vmatmul.msk.f32.gmra.mxu2 %vm3849_vm10, %v1861_v49 }
 0x582   :  { %v1897_v39 = vpop.f32.mrf.mxu2 }
 0x583   :  { %v1898_v53 = vadd.f32 %v1897_v39, %v1867_v0 }
 0x58a   :  { %v1900_v42 = vpop.f32.mrf.mxu2 }
 0x58b   :  { %v3706_v6 = vadd.f32 %v1900_v42, %v1872_v62 }
 0x58d   :  { %1937 = vmatpush.msrb.mxu1 %v3706_v6  ;;  %2018 = vmatpush.msra.mxu3 %v3706_v6 }
 0x58f   :  { %1938 = vmatpush.msrb.mxu1 %v1898_v53  ;;  %2019 = vmatpush.msra.mxu3 %v1898_v53 }
 0x590   :  { %2126 = vmatmul.msk.f32.vlgmr.msrb.gmra.mxu1 %vm3850_vm2, %v1903_v58  ;;  %2130 = vmatmul.msk.f32.vlgmr.msra.gmra.mxu3 %vm3851_vm5, %v1984_v41 }
 0x598   :  { %2127 = vmatmul.msk.f32.gmra.mxu1 %vm3852_vm3, %v1904_v23  ;;  %2131 = vmatmul.msk.f32.gmra.mxu3 %vm3853_vm7, %v1985_v56 }
 0x60d   :  { %v1940_v29 = vpop.f32.mrf.mxu1 }
 0x60e   :  { %v1941_v5 = vadd.f32 %v1940_v29, %v1910_v1 }
 0x610   :  { %v2128_v2 = vmul.f32 -1.442695, %v1941_v5 }
 0x612   :  { %2263 = vpow2.f32 %v2128_v2 }
 0x613   :  { %v2021_v43 = vpop.f32.mrf.mxu3 }
 0x614   :  { %v2022_v8 = vadd.f32 %v2021_v43, %v1991_v50 }
 0x615   :  { %v1943_v11 = vpop.f32.mrf.mxu1 }
 0x616   :  { %v1944_v47 = vadd.f32 %v1943_v11, %v1915_v60 }
 0x618   :  { %v2264_v7 = vpop.eup %2263  ;;  %v2129_v61 = vmul.f32 -1.442695, %v1944_v47 }
 0x619   :  { %v1952_v63 = vadd.f32 1.0, %v2264_v7 }
 0x61a   :  { %2265 = vpow2.f32 %v2129_v61 }
 0x61b   :  { %2267 = vrcp.f32 %v1952_v63  ;;  %v1965_v3 = vand.u32 2147483648, %v1952_v63  ;;  %v1963_v22 = vand.u32 2147483647, %v1952_v63  ;;  %vm1959_vm6 = vweird.f32 %v1952_v63  ;;  %v2024_v55 = vpop.f32.mrf.mxu3 }
 0x61c   :  { %v2025_v36 = vadd.f32 %v2024_v55, %v1996_v18 }
 0x61d   :  { %v1966_v51 = vor.u32 1.1754944e-38, %v1965_v3  ;;  %vm1964_vm14 = vcmp.eq.f32.partialorder %v1963_v22, 8.507059e+37 }
 0x620   :  { %v2266_v35 = vpop.eup %2265 }
 0x621   :  { %v2268_v57 = vpop.eup %2267  ;;  %v1953_v54 = vadd.f32 1.0, %v2266_v35 }
 0x622   :  { %v1955_v44 = vmul.f32 %v2268_v57, %v1952_v63  ;;  %vm1960_vm8 = vweird.f32 %v2268_v57 }
 0x623   :  { %2269 = vrcp.f32 %v1953_v54  ;;  %vm1961_vm12 = vmor %vm1959_vm6, %vm1960_vm8  ;;  %v1980_v30 = vand.u32 2147483648, %v1953_v54  ;;  %v1978_v21 = vand.u32 2147483647, %v1953_v54  ;;  %vm1974_vm11 = vweird.f32 %v1953_v54 }
 0x624   :  { %v1956_v45 = vsub.f32 1.0, %v1955_v44 }
 0x625   :  { %v1981_v34 = vor.u32 1.1754944e-38, %v1980_v30  ;;  %vm1979_vm15 = vcmp.eq.f32.partialorder %v1978_v21, 8.507059e+37 }
 0x626   :  { %v1957_v40 = vmul.f32 %v2268_v57, %v1956_v45 }
 0x628   :  { %v1958_v10 = vadd.f32 %v2268_v57, %v1957_v40 }
 0x629   :  { %v2270_v4 = vpop.eup %2269 }
 0x62a   :  { %v1962_v33 = vsel %vm1961_vm12, %v2268_v57, %v1958_v10  ;;  %v1970_v15 = vmul.f32 %v2270_v4, %v1953_v54  ;;  %vm1975_vm1 = vweird.f32 %v2270_v4 }
 0x62b   :  { %v1967_v38 = vsel %vm1964_vm14, %v1966_v51, %v1962_v33  ;;  %vm1976_vm13 = vmor %vm1974_vm11, %vm1975_vm1 }
 0x62c   :  { %v2027_v12 = vmul.f32 %v2022_v8, %v1967_v38  ;;  %v1971_v52 = vsub.f32 1.0, %v1970_v15 }
 0x62e   :  { %v2029_v32 = vadd.f32 %v2027_v12, %v1898_v53  ;;  %v1972_v28 = vmul.f32 %v2270_v4, %v1971_v52 }
 0x630   :  { %v2031_v31 = vmul.f32 0.70710677, %v2029_v32  ;;  %v1973_v26 = vadd.f32 %v2270_v4, %v1972_v28 }
 0x632   :  { %2034 = vst.msk [vmem:[%s3762_s27] sm:$0xff] %vm2033_vm4, %v2031_v31  ;;  %v1977_v27 = vsel %vm1976_vm13, %v2270_v4, %v1973_v26 }
 0x633   :  { %v1982_v13 = vsel %vm1979_vm15, %v1981_v34, %v1977_v27 }
 0x634   :  { %v2028_v20 = vmul.f32 %v2025_v36, %v1982_v13 }
 0x636   :  { %v2030_v48 = vadd.f32 %v2028_v20, %v3706_v6 }
 0x638   :  { %v2032_v19 = vmul.f32 0.70710677, %v2030_v48 }
 0x63a   :  { %2035 = vst.msk [vmem:[%s3762_s27 + $0x8] sm:$0xff] %vm2033_vm4, %v2032_v19 }

</bundles_post_ra>
